<compile_context>
chip_gen: v5e
topology: v5e:2x2
jax: 0.10.0
libtpu: 0.0.40
codegen_flags: <defaults>
</compile_context>

<pallas_src>
import functools

import jax
import jax.numpy as jnp
import numpy as np
from jax.experimental import pallas as pl
from jax.experimental.pallas import tpu as pltpu

VOCAB_SIZE = 32
EMBED_DIM = 16
HIDDEN_DIM = 32
N_LAYERS = 2
CELL_TYPE = "GRU"
DROPOUT = 0.0  # n_layers > 1 but p = 0.0 -> inter-layer dropout is identity


def _pad128(n):
    return ((n + 127) // 128) * 128


# ------------------------------------------------------------------ kernel ---
def attn_decoder_kernel(trg_ref, h0_ref, enc_ref, w_ref, out_ref, oc_ref,
                        *, offs, T, B, S, H, V, L, att_off, hid_off):
    """trg_ref: [T*B, 1] int32 (row = t*B + b);  h0_ref: [L, B, H] f32;
    enc_ref: [B*S, H] f32 (row = b*S + s);  w_ref: packed [R, 4H] bf16 slab.
    out_ref: merged lane-dense [B, out_w] f32 output.
    oc_ref:  [T*B, 2H] f32 VMEM scratch holding [rnn_out ; context] per step."""
    f32, bf16 = jnp.float32, jnp.bfloat16
    BS = B * S

    def w(name):                                   # load a slab piece (bf16)
        o, r = offs[name]
        return w_ref[o:o + r, :]

    def bdot(a, b_bf):                             # bf16 MXU matmul, f32 accum
        return jnp.dot(a.astype(bf16), b_bf, preferred_element_type=f32)

    # ---------------- hoisted (step-independent) pre-computation ----------------
    out_ref[...] = jnp.zeros_like(out_ref)

    attn_blk = w("attn_blk")                       # [H, 4H] bf16
    wa_h_bf = attn_blk[:, 0:H]                     # hidden part of attention linear
    wa_e_bf = attn_blk[:, H:2 * H]                 # encoder part
    vec = w("vec")                                 # [1, 4H] bf16
    b_attn = vec[:, 0:H].astype(f32)               # [1, H]
    v_bf = vec[:, H:2 * H]                         # [1, H]   attention 'v'

    # Embedding lookup fused with the layer-0 input-gate projection: ONE matmul,
    # layer-0 (input+hidden) biases already folded into the bias row.
    ids = trg_ref[...]                                                    # [T*B, 1]
    onehot = (ids == jax.lax.broadcasted_iota(jnp.int32, (T * B, V), 1)).astype(bf16)
    gi0e = jnp.dot(onehot, w("m0e"), preferred_element_type=f32) \
        + w("b0").astype(f32)                                             # [T*B, 4H]

    # Encoder part of the attention energy (ONE matmul) + bf16 encoder copy.
    enc_bf = enc_ref[...].astype(bf16)                                    # [B*S, H]
    ee = jnp.dot(enc_bf, wa_e_bf, preferred_element_type=f32) + b_attn    # [B*S, H]

    # Block-diagonal lane mask: row b owns lanes [b*S, (b+1)*S).
    r_idx = jax.lax.broadcasted_iota(jnp.int32, (B, BS), 0)
    c_idx = jax.lax.broadcasted_iota(jnp.int32, (B, BS), 1)
    bd_mask = (c_idx >= r_idx * S) & (c_idx < (r_idx + 1) * S)            # bool [B, BS]

    w_fused = [w(f"w{l}f") for l in range(L)]      # per-layer fused [2H, 4H] bf16
    b_rows = [w(f"b{l}").astype(f32) for l in range(1, L)]

    h = [h0_ref[l] for l in range(L)]              # L x [B, H] f32

    # --------------------------- decode loop (unrolled) ---------------------------
    for t in range(T):
        # ---- attention over encoder outputs (batched over B) ----
        eh = bdot(h[L - 1], wa_h_bf)                                      # [B, H]
        energy = jnp.tanh(jnp.concatenate(
            [ee[b * S:(b + 1) * S] + eh[b:b + 1, :] for b in range(B)],
            axis=0))                                                      # [B*S, H]
        scores = jax.lax.dot_general(                                     # [1, B*S]
            v_bf, energy.astype(bf16),
            dimension_numbers=(((1,), (1,)), ((), ())),
            preferred_element_type=f32)
        # masked softmax in "spread" [B, B*S] layout (off-diagonal lanes -> 0)
        sc = jnp.where(bd_mask, jnp.broadcast_to(scores, (B, BS)), -1e30)
        m = jnp.max(sc, axis=-1, keepdims=True)
        p = jnp.exp(sc - m)
        aw_bd = p * pl.reciprocal(jnp.sum(p, axis=-1, keepdims=True), approx=True)
        context = bdot(aw_bd, enc_bf)                                     # [B, H]

        # compact [B, S] attention weights (off-diagonal segments are exact zeros)
        aw = aw_bd[:, 0:S]
        for b in range(1, B):
            aw = aw + aw_bd[:, b * S:(b + 1) * S]
        out_ref[:, att_off + t * S: att_off + (t + 1) * S] = aw

        # ---- fused GRU stack: ONE [B,2H]x[2H,4H] matmul per layer ----
        x = context                    # layer-0 gets only the context part here;
        for l in range(L):             # the embedding part is already in gi0e.
            h_prev = h[l]
            g = bdot(jnp.concatenate([x, h_prev], axis=1), w_fused[l])    # [B, 4H]
            g = g + (gi0e[t * B:(t + 1) * B] if l == 0 else b_rows[l - 1])
            r = jax.nn.sigmoid(g[:, 0:H])
            z = jax.nn.sigmoid(g[:, H:2 * H])
            n = jnp.tanh(g[:, 2 * H:3 * H] + r * g[:, 3 * H:4 * H])
            h[l] = (1.0 - z) * n + z * h_prev
            x = h[l]

        # stash [rnn_out ; context] for the hoisted fc (short live ranges)
        oc_ref[t * B:(t + 1) * B, :] = jnp.concatenate([x, context], axis=1)

    # ------------------- epilogue: hoisted fc + lane-dense stores -------------------
    wfc_bf = jnp.concatenate([attn_blk[:, 2 * H:3 * H], attn_blk[:, 3 * H:4 * H]],
                             axis=0)                                      # [2H, V]
    b_fc = vec[:, 2 * H:3 * H].astype(f32)
    logits_tm = bdot(oc_ref[...], wfc_bf) + b_fc                          # [T*B, V]
    out_ref[:, 0:T * V] = jnp.concatenate(
        [logits_tm[t * B:(t + 1) * B] for t in range(T)], axis=1)         # [B, T*V]
    for l in range(L):
        out_ref[:, hid_off + l * H: hid_off + (l + 1) * H] = h[l]


# --------------------------------------------------------- parameter packing ---
def _pack_params(params):
    """Pack all decoder parameters into one lane-dense [R, 4H] bf16 slab.

    Matrix pieces sit at 16-row-aligned offsets; offsets are static ints."""
    H, E, V, L = HIDDEN_DIM, EMBED_DIM, VOCAB_SIZE, N_LAYERS
    G = 4 * H
    assert V == H, "packing assumes vocab_size == hidden_dim (true for this config)"

    rows, offs = [], {}

    def add(name, arr):
        arr = jnp.asarray(arr, jnp.float32)
        assert arr.shape[1] == G, name
        offs[name] = (sum(int(r.shape[0]) for r in rows), int(arr.shape[0]))
        rows.append(arr)

    z_H = jnp.zeros((H, H), jnp.float32)

    # layer-0 embedding part folded through its input-gate weights: [V, 4H]
    emb = params["embedding"]                       # [V, E]
    wih0 = params["layers"][0]["wih"]               # [E+H, 3H]
    w0e, w0c = wih0[:E], wih0[E:]                   # emb part [E,3H], ctx part [H,3H]
    add("m0e", jnp.concatenate(
        [emb @ w0e[:, 0:H], emb @ w0e[:, H:2 * H], emb @ w0e[:, 2 * H:3 * H],
         jnp.zeros((V, H), jnp.float32)], axis=1))

    # fused per-step GRU weights [2H, 4H]: rows 0:H input-part (r|z|n|0),
    # rows H:2H hidden-part (r|z|0|n)
    for l in range(L):
        lp = params["layers"][l]
        whh = lp["whh"]
        wi = w0c if l == 0 else lp["wih"]           # [H, 3H]
        wtop = jnp.concatenate([wi[:, 0:H], wi[:, H:2 * H], wi[:, 2 * H:3 * H], z_H],
                               axis=1)
        wbot = jnp.concatenate([whh[:, 0:H], whh[:, H:2 * H], z_H, whh[:, 2 * H:3 * H]],
                               axis=1)
        add(f"w{l}f", jnp.concatenate([wtop, wbot], axis=0))

    # attention / fc matrices packed 4-across in lanes: [H, 4H]
    wa, fcw = params["attn_w"], params["fc_w"]      # [2H, H], [2H, V]
    add("attn_blk", jnp.concatenate([wa[:H], wa[H:], fcw[:H], fcw[H:]], axis=1))

    # single-row pieces: per-layer bias rows (r/z input+hidden pre-combined) and misc
    for l in range(L):
        bih, bhh = params["layers"][l]["bih"], params["layers"][l]["bhh"]
        add(f"b{l}", jnp.concatenate([bih[:, 0:H] + bhh[:, 0:H],
                                      bih[:, H:2 * H] + bhh[:, H:2 * H],
                                      bih[:, 2 * H:3 * H], bhh[:, 2 * H:3 * H]], axis=1))
    add("vec", jnp.concatenate([params["attn_b"], params["attn_v"], params["fc_b"],
                                jnp.zeros((1, H), jnp.float32)], axis=1))

    slab = jnp.concatenate(rows, axis=0).astype(jnp.bfloat16)
    return slab, offs


# ----------------------------------------------------------------- wrapper ---
def attention_decoder_forward(trg, hidden, encoder_outputs, params):
    """trg: int32 [B, T]; hidden: f32 [L, B, H]; encoder_outputs: f32 [B, S, H].
    Returns (outputs [B, T, V], hidden [L, B, H], attentions [B, T, S])."""
    B, T = trg.shape
    L, _, H = hidden.shape
    S = encoder_outputs.shape[1]
    V = VOCAB_SIZE

    att_off = _pad128(T * V)
    hid_off = att_off + _pad128(T * S)
    out_w = hid_off + _pad128(L * H)

    trg_tm = jnp.transpose(trg, (1, 0)).reshape(T * B, 1).astype(jnp.int32)  # row=t*B+b
    enc_flat = encoder_outputs.astype(jnp.float32).reshape(B * S, H)         # row=b*S+s
    slab, offs = _pack_params(params)

    kernel = functools.partial(attn_decoder_kernel, offs=offs, T=T, B=B, S=S,
                               H=H, V=V, L=L, att_off=att_off, hid_off=hid_off)
    vmem = pl.BlockSpec(memory_space=pltpu.MemorySpace.VMEM)

    out = pl.pallas_call(
        kernel,
        out_shape=jax.ShapeDtypeStruct((B, out_w), jnp.float32),
        in_specs=[vmem, vmem, vmem, vmem],
        out_specs=vmem,
        scratch_shapes=[pltpu.VMEM((T * B, 2 * H), jnp.float32)],
    )(trg_tm, hidden.astype(jnp.float32), enc_flat, slab)

    outputs = out[:, :T * V].reshape(B, T, V)
    attentions = out[:, att_off:att_off + T * S].reshape(B, T, S)
    h_n = out[:, hid_off:hid_off + L * H].reshape(B, L, H).transpose(1, 0, 2)
    return outputs, h_n, attentions


# ------------------------------------------------------ params / reference ---
def init_params(key):
    ks = jax.random.split(key, 4 * N_LAYERS + 6)
    bound = 1.0 / float(np.sqrt(HIDDEN_DIM))
    emb = jax.random.normal(ks[0], (VOCAB_SIZE, EMBED_DIM), jnp.float32)
    emb = emb.at[0].set(0.0)                                 # padding_idx=0
    layers, ki = [], 1
    for l in range(N_LAYERS):
        in_dim = EMBED_DIM + HIDDEN_DIM if l == 0 else HIDDEN_DIM
        layers.append(dict(
            wih=jax.random.uniform(ks[ki + 0], (in_dim, 3 * HIDDEN_DIM), jnp.float32, -bound, bound),
            whh=jax.random.uniform(ks[ki + 1], (HIDDEN_DIM, 3 * HIDDEN_DIM), jnp.float32, -bound, bound),
            bih=jax.random.uniform(ks[ki + 2], (1, 3 * HIDDEN_DIM), jnp.float32, -bound, bound),
            bhh=jax.random.uniform(ks[ki + 3], (1, 3 * HIDDEN_DIM), jnp.float32, -bound, bound),
        ))
        ki += 4
    attn_w = jax.random.uniform(ks[ki + 0], (2 * HIDDEN_DIM, HIDDEN_DIM), jnp.float32, -bound, bound)
    attn_b = jax.random.uniform(ks[ki + 1], (1, HIDDEN_DIM), jnp.float32, -bound, bound)
    attn_v = jax.random.uniform(ks[ki + 2], (1, HIDDEN_DIM), jnp.float32, 0.0, 1.0)  # torch.rand
    fc_w = jax.random.uniform(ks[ki + 3], (2 * HIDDEN_DIM, VOCAB_SIZE), jnp.float32, -bound, bound)
    fc_b = jax.random.uniform(ks[ki + 4], (1, VOCAB_SIZE), jnp.float32, -bound, bound)
    return dict(embedding=emb, layers=layers, attn_w=attn_w, attn_b=attn_b,
                attn_v=attn_v, fc_w=fc_w, fc_b=fc_b)


def attention_decoder_ref(trg, hidden, encoder_outputs, params):
    """Pure-JAX mirror of AttentionDecoder.forward (GRU, batch_first)."""
    B, T = trg.shape
    H = HIDDEN_DIM
    emb = jnp.take(params["embedding"], trg, axis=0)                    # [B, T, E]
    wa, ba, v = params["attn_w"], params["attn_b"], params["attn_v"]
    h = hidden
    outputs, attentions = [], []
    for t in range(T):
        h_top = h[-1]                                                   # [B, H]
        hid_rep = jnp.broadcast_to(h_top[:, None, :], encoder_outputs.shape)
        energy = jnp.tanh(jnp.concatenate([hid_rep, encoder_outputs], axis=2) @ wa
                          + ba[None, :, :])                             # [B, S, H]
        scores = jnp.sum(energy * v[None, :, :], axis=-1)               # [B, S]
        attn_w = jax.nn.softmax(scores, axis=1)
        context = jnp.sum(attn_w[:, :, None] * encoder_outputs, axis=1)  # [B, H]
        x = jnp.concatenate([emb[:, t], context], axis=1)               # [B, E+H]
        new_h = []
        for l, lp in enumerate(params["layers"]):
            hp = h[l]
            gi = x @ lp["wih"] + lp["bih"]
            gh = hp @ lp["whh"] + lp["bhh"]
            r = jax.nn.sigmoid(gi[:, :H] + gh[:, :H])
            z = jax.nn.sigmoid(gi[:, H:2 * H] + gh[:, H:2 * H])
            n = jnp.tanh(gi[:, 2 * H:] + r * gh[:, 2 * H:])
            hl = (1.0 - z) * n + z * hp
            new_h.append(hl)
            x = hl
        h = jnp.stack(new_h, axis=0)
        pred = jnp.concatenate([x, context], axis=1) @ params["fc_w"] + params["fc_b"]
        outputs.append(pred)
        attentions.append(attn_w)
    return jnp.stack(outputs, axis=1), h, jnp.stack(attentions, axis=1)


# -------------------------------------------------------------------- main ---
if __name__ == "__main__":
    key = jax.random.PRNGKey(0)
    k_params, k_trg, k_h, k_enc = jax.random.split(key, 4)
    params = init_params(k_params)

    B, T, S = 2, 8, 10
    trg = jax.random.randint(k_trg, (B, T), 1, VOCAB_SIZE).astype(jnp.int32)
    trg = trg.at[:, -2:].set(0)                            # trailing padding tokens
    hidden0 = 0.5 * jax.random.normal(k_h, (N_LAYERS, B, HIDDEN_DIM), jnp.float32)
    enc_out = 0.5 * jax.random.normal(k_enc, (B, S, HIDDEN_DIM), jnp.float32)

    outputs, h_n, attentions = jax.jit(attention_decoder_forward)(trg, hidden0, enc_out, params)
    jax.block_until_ready((outputs, h_n, attentions))

    assert outputs.shape == (B, T, VOCAB_SIZE)
    assert h_n.shape == (N_LAYERS, B, HIDDEN_DIM)
    assert attentions.shape == (B, T, S)

    ref_out, ref_h, ref_attn = attention_decoder_ref(trg, hidden0, enc_out, params)
    # Kernel matmuls use bf16 operands with f32 accumulation (single MXU pass),
    # so the tolerance vs the pure-f32 reference is loosened accordingly.
    np.testing.assert_allclose(np.asarray(outputs), np.asarray(ref_out), atol=3e-2, rtol=3e-2)
    np.testing.assert_allclose(np.asarray(h_n), np.asarray(ref_h), atol=3e-2, rtol=3e-2)
    np.testing.assert_allclose(np.asarray(attentions), np.asarray(ref_attn), atol=3e-2, rtol=3e-2)

    print("KERNEL_OK")
</pallas_src>

<mosaic_0001>
module attributes {stable_mosaic.version = 11 : i64} {
  func.func @attn_decoder_kernel(%arg0: memref<16x1xi32, #tpu.memory_space<vmem>>, %arg1: memref<2x2x32xf32, #tpu.memory_space<vmem>>, %arg2: memref<20x32xf32, #tpu.memory_space<vmem>>, %arg3: memref<195x128xbf16, #tpu.memory_space<vmem>>, %arg4: memref<2x512xf32, #tpu.memory_space<vmem>>, %arg5: memref<16x64xf32, #tpu.memory_space<vmem>>) attributes {dimension_semantics = [], scalar_prefetch = 0 : i64, scratch_operands = 1 : i64, tpu.core_type = #tpu.core_type<tc>} {
    %cst = arith.constant 0.000000e+00 : f32
    %0 = vector.broadcast %cst : f32 to vector<2x512xf32>
    %c0 = arith.constant 0 : index
    %c0_0 = arith.constant 0 : index
    %1 = vector.load %arg4[%c0, %c0_0] : memref<2x512xf32, #tpu.memory_space<vmem>>, vector<2x512xf32>
    tpu.vector_store %arg4[%c0, %c0_0], %0 {strides = array<i32>} : memref<2x512xf32, #tpu.memory_space<vmem>>, vector<2x512xf32>,
    %c160 = arith.constant 160 : index
    %c0_1 = arith.constant 0 : index
    %2 = vector.load %arg3[%c160, %c0_1] : memref<195x128xbf16, #tpu.memory_space<vmem>>, vector<32x128xbf16>
    %3 = vector.extract_strided_slice %2 {offsets = [0, 0], sizes = [32, 32], strides = [1, 1]} : vector<32x128xbf16> to vector<32x32xbf16>
    %4 = vector.extract_strided_slice %2 {offsets = [0, 32], sizes = [32, 32], strides = [1, 1]} : vector<32x128xbf16> to vector<32x32xbf16>
    %c194 = arith.constant 194 : index
    %c0_2 = arith.constant 0 : index
    %5 = vector.load %arg3[%c194, %c0_2] : memref<195x128xbf16, #tpu.memory_space<vmem>>, vector<1x128xbf16>
    %6 = vector.extract_strided_slice %5 {offsets = [0, 0], sizes = [1, 32], strides = [1, 1]} : vector<1x128xbf16> to vector<1x32xbf16>
    %7 = arith.extf %6 : vector<1x32xbf16> to vector<1x32xf32>
    %8 = vector.extract_strided_slice %5 {offsets = [0, 32], sizes = [1, 32], strides = [1, 1]} : vector<1x128xbf16> to vector<1x32xbf16>
    %c0_3 = arith.constant 0 : index
    %c0_4 = arith.constant 0 : index
    %9 = vector.load %arg0[%c0_3, %c0_4] : memref<16x1xi32, #tpu.memory_space<vmem>>, vector<16x1xi32>
    %10 = tpu.iota {dimensions = array<i32: 1>} : vector<16x32xi32>
    %11 = vector.broadcast %9 : vector<16x1xi32> to vector<16x32xi32>
    %12 = arith.cmpi eq, %11, %10 : vector<16x32xi32>
    %13 = arith.extui %12 : vector<16x32xi1> to vector<16x32xi32>
    %14 = arith.sitofp %13 : vector<16x32xi32> to vector<16x32xf32>
    %15 = arith.truncf %14 : vector<16x32xf32> to vector<16x32xbf16>
    %c0_5 = arith.constant 0 : index
    %c0_6 = arith.constant 0 : index
    %16 = vector.load %arg3[%c0_5, %c0_6] : memref<195x128xbf16, #tpu.memory_space<vmem>>, vector<32x128xbf16>
    %cst_7 = arith.constant dense<0.000000e+00> : vector<16x128xf32>
    %17 = tpu.matmul %15, %16, %cst_7 {dimension_numbers = #tpu.dot_dimension_numbers<[1], [0], [0], [1], [0, 0, 1, 1], [], []>} : vector<16x32xbf16>, vector<32x128xbf16>, vector<16x128xf32> -> vector<16x128xf32>
    %c192 = arith.constant 192 : index
    %c0_8 = arith.constant 0 : index
    %18 = vector.load %arg3[%c192, %c0_8] : memref<195x128xbf16, #tpu.memory_space<vmem>>, vector<1x128xbf16>
    %19 = arith.extf %18 : vector<1x128xbf16> to vector<1x128xf32>
    %20 = vector.broadcast %19 : vector<1x128xf32> to vector<16x128xf32>
    %21 = arith.addf %17, %20 : vector<16x128xf32>
    %c0_9 = arith.constant 0 : index
    %c0_10 = arith.constant 0 : index
    %22 = vector.load %arg2[%c0_9, %c0_10] : memref<20x32xf32, #tpu.memory_space<vmem>>, vector<20x32xf32>
    %23 = arith.truncf %22 : vector<20x32xf32> to vector<20x32xbf16>
    %cst_11 = arith.constant dense<0.000000e+00> : vector<20x32xf32>
    %24 = tpu.matmul %23, %4, %cst_11 {dimension_numbers = #tpu.dot_dimension_numbers<[1], [0], [0], [1], [0, 0, 1, 1], [], []>} : vector<20x32xbf16>, vector<32x32xbf16>, vector<20x32xf32> -> vector<20x32xf32>
    %25 = vector.broadcast %7 : vector<1x32xf32> to vector<20x32xf32>
    %26 = arith.addf %24, %25 : vector<20x32xf32>
    %27 = tpu.iota {dimensions = array<i32: 0>} : vector<2x20xi32>
    %28 = tpu.iota {dimensions = array<i32: 1>} : vector<2x20xi32>
    %c10_i32 = arith.constant 10 : i32
    %29 = vector.broadcast %c10_i32 : i32 to vector<2x20xi32>
    %30 = arith.muli %27, %29 : vector<2x20xi32>
    %31 = arith.cmpi sge, %28, %30 : vector<2x20xi32>
    %c1_i32 = arith.constant 1 : i32
    %32 = vector.broadcast %c1_i32 : i32 to vector<2x20xi32>
    %33 = arith.addi %27, %32 : vector<2x20xi32>
    %c10_i32_12 = arith.constant 10 : i32
    %34 = vector.broadcast %c10_i32_12 : i32 to vector<2x20xi32>
    %35 = arith.muli %33, %34 : vector<2x20xi32>
    %36 = arith.cmpi slt, %28, %35 : vector<2x20xi32>
    %37 = arith.andi %31, %36 : vector<2x20xi1>
    %c32 = arith.constant 32 : index
    %c0_13 = arith.constant 0 : index
    %38 = vector.load %arg3[%c32, %c0_13] : memref<195x128xbf16, #tpu.memory_space<vmem>>, vector<64x128xbf16>
    %c96 = arith.constant 96 : index
    %c0_14 = arith.constant 0 : index
    %39 = vector.load %arg3[%c96, %c0_14] : memref<195x128xbf16, #tpu.memory_space<vmem>>, vector<64x128xbf16>
    %c193 = arith.constant 193 : index
    %c0_15 = arith.constant 0 : index
    %40 = vector.load %arg3[%c193, %c0_15] : memref<195x128xbf16, #tpu.memory_space<vmem>>, vector<1x128xbf16>
    %41 = arith.extf %40 : vector<1x128xbf16> to vector<1x128xf32>
    %c0_16 = arith.constant 0 : index
    %c0_17 = arith.constant 0 : index
    %c0_18 = arith.constant 0 : index
    %42 = vector.load %arg1[%c0_16, %c0_17, %c0_18] : memref<2x2x32xf32, #tpu.memory_space<vmem>>, vector<1x2x32xf32>
    %43 = vector.shape_cast %42 : vector<1x2x32xf32> to vector<2x32xf32>
    %c1 = arith.constant 1 : index
    %c0_19 = arith.constant 0 : index
    %c0_20 = arith.constant 0 : index
    %44 = vector.load %arg1[%c1, %c0_19, %c0_20] : memref<2x2x32xf32, #tpu.memory_space<vmem>>, vector<1x2x32xf32>
    %45 = vector.shape_cast %44 : vector<1x2x32xf32> to vector<2x32xf32>
    %46 = arith.truncf %45 : vector<2x32xf32> to vector<2x32xbf16>
    %cst_21 = arith.constant dense<0.000000e+00> : vector<2x32xf32>
    %47 = tpu.matmul %46, %3, %cst_21 {dimension_numbers = #tpu.dot_dimension_numbers<[1], [0], [0], [1], [0, 0, 1, 1], [], []>} : vector<2x32xbf16>, vector<32x32xbf16>, vector<2x32xf32> -> vector<2x32xf32>
    %48 = vector.extract_strided_slice %26 {offsets = [0, 0], sizes = [10, 32], strides = [1, 1]} : vector<20x32xf32> to vector<10x32xf32>
    %49 = vector.extract_strided_slice %47 {offsets = [0, 0], sizes = [1, 32], strides = [1, 1]} : vector<2x32xf32> to vector<1x32xf32>
    %50 = vector.broadcast %49 : vector<1x32xf32> to vector<10x32xf32>
    %51 = arith.addf %48, %50 : vector<10x32xf32>
    %52 = vector.extract_strided_slice %26 {offsets = [10, 0], sizes = [10, 32], strides = [1, 1]} : vector<20x32xf32> to vector<10x32xf32>
    %53 = vector.extract_strided_slice %47 {offsets = [1, 0], sizes = [1, 32], strides = [1, 1]} : vector<2x32xf32> to vector<1x32xf32>
    %54 = vector.broadcast %53 : vector<1x32xf32> to vector<10x32xf32>
    %55 = arith.addf %52, %54 : vector<10x32xf32>
    %56 = tpu.concatenate %51, %55 in 0 : vector<10x32xf32>, vector<10x32xf32> -> vector<20x32xf32>
    %57 = math.tanh %56 : vector<20x32xf32>
    %58 = arith.truncf %57 : vector<20x32xf32> to vector<20x32xbf16>
    %cst_22 = arith.constant dense<0.000000e+00> : vector<1x20xf32>
    %59 = tpu.matmul %8, %58, %cst_22 {dimension_numbers = #tpu.dot_dimension_numbers<[1], [1], [0], [0], [0, 0, 1, 0], [], []>} : vector<1x32xbf16>, vector<20x32xbf16>, vector<1x20xf32> -> vector<1x20xf32>
    %60 = vector.shape_cast %59 : vector<1x20xf32> to vector<1x20xf32>
    %61 = vector.broadcast %60 : vector<1x20xf32> to vector<2x20xf32>
    %cst_23 = arith.constant -1.000000e+30 : f32
    %62 = vector.broadcast %cst_23 : f32 to vector<2x20xf32>
    %63 = arith.select %37, %61, %62 : vector<2x20xi1>, vector<2x20xf32>
    %cst_24 = arith.constant dense<0xFF800000> : vector<2xf32>
    %64 = vector.multi_reduction <maximumf>, %63, %cst_24 [1] : vector<2x20xf32> to vector<2xf32>
    %65 = vector.shape_cast %64 : vector<2xf32> to vector<2x1xf32>
    %66 = vector.broadcast %65 : vector<2x1xf32> to vector<2x20xf32>
    %67 = arith.subf %63, %66 : vector<2x20xf32>
    %68 = math.exp %67 : vector<2x20xf32>
    %cst_25 = arith.constant dense<0.000000e+00> : vector<2xf32>
    %69 = vector.multi_reduction <add>, %68, %cst_25 [1] : vector<2x20xf32> to vector<2xf32>
    %70 = vector.shape_cast %69 : vector<2xf32> to vector<2x1xf32>
    %71 = tpu.reciprocal %70 {approx = true} : vector<2x1xf32> -> vector<2x1xf32>
    %72 = vector.broadcast %71 : vector<2x1xf32> to vector<2x20xf32>
    %73 = arith.mulf %68, %72 : vector<2x20xf32>
    %74 = arith.truncf %73 : vector<2x20xf32> to vector<2x20xbf16>
    %cst_26 = arith.constant dense<0.000000e+00> : vector<2x32xf32>
    %75 = tpu.matmul %74, %23, %cst_26 {dimension_numbers = #tpu.dot_dimension_numbers<[1], [0], [0], [1], [0, 0, 1, 1], [], []>} : vector<2x20xbf16>, vector<20x32xbf16>, vector<2x32xf32> -> vector<2x32xf32>
    %76 = vector.extract_strided_slice %73 {offsets = [0, 0], sizes = [2, 10], strides = [1, 1]} : vector<2x20xf32> to vector<2x10xf32>
    %77 = vector.extract_strided_slice %73 {offsets = [0, 10], sizes = [2, 10], strides = [1, 1]} : vector<2x20xf32> to vector<2x10xf32>
    %78 = arith.addf %76, %77 : vector<2x10xf32>
    %c0_27 = arith.constant 0 : index
    %c256 = arith.constant 256 : index
    %79 = vector.load %arg4[%c0_27, %c256] : memref<2x512xf32, #tpu.memory_space<vmem>>, vector<2x10xf32>
    tpu.vector_store %arg4[%c0_27, %c256], %78 {strides = array<i32>} : memref<2x512xf32, #tpu.memory_space<vmem>>, vector<2x10xf32>,
    %80 = tpu.concatenate %75, %43 in 1 : vector<2x32xf32>, vector<2x32xf32> -> vector<2x64xf32>
    %81 = arith.truncf %80 : vector<2x64xf32> to vector<2x64xbf16>
    %cst_28 = arith.constant dense<0.000000e+00> : vector<2x128xf32>
    %82 = tpu.matmul %81, %38, %cst_28 {dimension_numbers = #tpu.dot_dimension_numbers<[1], [0], [0], [1], [0, 0, 1, 1], [], []>} : vector<2x64xbf16>, vector<64x128xbf16>, vector<2x128xf32> -> vector<2x128xf32>
    %83 = vector.extract_strided_slice %21 {offsets = [0, 0], sizes = [2, 128], strides = [1, 1]} : vector<16x128xf32> to vector<2x128xf32>
    %84 = arith.addf %82, %83 : vector<2x128xf32>
    %85 = vector.extract_strided_slice %84 {offsets = [0, 0], sizes = [2, 32], strides = [1, 1]} : vector<2x128xf32> to vector<2x32xf32>
    %86 = arith.negf %85 : vector<2x32xf32>
    %87 = math.exp %86 : vector<2x32xf32>
    %cst_29 = arith.constant 1.000000e+00 : f32
    %88 = vector.broadcast %cst_29 : f32 to vector<2x32xf32>
    %89 = arith.addf %88, %87 : vector<2x32xf32>
    %90 = arith.divf %88, %89 : vector<2x32xf32>
    %91 = vector.extract_strided_slice %84 {offsets = [0, 32], sizes = [2, 32], strides = [1, 1]} : vector<2x128xf32> to vector<2x32xf32>
    %92 = arith.negf %91 : vector<2x32xf32>
    %93 = math.exp %92 : vector<2x32xf32>
    %cst_30 = arith.constant 1.000000e+00 : f32
    %94 = vector.broadcast %cst_30 : f32 to vector<2x32xf32>
    %95 = arith.addf %94, %93 : vector<2x32xf32>
    %96 = arith.divf %94, %95 : vector<2x32xf32>
    %97 = vector.extract_strided_slice %84 {offsets = [0, 64], sizes = [2, 32], strides = [1, 1]} : vector<2x128xf32> to vector<2x32xf32>
    %98 = vector.extract_strided_slice %84 {offsets = [0, 96], sizes = [2, 32], strides = [1, 1]} : vector<2x128xf32> to vector<2x32xf32>
    %99 = arith.mulf %90, %98 : vector<2x32xf32>
    %100 = arith.addf %97, %99 : vector<2x32xf32>
    %101 = math.tanh %100 : vector<2x32xf32>
    %cst_31 = arith.constant 1.000000e+00 : f32
    %102 = vector.broadcast %cst_31 : f32 to vector<2x32xf32>
    %103 = arith.subf %102, %96 : vector<2x32xf32>
    %104 = arith.mulf %103, %101 : vector<2x32xf32>
    %105 = arith.mulf %96, %43 : vector<2x32xf32>
    %106 = arith.addf %104, %105 : vector<2x32xf32>
    %107 = tpu.concatenate %106, %45 in 1 : vector<2x32xf32>, vector<2x32xf32> -> vector<2x64xf32>
    %108 = arith.truncf %107 : vector<2x64xf32> to vector<2x64xbf16>
    %cst_32 = arith.constant dense<0.000000e+00> : vector<2x128xf32>
    %109 = tpu.matmul %108, %39, %cst_32 {dimension_numbers = #tpu.dot_dimension_numbers<[1], [0], [0], [1], [0, 0, 1, 1], [], []>} : vector<2x64xbf16>, vector<64x128xbf16>, vector<2x128xf32> -> vector<2x128xf32>
    %110 = vector.broadcast %41 : vector<1x128xf32> to vector<2x128xf32>
    %111 = arith.addf %109, %110 : vector<2x128xf32>
    %112 = vector.extract_strided_slice %111 {offsets = [0, 0], sizes = [2, 32], strides = [1, 1]} : vector<2x128xf32> to vector<2x32xf32>
    %113 = arith.negf %112 : vector<2x32xf32>
    %114 = math.exp %113 : vector<2x32xf32>
    %cst_33 = arith.constant 1.000000e+00 : f32
    %115 = vector.broadcast %cst_33 : f32 to vector<2x32xf32>
    %116 = arith.addf %115, %114 : vector<2x32xf32>
    %117 = arith.divf %115, %116 : vector<2x32xf32>
    %118 = vector.extract_strided_slice %111 {offsets = [0, 32], sizes = [2, 32], strides = [1, 1]} : vector<2x128xf32> to vector<2x32xf32>
    %119 = arith.negf %118 : vector<2x32xf32>
    %120 = math.exp %119 : vector<2x32xf32>
    %cst_34 = arith.constant 1.000000e+00 : f32
    %121 = vector.broadcast %cst_34 : f32 to vector<2x32xf32>
    %122 = arith.addf %121, %120 : vector<2x32xf32>
    %123 = arith.divf %121, %122 : vector<2x32xf32>
    %124 = vector.extract_strided_slice %111 {offsets = [0, 64], sizes = [2, 32], strides = [1, 1]} : vector<2x128xf32> to vector<2x32xf32>
    %125 = vector.extract_strided_slice %111 {offsets = [0, 96], sizes = [2, 32], strides = [1, 1]} : vector<2x128xf32> to vector<2x32xf32>
    %126 = arith.mulf %117, %125 : vector<2x32xf32>
    %127 = arith.addf %124, %126 : vector<2x32xf32>
    %128 = math.tanh %127 : vector<2x32xf32>
    %cst_35 = arith.constant 1.000000e+00 : f32
    %129 = vector.broadcast %cst_35 : f32 to vector<2x32xf32>
    %130 = arith.subf %129, %123 : vector<2x32xf32>
    %131 = arith.mulf %130, %128 : vector<2x32xf32>
    %132 = arith.mulf %123, %45 : vector<2x32xf32>
    %133 = arith.addf %131, %132 : vector<2x32xf32>
    %134 = tpu.concatenate %133, %75 in 1 : vector<2x32xf32>, vector<2x32xf32> -> vector<2x64xf32>
    %c0_36 = arith.constant 0 : index
    %c0_37 = arith.constant 0 : index
    %135 = vector.load %arg5[%c0_36, %c0_37] : memref<16x64xf32, #tpu.memory_space<vmem>>, vector<2x64xf32>
    tpu.vector_store %arg5[%c0_36, %c0_37], %134 {strides = array<i32>} : memref<16x64xf32, #tpu.memory_space<vmem>>, vector<2x64xf32>,
    %136 = arith.truncf %133 : vector<2x32xf32> to vector<2x32xbf16>
    %cst_38 = arith.constant dense<0.000000e+00> : vector<2x32xf32>
    %137 = tpu.matmul %136, %3, %cst_38 {dimension_numbers = #tpu.dot_dimension_numbers<[1], [0], [0], [1], [0, 0, 1, 1], [], []>} : vector<2x32xbf16>, vector<32x32xbf16>, vector<2x32xf32> -> vector<2x32xf32>
    %138 = vector.extract_strided_slice %26 {offsets = [0, 0], sizes = [10, 32], strides = [1, 1]} : vector<20x32xf32> to vector<10x32xf32>
    %139 = vector.extract_strided_slice %137 {offsets = [0, 0], sizes = [1, 32], strides = [1, 1]} : vector<2x32xf32> to vector<1x32xf32>
    %140 = vector.broadcast %139 : vector<1x32xf32> to vector<10x32xf32>
    %141 = arith.addf %138, %140 : vector<10x32xf32>
    %142 = vector.extract_strided_slice %26 {offsets = [10, 0], sizes = [10, 32], strides = [1, 1]} : vector<20x32xf32> to vector<10x32xf32>
    %143 = vector.extract_strided_slice %137 {offsets = [1, 0], sizes = [1, 32], strides = [1, 1]} : vector<2x32xf32> to vector<1x32xf32>
    %144 = vector.broadcast %143 : vector<1x32xf32> to vector<10x32xf32>
    %145 = arith.addf %142, %144 : vector<10x32xf32>
    %146 = tpu.concatenate %141, %145 in 0 : vector<10x32xf32>, vector<10x32xf32> -> vector<20x32xf32>
    %147 = math.tanh %146 : vector<20x32xf32>
    %148 = arith.truncf %147 : vector<20x32xf32> to vector<20x32xbf16>
    %cst_39 = arith.constant dense<0.000000e+00> : vector<1x20xf32>
    %149 = tpu.matmul %8, %148, %cst_39 {dimension_numbers = #tpu.dot_dimension_numbers<[1], [1], [0], [0], [0, 0, 1, 0], [], []>} : vector<1x32xbf16>, vector<20x32xbf16>, vector<1x20xf32> -> vector<1x20xf32>
    %150 = vector.shape_cast %149 : vector<1x20xf32> to vector<1x20xf32>
    %151 = vector.broadcast %150 : vector<1x20xf32> to vector<2x20xf32>
    %cst_40 = arith.constant -1.000000e+30 : f32
    %152 = vector.broadcast %cst_40 : f32 to vector<2x20xf32>
    %153 = arith.select %37, %151, %152 : vector<2x20xi1>, vector<2x20xf32>
    %cst_41 = arith.constant dense<0xFF800000> : vector<2xf32>
    %154 = vector.multi_reduction <maximumf>, %153, %cst_41 [1] : vector<2x20xf32> to vector<2xf32>
    %155 = vector.shape_cast %154 : vector<2xf32> to vector<2x1xf32>
    %156 = vector.broadcast %155 : vector<2x1xf32> to vector<2x20xf32>
    %157 = arith.subf %153, %156 : vector<2x20xf32>
    %158 = math.exp %157 : vector<2x20xf32>
    %cst_42 = arith.constant dense<0.000000e+00> : vector<2xf32>
    %159 = vector.multi_reduction <add>, %158, %cst_42 [1] : vector<2x20xf32> to vector<2xf32>
    %160 = vector.shape_cast %159 : vector<2xf32> to vector<2x1xf32>
    %161 = tpu.reciprocal %160 {approx = true} : vector<2x1xf32> -> vector<2x1xf32>
    %162 = vector.broadcast %161 : vector<2x1xf32> to vector<2x20xf32>
    %163 = arith.mulf %158, %162 : vector<2x20xf32>
    %164 = arith.truncf %163 : vector<2x20xf32> to vector<2x20xbf16>
    %cst_43 = arith.constant dense<0.000000e+00> : vector<2x32xf32>
    %165 = tpu.matmul %164, %23, %cst_43 {dimension_numbers = #tpu.dot_dimension_numbers<[1], [0], [0], [1], [0, 0, 1, 1], [], []>} : vector<2x20xbf16>, vector<20x32xbf16>, vector<2x32xf32> -> vector<2x32xf32>
    %166 = vector.extract_strided_slice %163 {offsets = [0, 0], sizes = [2, 10], strides = [1, 1]} : vector<2x20xf32> to vector<2x10xf32>
    %167 = vector.extract_strided_slice %163 {offsets = [0, 10], sizes = [2, 10], strides = [1, 1]} : vector<2x20xf32> to vector<2x10xf32>
    %168 = arith.addf %166, %167 : vector<2x10xf32>
    %c0_44 = arith.constant 0 : index
    %c266 = arith.constant 266 : index
    %169 = vector.load %arg4[%c0_44, %c266] : memref<2x512xf32, #tpu.memory_space<vmem>>, vector<2x10xf32>
    tpu.vector_store %arg4[%c0_44, %c266], %168 {strides = array<i32>} : memref<2x512xf32, #tpu.memory_space<vmem>>, vector<2x10xf32>,
    %170 = tpu.concatenate %165, %106 in 1 : vector<2x32xf32>, vector<2x32xf32> -> vector<2x64xf32>
    %171 = arith.truncf %170 : vector<2x64xf32> to vector<2x64xbf16>
    %cst_45 = arith.constant dense<0.000000e+00> : vector<2x128xf32>
    %172 = tpu.matmul %171, %38, %cst_45 {dimension_numbers = #tpu.dot_dimension_numbers<[1], [0], [0], [1], [0, 0, 1, 1], [], []>} : vector<2x64xbf16>, vector<64x128xbf16>, vector<2x128xf32> -> vector<2x128xf32>
    %173 = vector.extract_strided_slice %21 {offsets = [2, 0], sizes = [2, 128], strides = [1, 1]} : vector<16x128xf32> to vector<2x128xf32>
    %174 = arith.addf %172, %173 : vector<2x128xf32>
    %175 = vector.extract_strided_slice %174 {offsets = [0, 0], sizes = [2, 32], strides = [1, 1]} : vector<2x128xf32> to vector<2x32xf32>
    %176 = arith.negf %175 : vector<2x32xf32>
    %177 = math.exp %176 : vector<2x32xf32>
    %cst_46 = arith.constant 1.000000e+00 : f32
    %178 = vector.broadcast %cst_46 : f32 to vector<2x32xf32>
    %179 = arith.addf %178, %177 : vector<2x32xf32>
    %180 = arith.divf %178, %179 : vector<2x32xf32>
    %181 = vector.extract_strided_slice %174 {offsets = [0, 32], sizes = [2, 32], strides = [1, 1]} : vector<2x128xf32> to vector<2x32xf32>
    %182 = arith.negf %181 : vector<2x32xf32>
    %183 = math.exp %182 : vector<2x32xf32>
    %cst_47 = arith.constant 1.000000e+00 : f32
    %184 = vector.broadcast %cst_47 : f32 to vector<2x32xf32>
    %185 = arith.addf %184, %183 : vector<2x32xf32>
    %186 = arith.divf %184, %185 : vector<2x32xf32>
    %187 = vector.extract_strided_slice %174 {offsets = [0, 64], sizes = [2, 32], strides = [1, 1]} : vector<2x128xf32> to vector<2x32xf32>
    %188 = vector.extract_strided_slice %174 {offsets = [0, 96], sizes = [2, 32], strides = [1, 1]} : vector<2x128xf32> to vector<2x32xf32>
    %189 = arith.mulf %180, %188 : vector<2x32xf32>
    %190 = arith.addf %187, %189 : vector<2x32xf32>
    %191 = math.tanh %190 : vector<2x32xf32>
    %cst_48 = arith.constant 1.000000e+00 : f32
    %192 = vector.broadcast %cst_48 : f32 to vector<2x32xf32>
    %193 = arith.subf %192, %186 : vector<2x32xf32>
    %194 = arith.mulf %193, %191 : vector<2x32xf32>
    %195 = arith.mulf %186, %106 : vector<2x32xf32>
    %196 = arith.addf %194, %195 : vector<2x32xf32>
    %197 = tpu.concatenate %196, %133 in 1 : vector<2x32xf32>, vector<2x32xf32> -> vector<2x64xf32>
    %198 = arith.truncf %197 : vector<2x64xf32> to vector<2x64xbf16>
    %cst_49 = arith.constant dense<0.000000e+00> : vector<2x128xf32>
    %199 = tpu.matmul %198, %39, %cst_49 {dimension_numbers = #tpu.dot_dimension_numbers<[1], [0], [0], [1], [0, 0, 1, 1], [], []>} : vector<2x64xbf16>, vector<64x128xbf16>, vector<2x128xf32> -> vector<2x128xf32>
    %200 = vector.broadcast %41 : vector<1x128xf32> to vector<2x128xf32>
    %201 = arith.addf %199, %200 : vector<2x128xf32>
    %202 = vector.extract_strided_slice %201 {offsets = [0, 0], sizes = [2, 32], strides = [1, 1]} : vector<2x128xf32> to vector<2x32xf32>
    %203 = arith.negf %202 : vector<2x32xf32>
    %204 = math.exp %203 : vector<2x32xf32>
    %cst_50 = arith.constant 1.000000e+00 : f32
    %205 = vector.broadcast %cst_50 : f32 to vector<2x32xf32>
    %206 = arith.addf %205, %204 : vector<2x32xf32>
    %207 = arith.divf %205, %206 : vector<2x32xf32>
    %208 = vector.extract_strided_slice %201 {offsets = [0, 32], sizes = [2, 32], strides = [1, 1]} : vector<2x128xf32> to vector<2x32xf32>
    %209 = arith.negf %208 : vector<2x32xf32>
    %210 = math.exp %209 : vector<2x32xf32>
    %cst_51 = arith.constant 1.000000e+00 : f32
    %211 = vector.broadcast %cst_51 : f32 to vector<2x32xf32>
    %212 = arith.addf %211, %210 : vector<2x32xf32>
    %213 = arith.divf %211, %212 : vector<2x32xf32>
    %214 = vector.extract_strided_slice %201 {offsets = [0, 64], sizes = [2, 32], strides = [1, 1]} : vector<2x128xf32> to vector<2x32xf32>
    %215 = vector.extract_strided_slice %201 {offsets = [0, 96], sizes = [2, 32], strides = [1, 1]} : vector<2x128xf32> to vector<2x32xf32>
    %216 = arith.mulf %207, %215 : vector<2x32xf32>
    %217 = arith.addf %214, %216 : vector<2x32xf32>
    %218 = math.tanh %217 : vector<2x32xf32>
    %cst_52 = arith.constant 1.000000e+00 : f32
    %219 = vector.broadcast %cst_52 : f32 to vector<2x32xf32>
    %220 = arith.subf %219, %213 : vector<2x32xf32>
    %221 = arith.mulf %220, %218 : vector<2x32xf32>
    %222 = arith.mulf %213, %133 : vector<2x32xf32>
    %223 = arith.addf %221, %222 : vector<2x32xf32>
    %224 = tpu.concatenate %223, %165 in 1 : vector<2x32xf32>, vector<2x32xf32> -> vector<2x64xf32>
    %c2 = arith.constant 2 : index
    %c0_53 = arith.constant 0 : index
    %225 = vector.load %arg5[%c2, %c0_53] : memref<16x64xf32, #tpu.memory_space<vmem>>, vector<2x64xf32>
    tpu.vector_store %arg5[%c2, %c0_53], %224 {strides = array<i32>} : memref<16x64xf32, #tpu.memory_space<vmem>>, vector<2x64xf32>,
    %226 = arith.truncf %223 : vector<2x32xf32> to vector<2x32xbf16>
    %cst_54 = arith.constant dense<0.000000e+00> : vector<2x32xf32>
    %227 = tpu.matmul %226, %3, %cst_54 {dimension_numbers = #tpu.dot_dimension_numbers<[1], [0], [0], [1], [0, 0, 1, 1], [], []>} : vector<2x32xbf16>, vector<32x32xbf16>, vector<2x32xf32> -> vector<2x32xf32>
    %228 = vector.extract_strided_slice %26 {offsets = [0, 0], sizes = [10, 32], strides = [1, 1]} : vector<20x32xf32> to vector<10x32xf32>
    %229 = vector.extract_strided_slice %227 {offsets = [0, 0], sizes = [1, 32], strides = [1, 1]} : vector<2x32xf32> to vector<1x32xf32>
    %230 = vector.broadcast %229 : vector<1x32xf32> to vector<10x32xf32>
    %231 = arith.addf %228, %230 : vector<10x32xf32>
    %232 = vector.extract_strided_slice %26 {offsets = [10, 0], sizes = [10, 32], strides = [1, 1]} : vector<20x32xf32> to vector<10x32xf32>
    %233 = vector.extract_strided_slice %227 {offsets = [1, 0], sizes = [1, 32], strides = [1, 1]} : vector<2x32xf32> to vector<1x32xf32>
    %234 = vector.broadcast %233 : vector<1x32xf32> to vector<10x32xf32>
    %235 = arith.addf %232, %234 : vector<10x32xf32>
    %236 = tpu.concatenate %231, %235 in 0 : vector<10x32xf32>, vector<10x32xf32> -> vector<20x32xf32>
    %237 = math.tanh %236 : vector<20x32xf32>
    %238 = arith.truncf %237 : vector<20x32xf32> to vector<20x32xbf16>
    %cst_55 = arith.constant dense<0.000000e+00> : vector<1x20xf32>
    %239 = tpu.matmul %8, %238, %cst_55 {dimension_numbers = #tpu.dot_dimension_numbers<[1], [1], [0], [0], [0, 0, 1, 0], [], []>} : vector<1x32xbf16>, vector<20x32xbf16>, vector<1x20xf32> -> vector<1x20xf32>
    %240 = vector.shape_cast %239 : vector<1x20xf32> to vector<1x20xf32>
    %241 = vector.broadcast %240 : vector<1x20xf32> to vector<2x20xf32>
    %cst_56 = arith.constant -1.000000e+30 : f32
    %242 = vector.broadcast %cst_56 : f32 to vector<2x20xf32>
    %243 = arith.select %37, %241, %242 : vector<2x20xi1>, vector<2x20xf32>
    %cst_57 = arith.constant dense<0xFF800000> : vector<2xf32>
    %244 = vector.multi_reduction <maximumf>, %243, %cst_57 [1] : vector<2x20xf32> to vector<2xf32>
    %245 = vector.shape_cast %244 : vector<2xf32> to vector<2x1xf32>
    %246 = vector.broadcast %245 : vector<2x1xf32> to vector<2x20xf32>
    %247 = arith.subf %243, %246 : vector<2x20xf32>
    %248 = math.exp %247 : vector<2x20xf32>
    %cst_58 = arith.constant dense<0.000000e+00> : vector<2xf32>
    %249 = vector.multi_reduction <add>, %248, %cst_58 [1] : vector<2x20xf32> to vector<2xf32>
    %250 = vector.shape_cast %249 : vector<2xf32> to vector<2x1xf32>
    %251 = tpu.reciprocal %250 {approx = true} : vector<2x1xf32> -> vector<2x1xf32>
    %252 = vector.broadcast %251 : vector<2x1xf32> to vector<2x20xf32>
    %253 = arith.mulf %248, %252 : vector<2x20xf32>
    %254 = arith.truncf %253 : vector<2x20xf32> to vector<2x20xbf16>
    %cst_59 = arith.constant dense<0.000000e+00> : vector<2x32xf32>
    %255 = tpu.matmul %254, %23, %cst_59 {dimension_numbers = #tpu.dot_dimension_numbers<[1], [0], [0], [1], [0, 0, 1, 1], [], []>} : vector<2x20xbf16>, vector<20x32xbf16>, vector<2x32xf32> -> vector<2x32xf32>
    %256 = vector.extract_strided_slice %253 {offsets = [0, 0], sizes = [2, 10], strides = [1, 1]} : vector<2x20xf32> to vector<2x10xf32>
    %257 = vector.extract_strided_slice %253 {offsets = [0, 10], sizes = [2, 10], strides = [1, 1]} : vector<2x20xf32> to vector<2x10xf32>
    %258 = arith.addf %256, %257 : vector<2x10xf32>
    %c0_60 = arith.constant 0 : index
    %c276 = arith.constant 276 : index
    %259 = vector.load %arg4[%c0_60, %c276] : memref<2x512xf32, #tpu.memory_space<vmem>>, vector<2x10xf32>
    tpu.vector_store %arg4[%c0_60, %c276], %258 {strides = array<i32>} : memref<2x512xf32, #tpu.memory_space<vmem>>, vector<2x10xf32>,
    %260 = tpu.concatenate %255, %196 in 1 : vector<2x32xf32>, vector<2x32xf32> -> vector<2x64xf32>
    %261 = arith.truncf %260 : vector<2x64xf32> to vector<2x64xbf16>
    %cst_61 = arith.constant dense<0.000000e+00> : vector<2x128xf32>
    %262 = tpu.matmul %261, %38, %cst_61 {dimension_numbers = #tpu.dot_dimension_numbers<[1], [0], [0], [1], [0, 0, 1, 1], [], []>} : vector<2x64xbf16>, vector<64x128xbf16>, vector<2x128xf32> -> vector<2x128xf32>
    %263 = vector.extract_strided_slice %21 {offsets = [4, 0], sizes = [2, 128], strides = [1, 1]} : vector<16x128xf32> to vector<2x128xf32>
    %264 = arith.addf %262, %263 : vector<2x128xf32>
    %265 = vector.extract_strided_slice %264 {offsets = [0, 0], sizes = [2, 32], strides = [1, 1]} : vector<2x128xf32> to vector<2x32xf32>
    %266 = arith.negf %265 : vector<2x32xf32>
    %267 = math.exp %266 : vector<2x32xf32>
    %cst_62 = arith.constant 1.000000e+00 : f32
    %268 = vector.broadcast %cst_62 : f32 to vector<2x32xf32>
    %269 = arith.addf %268, %267 : vector<2x32xf32>
    %270 = arith.divf %268, %269 : vector<2x32xf32>
    %271 = vector.extract_strided_slice %264 {offsets = [0, 32], sizes = [2, 32], strides = [1, 1]} : vector<2x128xf32> to vector<2x32xf32>
    %272 = arith.negf %271 : vector<2x32xf32>
    %273 = math.exp %272 : vector<2x32xf32>
    %cst_63 = arith.constant 1.000000e+00 : f32
    %274 = vector.broadcast %cst_63 : f32 to vector<2x32xf32>
    %275 = arith.addf %274, %273 : vector<2x32xf32>
    %276 = arith.divf %274, %275 : vector<2x32xf32>
    %277 = vector.extract_strided_slice %264 {offsets = [0, 64], sizes = [2, 32], strides = [1, 1]} : vector<2x128xf32> to vector<2x32xf32>
    %278 = vector.extract_strided_slice %264 {offsets = [0, 96], sizes = [2, 32], strides = [1, 1]} : vector<2x128xf32> to vector<2x32xf32>
    %279 = arith.mulf %270, %278 : vector<2x32xf32>
    %280 = arith.addf %277, %279 : vector<2x32xf32>
    %281 = math.tanh %280 : vector<2x32xf32>
    %cst_64 = arith.constant 1.000000e+00 : f32
    %282 = vector.broadcast %cst_64 : f32 to vector<2x32xf32>
    %283 = arith.subf %282, %276 : vector<2x32xf32>
    %284 = arith.mulf %283, %281 : vector<2x32xf32>
    %285 = arith.mulf %276, %196 : vector<2x32xf32>
    %286 = arith.addf %284, %285 : vector<2x32xf32>
    %287 = tpu.concatenate %286, %223 in 1 : vector<2x32xf32>, vector<2x32xf32> -> vector<2x64xf32>
    %288 = arith.truncf %287 : vector<2x64xf32> to vector<2x64xbf16>
    %cst_65 = arith.constant dense<0.000000e+00> : vector<2x128xf32>
    %289 = tpu.matmul %288, %39, %cst_65 {dimension_numbers = #tpu.dot_dimension_numbers<[1], [0], [0], [1], [0, 0, 1, 1], [], []>} : vector<2x64xbf16>, vector<64x128xbf16>, vector<2x128xf32> -> vector<2x128xf32>
    %290 = vector.broadcast %41 : vector<1x128xf32> to vector<2x128xf32>
    %291 = arith.addf %289, %290 : vector<2x128xf32>
    %292 = vector.extract_strided_slice %291 {offsets = [0, 0], sizes = [2, 32], strides = [1, 1]} : vector<2x128xf32> to vector<2x32xf32>
    %293 = arith.negf %292 : vector<2x32xf32>
    %294 = math.exp %293 : vector<2x32xf32>
    %cst_66 = arith.constant 1.000000e+00 : f32
    %295 = vector.broadcast %cst_66 : f32 to vector<2x32xf32>
    %296 = arith.addf %295, %294 : vector<2x32xf32>
    %297 = arith.divf %295, %296 : vector<2x32xf32>
    %298 = vector.extract_strided_slice %291 {offsets = [0, 32], sizes = [2, 32], strides = [1, 1]} : vector<2x128xf32> to vector<2x32xf32>
    %299 = arith.negf %298 : vector<2x32xf32>
    %300 = math.exp %299 : vector<2x32xf32>
    %cst_67 = arith.constant 1.000000e+00 : f32
    %301 = vector.broadcast %cst_67 : f32 to vector<2x32xf32>
    %302 = arith.addf %301, %300 : vector<2x32xf32>
    %303 = arith.divf %301, %302 : vector<2x32xf32>
    %304 = vector.extract_strided_slice %291 {offsets = [0, 64], sizes = [2, 32], strides = [1, 1]} : vector<2x128xf32> to vector<2x32xf32>
    %305 = vector.extract_strided_slice %291 {offsets = [0, 96], sizes = [2, 32], strides = [1, 1]} : vector<2x128xf32> to vector<2x32xf32>
    %306 = arith.mulf %297, %305 : vector<2x32xf32>
    %307 = arith.addf %304, %306 : vector<2x32xf32>
    %308 = math.tanh %307 : vector<2x32xf32>
    %cst_68 = arith.constant 1.000000e+00 : f32
    %309 = vector.broadcast %cst_68 : f32 to vector<2x32xf32>
    %310 = arith.subf %309, %303 : vector<2x32xf32>
    %311 = arith.mulf %310, %308 : vector<2x32xf32>
    %312 = arith.mulf %303, %223 : vector<2x32xf32>
    %313 = arith.addf %311, %312 : vector<2x32xf32>
    %314 = tpu.concatenate %313, %255 in 1 : vector<2x32xf32>, vector<2x32xf32> -> vector<2x64xf32>
    %c4 = arith.constant 4 : index
    %c0_69 = arith.constant 0 : index
    %315 = vector.load %arg5[%c4, %c0_69] : memref<16x64xf32, #tpu.memory_space<vmem>>, vector<2x64xf32>
    tpu.vector_store %arg5[%c4, %c0_69], %314 {strides = array<i32>} : memref<16x64xf32, #tpu.memory_space<vmem>>, vector<2x64xf32>,
    %316 = arith.truncf %313 : vector<2x32xf32> to vector<2x32xbf16>
    %cst_70 = arith.constant dense<0.000000e+00> : vector<2x32xf32>
    %317 = tpu.matmul %316, %3, %cst_70 {dimension_numbers = #tpu.dot_dimension_numbers<[1], [0], [0], [1], [0, 0, 1, 1], [], []>} : vector<2x32xbf16>, vector<32x32xbf16>, vector<2x32xf32> -> vector<2x32xf32>
    %318 = vector.extract_strided_slice %26 {offsets = [0, 0], sizes = [10, 32], strides = [1, 1]} : vector<20x32xf32> to vector<10x32xf32>
    %319 = vector.extract_strided_slice %317 {offsets = [0, 0], sizes = [1, 32], strides = [1, 1]} : vector<2x32xf32> to vector<1x32xf32>
    %320 = vector.broadcast %319 : vector<1x32xf32> to vector<10x32xf32>
    %321 = arith.addf %318, %320 : vector<10x32xf32>
    %322 = vector.extract_strided_slice %26 {offsets = [10, 0], sizes = [10, 32], strides = [1, 1]} : vector<20x32xf32> to vector<10x32xf32>
    %323 = vector.extract_strided_slice %317 {offsets = [1, 0], sizes = [1, 32], strides = [1, 1]} : vector<2x32xf32> to vector<1x32xf32>
    %324 = vector.broadcast %323 : vector<1x32xf32> to vector<10x32xf32>
    %325 = arith.addf %322, %324 : vector<10x32xf32>
    %326 = tpu.concatenate %321, %325 in 0 : vector<10x32xf32>, vector<10x32xf32> -> vector<20x32xf32>
    %327 = math.tanh %326 : vector<20x32xf32>
    %328 = arith.truncf %327 : vector<20x32xf32> to vector<20x32xbf16>
    %cst_71 = arith.constant dense<0.000000e+00> : vector<1x20xf32>
    %329 = tpu.matmul %8, %328, %cst_71 {dimension_numbers = #tpu.dot_dimension_numbers<[1], [1], [0], [0], [0, 0, 1, 0], [], []>} : vector<1x32xbf16>, vector<20x32xbf16>, vector<1x20xf32> -> vector<1x20xf32>
    %330 = vector.shape_cast %329 : vector<1x20xf32> to vector<1x20xf32>
    %331 = vector.broadcast %330 : vector<1x20xf32> to vector<2x20xf32>
    %cst_72 = arith.constant -1.000000e+30 : f32
    %332 = vector.broadcast %cst_72 : f32 to vector<2x20xf32>
    %333 = arith.select %37, %331, %332 : vector<2x20xi1>, vector<2x20xf32>
    %cst_73 = arith.constant dense<0xFF800000> : vector<2xf32>
    %334 = vector.multi_reduction <maximumf>, %333, %cst_73 [1] : vector<2x20xf32> to vector<2xf32>
    %335 = vector.shape_cast %334 : vector<2xf32> to vector<2x1xf32>
    %336 = vector.broadcast %335 : vector<2x1xf32> to vector<2x20xf32>
    %337 = arith.subf %333, %336 : vector<2x20xf32>
    %338 = math.exp %337 : vector<2x20xf32>
    %cst_74 = arith.constant dense<0.000000e+00> : vector<2xf32>
    %339 = vector.multi_reduction <add>, %338, %cst_74 [1] : vector<2x20xf32> to vector<2xf32>
    %340 = vector.shape_cast %339 : vector<2xf32> to vector<2x1xf32>
    %341 = tpu.reciprocal %340 {approx = true} : vector<2x1xf32> -> vector<2x1xf32>
    %342 = vector.broadcast %341 : vector<2x1xf32> to vector<2x20xf32>
    %343 = arith.mulf %338, %342 : vector<2x20xf32>
    %344 = arith.truncf %343 : vector<2x20xf32> to vector<2x20xbf16>
    %cst_75 = arith.constant dense<0.000000e+00> : vector<2x32xf32>
    %345 = tpu.matmul %344, %23, %cst_75 {dimension_numbers = #tpu.dot_dimension_numbers<[1], [0], [0], [1], [0, 0, 1, 1], [], []>} : vector<2x20xbf16>, vector<20x32xbf16>, vector<2x32xf32> -> vector<2x32xf32>
    %346 = vector.extract_strided_slice %343 {offsets = [0, 0], sizes = [2, 10], strides = [1, 1]} : vector<2x20xf32> to vector<2x10xf32>
    %347 = vector.extract_strided_slice %343 {offsets = [0, 10], sizes = [2, 10], strides = [1, 1]} : vector<2x20xf32> to vector<2x10xf32>
    %348 = arith.addf %346, %347 : vector<2x10xf32>
    %c0_76 = arith.constant 0 : index
    %c286 = arith.constant 286 : index
    %349 = vector.load %arg4[%c0_76, %c286] : memref<2x512xf32, #tpu.memory_space<vmem>>, vector<2x10xf32>
    tpu.vector_store %arg4[%c0_76, %c286], %348 {strides = array<i32>} : memref<2x512xf32, #tpu.memory_space<vmem>>, vector<2x10xf32>,
    %350 = tpu.concatenate %345, %286 in 1 : vector<2x32xf32>, vector<2x32xf32> -> vector<2x64xf32>
    %351 = arith.truncf %350 : vector<2x64xf32> to vector<2x64xbf16>
    %cst_77 = arith.constant dense<0.000000e+00> : vector<2x128xf32>
    %352 = tpu.matmul %351, %38, %cst_77 {dimension_numbers = #tpu.dot_dimension_numbers<[1], [0], [0], [1], [0, 0, 1, 1], [], []>} : vector<2x64xbf16>, vector<64x128xbf16>, vector<2x128xf32> -> vector<2x128xf32>
    %353 = vector.extract_strided_slice %21 {offsets = [6, 0], sizes = [2, 128], strides = [1, 1]} : vector<16x128xf32> to vector<2x128xf32>
    %354 = arith.addf %352, %353 : vector<2x128xf32>
    %355 = vector.extract_strided_slice %354 {offsets = [0, 0], sizes = [2, 32], strides = [1, 1]} : vector<2x128xf32> to vector<2x32xf32>
    %356 = arith.negf %355 : vector<2x32xf32>
    %357 = math.exp %356 : vector<2x32xf32>
    %cst_78 = arith.constant 1.000000e+00 : f32
    %358 = vector.broadcast %cst_78 : f32 to vector<2x32xf32>
    %359 = arith.addf %358, %357 : vector<2x32xf32>
    %360 = arith.divf %358, %359 : vector<2x32xf32>
    %361 = vector.extract_strided_slice %354 {offsets = [0, 32], sizes = [2, 32], strides = [1, 1]} : vector<2x128xf32> to vector<2x32xf32>
    %362 = arith.negf %361 : vector<2x32xf32>
    %363 = math.exp %362 : vector<2x32xf32>
    %cst_79 = arith.constant 1.000000e+00 : f32
    %364 = vector.broadcast %cst_79 : f32 to vector<2x32xf32>
    %365 = arith.addf %364, %363 : vector<2x32xf32>
    %366 = arith.divf %364, %365 : vector<2x32xf32>
    %367 = vector.extract_strided_slice %354 {offsets = [0, 64], sizes = [2, 32], strides = [1, 1]} : vector<2x128xf32> to vector<2x32xf32>
    %368 = vector.extract_strided_slice %354 {offsets = [0, 96], sizes = [2, 32], strides = [1, 1]} : vector<2x128xf32> to vector<2x32xf32>
    %369 = arith.mulf %360, %368 : vector<2x32xf32>
    %370 = arith.addf %367, %369 : vector<2x32xf32>
    %371 = math.tanh %370 : vector<2x32xf32>
    %cst_80 = arith.constant 1.000000e+00 : f32
    %372 = vector.broadcast %cst_80 : f32 to vector<2x32xf32>
    %373 = arith.subf %372, %366 : vector<2x32xf32>
    %374 = arith.mulf %373, %371 : vector<2x32xf32>
    %375 = arith.mulf %366, %286 : vector<2x32xf32>
    %376 = arith.addf %374, %375 : vector<2x32xf32>
    %377 = tpu.concatenate %376, %313 in 1 : vector<2x32xf32>, vector<2x32xf32> -> vector<2x64xf32>
    %378 = arith.truncf %377 : vector<2x64xf32> to vector<2x64xbf16>
    %cst_81 = arith.constant dense<0.000000e+00> : vector<2x128xf32>
    %379 = tpu.matmul %378, %39, %cst_81 {dimension_numbers = #tpu.dot_dimension_numbers<[1], [0], [0], [1], [0, 0, 1, 1], [], []>} : vector<2x64xbf16>, vector<64x128xbf16>, vector<2x128xf32> -> vector<2x128xf32>
    %380 = vector.broadcast %41 : vector<1x128xf32> to vector<2x128xf32>
    %381 = arith.addf %379, %380 : vector<2x128xf32>
    %382 = vector.extract_strided_slice %381 {offsets = [0, 0], sizes = [2, 32], strides = [1, 1]} : vector<2x128xf32> to vector<2x32xf32>
    %383 = arith.negf %382 : vector<2x32xf32>
    %384 = math.exp %383 : vector<2x32xf32>
    %cst_82 = arith.constant 1.000000e+00 : f32
    %385 = vector.broadcast %cst_82 : f32 to vector<2x32xf32>
    %386 = arith.addf %385, %384 : vector<2x32xf32>
    %387 = arith.divf %385, %386 : vector<2x32xf32>
    %388 = vector.extract_strided_slice %381 {offsets = [0, 32], sizes = [2, 32], strides = [1, 1]} : vector<2x128xf32> to vector<2x32xf32>
    %389 = arith.negf %388 : vector<2x32xf32>
    %390 = math.exp %389 : vector<2x32xf32>
    %cst_83 = arith.constant 1.000000e+00 : f32
    %391 = vector.broadcast %cst_83 : f32 to vector<2x32xf32>
    %392 = arith.addf %391, %390 : vector<2x32xf32>
    %393 = arith.divf %391, %392 : vector<2x32xf32>
    %394 = vector.extract_strided_slice %381 {offsets = [0, 64], sizes = [2, 32], strides = [1, 1]} : vector<2x128xf32> to vector<2x32xf32>
    %395 = vector.extract_strided_slice %381 {offsets = [0, 96], sizes = [2, 32], strides = [1, 1]} : vector<2x128xf32> to vector<2x32xf32>
    %396 = arith.mulf %387, %395 : vector<2x32xf32>
    %397 = arith.addf %394, %396 : vector<2x32xf32>
    %398 = math.tanh %397 : vector<2x32xf32>
    %cst_84 = arith.constant 1.000000e+00 : f32
    %399 = vector.broadcast %cst_84 : f32 to vector<2x32xf32>
    %400 = arith.subf %399, %393 : vector<2x32xf32>
    %401 = arith.mulf %400, %398 : vector<2x32xf32>
    %402 = arith.mulf %393, %313 : vector<2x32xf32>
    %403 = arith.addf %401, %402 : vector<2x32xf32>
    %404 = tpu.concatenate %403, %345 in 1 : vector<2x32xf32>, vector<2x32xf32> -> vector<2x64xf32>
    %c6 = arith.constant 6 : index
    %c0_85 = arith.constant 0 : index
    %405 = vector.load %arg5[%c6, %c0_85] : memref<16x64xf32, #tpu.memory_space<vmem>>, vector<2x64xf32>
    tpu.vector_store %arg5[%c6, %c0_85], %404 {strides = array<i32>} : memref<16x64xf32, #tpu.memory_space<vmem>>, vector<2x64xf32>,
    %406 = arith.truncf %403 : vector<2x32xf32> to vector<2x32xbf16>
    %cst_86 = arith.constant dense<0.000000e+00> : vector<2x32xf32>
    %407 = tpu.matmul %406, %3, %cst_86 {dimension_numbers = #tpu.dot_dimension_numbers<[1], [0], [0], [1], [0, 0, 1, 1], [], []>} : vector<2x32xbf16>, vector<32x32xbf16>, vector<2x32xf32> -> vector<2x32xf32>
    %408 = vector.extract_strided_slice %26 {offsets = [0, 0], sizes = [10, 32], strides = [1, 1]} : vector<20x32xf32> to vector<10x32xf32>
    %409 = vector.extract_strided_slice %407 {offsets = [0, 0], sizes = [1, 32], strides = [1, 1]} : vector<2x32xf32> to vector<1x32xf32>
    %410 = vector.broadcast %409 : vector<1x32xf32> to vector<10x32xf32>
    %411 = arith.addf %408, %410 : vector<10x32xf32>
    %412 = vector.extract_strided_slice %26 {offsets = [10, 0], sizes = [10, 32], strides = [1, 1]} : vector<20x32xf32> to vector<10x32xf32>
    %413 = vector.extract_strided_slice %407 {offsets = [1, 0], sizes = [1, 32], strides = [1, 1]} : vector<2x32xf32> to vector<1x32xf32>
    %414 = vector.broadcast %413 : vector<1x32xf32> to vector<10x32xf32>
    %415 = arith.addf %412, %414 : vector<10x32xf32>
    %416 = tpu.concatenate %411, %415 in 0 : vector<10x32xf32>, vector<10x32xf32> -> vector<20x32xf32>
    %417 = math.tanh %416 : vector<20x32xf32>
    %418 = arith.truncf %417 : vector<20x32xf32> to vector<20x32xbf16>
    %cst_87 = arith.constant dense<0.000000e+00> : vector<1x20xf32>
    %419 = tpu.matmul %8, %418, %cst_87 {dimension_numbers = #tpu.dot_dimension_numbers<[1], [1], [0], [0], [0, 0, 1, 0], [], []>} : vector<1x32xbf16>, vector<20x32xbf16>, vector<1x20xf32> -> vector<1x20xf32>
    %420 = vector.shape_cast %419 : vector<1x20xf32> to vector<1x20xf32>
    %421 = vector.broadcast %420 : vector<1x20xf32> to vector<2x20xf32>
    %cst_88 = arith.constant -1.000000e+30 : f32
    %422 = vector.broadcast %cst_88 : f32 to vector<2x20xf32>
    %423 = arith.select %37, %421, %422 : vector<2x20xi1>, vector<2x20xf32>
    %cst_89 = arith.constant dense<0xFF800000> : vector<2xf32>
    %424 = vector.multi_reduction <maximumf>, %423, %cst_89 [1] : vector<2x20xf32> to vector<2xf32>
    %425 = vector.shape_cast %424 : vector<2xf32> to vector<2x1xf32>
    %426 = vector.broadcast %425 : vector<2x1xf32> to vector<2x20xf32>
    %427 = arith.subf %423, %426 : vector<2x20xf32>
    %428 = math.exp %427 : vector<2x20xf32>
    %cst_90 = arith.constant dense<0.000000e+00> : vector<2xf32>
    %429 = vector.multi_reduction <add>, %428, %cst_90 [1] : vector<2x20xf32> to vector<2xf32>
    %430 = vector.shape_cast %429 : vector<2xf32> to vector<2x1xf32>
    %431 = tpu.reciprocal %430 {approx = true} : vector<2x1xf32> -> vector<2x1xf32>
    %432 = vector.broadcast %431 : vector<2x1xf32> to vector<2x20xf32>
    %433 = arith.mulf %428, %432 : vector<2x20xf32>
    %434 = arith.truncf %433 : vector<2x20xf32> to vector<2x20xbf16>
    %cst_91 = arith.constant dense<0.000000e+00> : vector<2x32xf32>
    %435 = tpu.matmul %434, %23, %cst_91 {dimension_numbers = #tpu.dot_dimension_numbers<[1], [0], [0], [1], [0, 0, 1, 1], [], []>} : vector<2x20xbf16>, vector<20x32xbf16>, vector<2x32xf32> -> vector<2x32xf32>
    %436 = vector.extract_strided_slice %433 {offsets = [0, 0], sizes = [2, 10], strides = [1, 1]} : vector<2x20xf32> to vector<2x10xf32>
    %437 = vector.extract_strided_slice %433 {offsets = [0, 10], sizes = [2, 10], strides = [1, 1]} : vector<2x20xf32> to vector<2x10xf32>
    %438 = arith.addf %436, %437 : vector<2x10xf32>
    %c0_92 = arith.constant 0 : index
    %c296 = arith.constant 296 : index
    %439 = vector.load %arg4[%c0_92, %c296] : memref<2x512xf32, #tpu.memory_space<vmem>>, vector<2x10xf32>
    tpu.vector_store %arg4[%c0_92, %c296], %438 {strides = array<i32>} : memref<2x512xf32, #tpu.memory_space<vmem>>, vector<2x10xf32>,
    %440 = tpu.concatenate %435, %376 in 1 : vector<2x32xf32>, vector<2x32xf32> -> vector<2x64xf32>
    %441 = arith.truncf %440 : vector<2x64xf32> to vector<2x64xbf16>
    %cst_93 = arith.constant dense<0.000000e+00> : vector<2x128xf32>
    %442 = tpu.matmul %441, %38, %cst_93 {dimension_numbers = #tpu.dot_dimension_numbers<[1], [0], [0], [1], [0, 0, 1, 1], [], []>} : vector<2x64xbf16>, vector<64x128xbf16>, vector<2x128xf32> -> vector<2x128xf32>
    %443 = vector.extract_strided_slice %21 {offsets = [8, 0], sizes = [2, 128], strides = [1, 1]} : vector<16x128xf32> to vector<2x128xf32>
    %444 = arith.addf %442, %443 : vector<2x128xf32>
    %445 = vector.extract_strided_slice %444 {offsets = [0, 0], sizes = [2, 32], strides = [1, 1]} : vector<2x128xf32> to vector<2x32xf32>
    %446 = arith.negf %445 : vector<2x32xf32>
    %447 = math.exp %446 : vector<2x32xf32>
    %cst_94 = arith.constant 1.000000e+00 : f32
    %448 = vector.broadcast %cst_94 : f32 to vector<2x32xf32>
    %449 = arith.addf %448, %447 : vector<2x32xf32>
    %450 = arith.divf %448, %449 : vector<2x32xf32>
    %451 = vector.extract_strided_slice %444 {offsets = [0, 32], sizes = [2, 32], strides = [1, 1]} : vector<2x128xf32> to vector<2x32xf32>
    %452 = arith.negf %451 : vector<2x32xf32>
    %453 = math.exp %452 : vector<2x32xf32>
    %cst_95 = arith.constant 1.000000e+00 : f32
    %454 = vector.broadcast %cst_95 : f32 to vector<2x32xf32>
    %455 = arith.addf %454, %453 : vector<2x32xf32>
    %456 = arith.divf %454, %455 : vector<2x32xf32>
    %457 = vector.extract_strided_slice %444 {offsets = [0, 64], sizes = [2, 32], strides = [1, 1]} : vector<2x128xf32> to vector<2x32xf32>
    %458 = vector.extract_strided_slice %444 {offsets = [0, 96], sizes = [2, 32], strides = [1, 1]} : vector<2x128xf32> to vector<2x32xf32>
    %459 = arith.mulf %450, %458 : vector<2x32xf32>
    %460 = arith.addf %457, %459 : vector<2x32xf32>
    %461 = math.tanh %460 : vector<2x32xf32>
    %cst_96 = arith.constant 1.000000e+00 : f32
    %462 = vector.broadcast %cst_96 : f32 to vector<2x32xf32>
    %463 = arith.subf %462, %456 : vector<2x32xf32>
    %464 = arith.mulf %463, %461 : vector<2x32xf32>
    %465 = arith.mulf %456, %376 : vector<2x32xf32>
    %466 = arith.addf %464, %465 : vector<2x32xf32>
    %467 = tpu.concatenate %466, %403 in 1 : vector<2x32xf32>, vector<2x32xf32> -> vector<2x64xf32>
    %468 = arith.truncf %467 : vector<2x64xf32> to vector<2x64xbf16>
    %cst_97 = arith.constant dense<0.000000e+00> : vector<2x128xf32>
    %469 = tpu.matmul %468, %39, %cst_97 {dimension_numbers = #tpu.dot_dimension_numbers<[1], [0], [0], [1], [0, 0, 1, 1], [], []>} : vector<2x64xbf16>, vector<64x128xbf16>, vector<2x128xf32> -> vector<2x128xf32>
    %470 = vector.broadcast %41 : vector<1x128xf32> to vector<2x128xf32>
    %471 = arith.addf %469, %470 : vector<2x128xf32>
    %472 = vector.extract_strided_slice %471 {offsets = [0, 0], sizes = [2, 32], strides = [1, 1]} : vector<2x128xf32> to vector<2x32xf32>
    %473 = arith.negf %472 : vector<2x32xf32>
    %474 = math.exp %473 : vector<2x32xf32>
    %cst_98 = arith.constant 1.000000e+00 : f32
    %475 = vector.broadcast %cst_98 : f32 to vector<2x32xf32>
    %476 = arith.addf %475, %474 : vector<2x32xf32>
    %477 = arith.divf %475, %476 : vector<2x32xf32>
    %478 = vector.extract_strided_slice %471 {offsets = [0, 32], sizes = [2, 32], strides = [1, 1]} : vector<2x128xf32> to vector<2x32xf32>
    %479 = arith.negf %478 : vector<2x32xf32>
    %480 = math.exp %479 : vector<2x32xf32>
    %cst_99 = arith.constant 1.000000e+00 : f32
    %481 = vector.broadcast %cst_99 : f32 to vector<2x32xf32>
    %482 = arith.addf %481, %480 : vector<2x32xf32>
    %483 = arith.divf %481, %482 : vector<2x32xf32>
    %484 = vector.extract_strided_slice %471 {offsets = [0, 64], sizes = [2, 32], strides = [1, 1]} : vector<2x128xf32> to vector<2x32xf32>
    %485 = vector.extract_strided_slice %471 {offsets = [0, 96], sizes = [2, 32], strides = [1, 1]} : vector<2x128xf32> to vector<2x32xf32>
    %486 = arith.mulf %477, %485 : vector<2x32xf32>
    %487 = arith.addf %484, %486 : vector<2x32xf32>
    %488 = math.tanh %487 : vector<2x32xf32>
    %cst_100 = arith.constant 1.000000e+00 : f32
    %489 = vector.broadcast %cst_100 : f32 to vector<2x32xf32>
    %490 = arith.subf %489, %483 : vector<2x32xf32>
    %491 = arith.mulf %490, %488 : vector<2x32xf32>
    %492 = arith.mulf %483, %403 : vector<2x32xf32>
    %493 = arith.addf %491, %492 : vector<2x32xf32>
    %494 = tpu.concatenate %493, %435 in 1 : vector<2x32xf32>, vector<2x32xf32> -> vector<2x64xf32>
    %c8 = arith.constant 8 : index
    %c0_101 = arith.constant 0 : index
    %495 = vector.load %arg5[%c8, %c0_101] : memref<16x64xf32, #tpu.memory_space<vmem>>, vector<2x64xf32>
    tpu.vector_store %arg5[%c8, %c0_101], %494 {strides = array<i32>} : memref<16x64xf32, #tpu.memory_space<vmem>>, vector<2x64xf32>,
    %496 = arith.truncf %493 : vector<2x32xf32> to vector<2x32xbf16>
    %cst_102 = arith.constant dense<0.000000e+00> : vector<2x32xf32>
    %497 = tpu.matmul %496, %3, %cst_102 {dimension_numbers = #tpu.dot_dimension_numbers<[1], [0], [0], [1], [0, 0, 1, 1], [], []>} : vector<2x32xbf16>, vector<32x32xbf16>, vector<2x32xf32> -> vector<2x32xf32>
    %498 = vector.extract_strided_slice %26 {offsets = [0, 0], sizes = [10, 32], strides = [1, 1]} : vector<20x32xf32> to vector<10x32xf32>
    %499 = vector.extract_strided_slice %497 {offsets = [0, 0], sizes = [1, 32], strides = [1, 1]} : vector<2x32xf32> to vector<1x32xf32>
    %500 = vector.broadcast %499 : vector<1x32xf32> to vector<10x32xf32>
    %501 = arith.addf %498, %500 : vector<10x32xf32>
    %502 = vector.extract_strided_slice %26 {offsets = [10, 0], sizes = [10, 32], strides = [1, 1]} : vector<20x32xf32> to vector<10x32xf32>
    %503 = vector.extract_strided_slice %497 {offsets = [1, 0], sizes = [1, 32], strides = [1, 1]} : vector<2x32xf32> to vector<1x32xf32>
    %504 = vector.broadcast %503 : vector<1x32xf32> to vector<10x32xf32>
    %505 = arith.addf %502, %504 : vector<10x32xf32>
    %506 = tpu.concatenate %501, %505 in 0 : vector<10x32xf32>, vector<10x32xf32> -> vector<20x32xf32>
    %507 = math.tanh %506 : vector<20x32xf32>
    %508 = arith.truncf %507 : vector<20x32xf32> to vector<20x32xbf16>
    %cst_103 = arith.constant dense<0.000000e+00> : vector<1x20xf32>
    %509 = tpu.matmul %8, %508, %cst_103 {dimension_numbers = #tpu.dot_dimension_numbers<[1], [1], [0], [0], [0, 0, 1, 0], [], []>} : vector<1x32xbf16>, vector<20x32xbf16>, vector<1x20xf32> -> vector<1x20xf32>
    %510 = vector.shape_cast %509 : vector<1x20xf32> to vector<1x20xf32>
    %511 = vector.broadcast %510 : vector<1x20xf32> to vector<2x20xf32>
    %cst_104 = arith.constant -1.000000e+30 : f32
    %512 = vector.broadcast %cst_104 : f32 to vector<2x20xf32>
    %513 = arith.select %37, %511, %512 : vector<2x20xi1>, vector<2x20xf32>
    %cst_105 = arith.constant dense<0xFF800000> : vector<2xf32>
    %514 = vector.multi_reduction <maximumf>, %513, %cst_105 [1] : vector<2x20xf32> to vector<2xf32>
    %515 = vector.shape_cast %514 : vector<2xf32> to vector<2x1xf32>
    %516 = vector.broadcast %515 : vector<2x1xf32> to vector<2x20xf32>
    %517 = arith.subf %513, %516 : vector<2x20xf32>
    %518 = math.exp %517 : vector<2x20xf32>
    %cst_106 = arith.constant dense<0.000000e+00> : vector<2xf32>
    %519 = vector.multi_reduction <add>, %518, %cst_106 [1] : vector<2x20xf32> to vector<2xf32>
    %520 = vector.shape_cast %519 : vector<2xf32> to vector<2x1xf32>
    %521 = tpu.reciprocal %520 {approx = true} : vector<2x1xf32> -> vector<2x1xf32>
    %522 = vector.broadcast %521 : vector<2x1xf32> to vector<2x20xf32>
    %523 = arith.mulf %518, %522 : vector<2x20xf32>
    %524 = arith.truncf %523 : vector<2x20xf32> to vector<2x20xbf16>
    %cst_107 = arith.constant dense<0.000000e+00> : vector<2x32xf32>
    %525 = tpu.matmul %524, %23, %cst_107 {dimension_numbers = #tpu.dot_dimension_numbers<[1], [0], [0], [1], [0, 0, 1, 1], [], []>} : vector<2x20xbf16>, vector<20x32xbf16>, vector<2x32xf32> -> vector<2x32xf32>
    %526 = vector.extract_strided_slice %523 {offsets = [0, 0], sizes = [2, 10], strides = [1, 1]} : vector<2x20xf32> to vector<2x10xf32>
    %527 = vector.extract_strided_slice %523 {offsets = [0, 10], sizes = [2, 10], strides = [1, 1]} : vector<2x20xf32> to vector<2x10xf32>
    %528 = arith.addf %526, %527 : vector<2x10xf32>
    %c0_108 = arith.constant 0 : index
    %c306 = arith.constant 306 : index
    %529 = vector.load %arg4[%c0_108, %c306] : memref<2x512xf32, #tpu.memory_space<vmem>>, vector<2x10xf32>
    tpu.vector_store %arg4[%c0_108, %c306], %528 {strides = array<i32>} : memref<2x512xf32, #tpu.memory_space<vmem>>, vector<2x10xf32>,
    %530 = tpu.concatenate %525, %466 in 1 : vector<2x32xf32>, vector<2x32xf32> -> vector<2x64xf32>
    %531 = arith.truncf %530 : vector<2x64xf32> to vector<2x64xbf16>
    %cst_109 = arith.constant dense<0.000000e+00> : vector<2x128xf32>
    %532 = tpu.matmul %531, %38, %cst_109 {dimension_numbers = #tpu.dot_dimension_numbers<[1], [0], [0], [1], [0, 0, 1, 1], [], []>} : vector<2x64xbf16>, vector<64x128xbf16>, vector<2x128xf32> -> vector<2x128xf32>
    %533 = vector.extract_strided_slice %21 {offsets = [10, 0], sizes = [2, 128], strides = [1, 1]} : vector<16x128xf32> to vector<2x128xf32>
    %534 = arith.addf %532, %533 : vector<2x128xf32>
    %535 = vector.extract_strided_slice %534 {offsets = [0, 0], sizes = [2, 32], strides = [1, 1]} : vector<2x128xf32> to vector<2x32xf32>
    %536 = arith.negf %535 : vector<2x32xf32>
    %537 = math.exp %536 : vector<2x32xf32>
    %cst_110 = arith.constant 1.000000e+00 : f32
    %538 = vector.broadcast %cst_110 : f32 to vector<2x32xf32>
    %539 = arith.addf %538, %537 : vector<2x32xf32>
    %540 = arith.divf %538, %539 : vector<2x32xf32>
    %541 = vector.extract_strided_slice %534 {offsets = [0, 32], sizes = [2, 32], strides = [1, 1]} : vector<2x128xf32> to vector<2x32xf32>
    %542 = arith.negf %541 : vector<2x32xf32>
    %543 = math.exp %542 : vector<2x32xf32>
    %cst_111 = arith.constant 1.000000e+00 : f32
    %544 = vector.broadcast %cst_111 : f32 to vector<2x32xf32>
    %545 = arith.addf %544, %543 : vector<2x32xf32>
    %546 = arith.divf %544, %545 : vector<2x32xf32>
    %547 = vector.extract_strided_slice %534 {offsets = [0, 64], sizes = [2, 32], strides = [1, 1]} : vector<2x128xf32> to vector<2x32xf32>
    %548 = vector.extract_strided_slice %534 {offsets = [0, 96], sizes = [2, 32], strides = [1, 1]} : vector<2x128xf32> to vector<2x32xf32>
    %549 = arith.mulf %540, %548 : vector<2x32xf32>
    %550 = arith.addf %547, %549 : vector<2x32xf32>
    %551 = math.tanh %550 : vector<2x32xf32>
    %cst_112 = arith.constant 1.000000e+00 : f32
    %552 = vector.broadcast %cst_112 : f32 to vector<2x32xf32>
    %553 = arith.subf %552, %546 : vector<2x32xf32>
    %554 = arith.mulf %553, %551 : vector<2x32xf32>
    %555 = arith.mulf %546, %466 : vector<2x32xf32>
    %556 = arith.addf %554, %555 : vector<2x32xf32>
    %557 = tpu.concatenate %556, %493 in 1 : vector<2x32xf32>, vector<2x32xf32> -> vector<2x64xf32>
    %558 = arith.truncf %557 : vector<2x64xf32> to vector<2x64xbf16>
    %cst_113 = arith.constant dense<0.000000e+00> : vector<2x128xf32>
    %559 = tpu.matmul %558, %39, %cst_113 {dimension_numbers = #tpu.dot_dimension_numbers<[1], [0], [0], [1], [0, 0, 1, 1], [], []>} : vector<2x64xbf16>, vector<64x128xbf16>, vector<2x128xf32> -> vector<2x128xf32>
    %560 = vector.broadcast %41 : vector<1x128xf32> to vector<2x128xf32>
    %561 = arith.addf %559, %560 : vector<2x128xf32>
    %562 = vector.extract_strided_slice %561 {offsets = [0, 0], sizes = [2, 32], strides = [1, 1]} : vector<2x128xf32> to vector<2x32xf32>
    %563 = arith.negf %562 : vector<2x32xf32>
    %564 = math.exp %563 : vector<2x32xf32>
    %cst_114 = arith.constant 1.000000e+00 : f32
    %565 = vector.broadcast %cst_114 : f32 to vector<2x32xf32>
    %566 = arith.addf %565, %564 : vector<2x32xf32>
    %567 = arith.divf %565, %566 : vector<2x32xf32>
    %568 = vector.extract_strided_slice %561 {offsets = [0, 32], sizes = [2, 32], strides = [1, 1]} : vector<2x128xf32> to vector<2x32xf32>
    %569 = arith.negf %568 : vector<2x32xf32>
    %570 = math.exp %569 : vector<2x32xf32>
    %cst_115 = arith.constant 1.000000e+00 : f32
    %571 = vector.broadcast %cst_115 : f32 to vector<2x32xf32>
    %572 = arith.addf %571, %570 : vector<2x32xf32>
    %573 = arith.divf %571, %572 : vector<2x32xf32>
    %574 = vector.extract_strided_slice %561 {offsets = [0, 64], sizes = [2, 32], strides = [1, 1]} : vector<2x128xf32> to vector<2x32xf32>
    %575 = vector.extract_strided_slice %561 {offsets = [0, 96], sizes = [2, 32], strides = [1, 1]} : vector<2x128xf32> to vector<2x32xf32>
    %576 = arith.mulf %567, %575 : vector<2x32xf32>
    %577 = arith.addf %574, %576 : vector<2x32xf32>
    %578 = math.tanh %577 : vector<2x32xf32>
    %cst_116 = arith.constant 1.000000e+00 : f32
    %579 = vector.broadcast %cst_116 : f32 to vector<2x32xf32>
    %580 = arith.subf %579, %573 : vector<2x32xf32>
    %581 = arith.mulf %580, %578 : vector<2x32xf32>
    %582 = arith.mulf %573, %493 : vector<2x32xf32>
    %583 = arith.addf %581, %582 : vector<2x32xf32>
    %584 = tpu.concatenate %583, %525 in 1 : vector<2x32xf32>, vector<2x32xf32> -> vector<2x64xf32>
    %c10 = arith.constant 10 : index
    %c0_117 = arith.constant 0 : index
    %585 = vector.load %arg5[%c10, %c0_117] : memref<16x64xf32, #tpu.memory_space<vmem>>, vector<2x64xf32>
    tpu.vector_store %arg5[%c10, %c0_117], %584 {strides = array<i32>} : memref<16x64xf32, #tpu.memory_space<vmem>>, vector<2x64xf32>,
    %586 = arith.truncf %583 : vector<2x32xf32> to vector<2x32xbf16>
    %cst_118 = arith.constant dense<0.000000e+00> : vector<2x32xf32>
    %587 = tpu.matmul %586, %3, %cst_118 {dimension_numbers = #tpu.dot_dimension_numbers<[1], [0], [0], [1], [0, 0, 1, 1], [], []>} : vector<2x32xbf16>, vector<32x32xbf16>, vector<2x32xf32> -> vector<2x32xf32>
    %588 = vector.extract_strided_slice %26 {offsets = [0, 0], sizes = [10, 32], strides = [1, 1]} : vector<20x32xf32> to vector<10x32xf32>
    %589 = vector.extract_strided_slice %587 {offsets = [0, 0], sizes = [1, 32], strides = [1, 1]} : vector<2x32xf32> to vector<1x32xf32>
    %590 = vector.broadcast %589 : vector<1x32xf32> to vector<10x32xf32>
    %591 = arith.addf %588, %590 : vector<10x32xf32>
    %592 = vector.extract_strided_slice %26 {offsets = [10, 0], sizes = [10, 32], strides = [1, 1]} : vector<20x32xf32> to vector<10x32xf32>
    %593 = vector.extract_strided_slice %587 {offsets = [1, 0], sizes = [1, 32], strides = [1, 1]} : vector<2x32xf32> to vector<1x32xf32>
    %594 = vector.broadcast %593 : vector<1x32xf32> to vector<10x32xf32>
    %595 = arith.addf %592, %594 : vector<10x32xf32>
    %596 = tpu.concatenate %591, %595 in 0 : vector<10x32xf32>, vector<10x32xf32> -> vector<20x32xf32>
    %597 = math.tanh %596 : vector<20x32xf32>
    %598 = arith.truncf %597 : vector<20x32xf32> to vector<20x32xbf16>
    %cst_119 = arith.constant dense<0.000000e+00> : vector<1x20xf32>
    %599 = tpu.matmul %8, %598, %cst_119 {dimension_numbers = #tpu.dot_dimension_numbers<[1], [1], [0], [0], [0, 0, 1, 0], [], []>} : vector<1x32xbf16>, vector<20x32xbf16>, vector<1x20xf32> -> vector<1x20xf32>
    %600 = vector.shape_cast %599 : vector<1x20xf32> to vector<1x20xf32>
    %601 = vector.broadcast %600 : vector<1x20xf32> to vector<2x20xf32>
    %cst_120 = arith.constant -1.000000e+30 : f32
    %602 = vector.broadcast %cst_120 : f32 to vector<2x20xf32>
    %603 = arith.select %37, %601, %602 : vector<2x20xi1>, vector<2x20xf32>
    %cst_121 = arith.constant dense<0xFF800000> : vector<2xf32>
    %604 = vector.multi_reduction <maximumf>, %603, %cst_121 [1] : vector<2x20xf32> to vector<2xf32>
    %605 = vector.shape_cast %604 : vector<2xf32> to vector<2x1xf32>
    %606 = vector.broadcast %605 : vector<2x1xf32> to vector<2x20xf32>
    %607 = arith.subf %603, %606 : vector<2x20xf32>
    %608 = math.exp %607 : vector<2x20xf32>
    %cst_122 = arith.constant dense<0.000000e+00> : vector<2xf32>
    %609 = vector.multi_reduction <add>, %608, %cst_122 [1] : vector<2x20xf32> to vector<2xf32>
    %610 = vector.shape_cast %609 : vector<2xf32> to vector<2x1xf32>
    %611 = tpu.reciprocal %610 {approx = true} : vector<2x1xf32> -> vector<2x1xf32>
    %612 = vector.broadcast %611 : vector<2x1xf32> to vector<2x20xf32>
    %613 = arith.mulf %608, %612 : vector<2x20xf32>
    %614 = arith.truncf %613 : vector<2x20xf32> to vector<2x20xbf16>
    %cst_123 = arith.constant dense<0.000000e+00> : vector<2x32xf32>
    %615 = tpu.matmul %614, %23, %cst_123 {dimension_numbers = #tpu.dot_dimension_numbers<[1], [0], [0], [1], [0, 0, 1, 1], [], []>} : vector<2x20xbf16>, vector<20x32xbf16>, vector<2x32xf32> -> vector<2x32xf32>
    %616 = vector.extract_strided_slice %613 {offsets = [0, 0], sizes = [2, 10], strides = [1, 1]} : vector<2x20xf32> to vector<2x10xf32>
    %617 = vector.extract_strided_slice %613 {offsets = [0, 10], sizes = [2, 10], strides = [1, 1]} : vector<2x20xf32> to vector<2x10xf32>
    %618 = arith.addf %616, %617 : vector<2x10xf32>
    %c0_124 = arith.constant 0 : index
    %c316 = arith.constant 316 : index
    %619 = vector.load %arg4[%c0_124, %c316] : memref<2x512xf32, #tpu.memory_space<vmem>>, vector<2x10xf32>
    tpu.vector_store %arg4[%c0_124, %c316], %618 {strides = array<i32>} : memref<2x512xf32, #tpu.memory_space<vmem>>, vector<2x10xf32>,
    %620 = tpu.concatenate %615, %556 in 1 : vector<2x32xf32>, vector<2x32xf32> -> vector<2x64xf32>
    %621 = arith.truncf %620 : vector<2x64xf32> to vector<2x64xbf16>
    %cst_125 = arith.constant dense<0.000000e+00> : vector<2x128xf32>
    %622 = tpu.matmul %621, %38, %cst_125 {dimension_numbers = #tpu.dot_dimension_numbers<[1], [0], [0], [1], [0, 0, 1, 1], [], []>} : vector<2x64xbf16>, vector<64x128xbf16>, vector<2x128xf32> -> vector<2x128xf32>
    %623 = vector.extract_strided_slice %21 {offsets = [12, 0], sizes = [2, 128], strides = [1, 1]} : vector<16x128xf32> to vector<2x128xf32>
    %624 = arith.addf %622, %623 : vector<2x128xf32>
    %625 = vector.extract_strided_slice %624 {offsets = [0, 0], sizes = [2, 32], strides = [1, 1]} : vector<2x128xf32> to vector<2x32xf32>
    %626 = arith.negf %625 : vector<2x32xf32>
    %627 = math.exp %626 : vector<2x32xf32>
    %cst_126 = arith.constant 1.000000e+00 : f32
    %628 = vector.broadcast %cst_126 : f32 to vector<2x32xf32>
    %629 = arith.addf %628, %627 : vector<2x32xf32>
    %630 = arith.divf %628, %629 : vector<2x32xf32>
    %631 = vector.extract_strided_slice %624 {offsets = [0, 32], sizes = [2, 32], strides = [1, 1]} : vector<2x128xf32> to vector<2x32xf32>
    %632 = arith.negf %631 : vector<2x32xf32>
    %633 = math.exp %632 : vector<2x32xf32>
    %cst_127 = arith.constant 1.000000e+00 : f32
    %634 = vector.broadcast %cst_127 : f32 to vector<2x32xf32>
    %635 = arith.addf %634, %633 : vector<2x32xf32>
    %636 = arith.divf %634, %635 : vector<2x32xf32>
    %637 = vector.extract_strided_slice %624 {offsets = [0, 64], sizes = [2, 32], strides = [1, 1]} : vector<2x128xf32> to vector<2x32xf32>
    %638 = vector.extract_strided_slice %624 {offsets = [0, 96], sizes = [2, 32], strides = [1, 1]} : vector<2x128xf32> to vector<2x32xf32>
    %639 = arith.mulf %630, %638 : vector<2x32xf32>
    %640 = arith.addf %637, %639 : vector<2x32xf32>
    %641 = math.tanh %640 : vector<2x32xf32>
    %cst_128 = arith.constant 1.000000e+00 : f32
    %642 = vector.broadcast %cst_128 : f32 to vector<2x32xf32>
    %643 = arith.subf %642, %636 : vector<2x32xf32>
    %644 = arith.mulf %643, %641 : vector<2x32xf32>
    %645 = arith.mulf %636, %556 : vector<2x32xf32>
    %646 = arith.addf %644, %645 : vector<2x32xf32>
    %647 = tpu.concatenate %646, %583 in 1 : vector<2x32xf32>, vector<2x32xf32> -> vector<2x64xf32>
    %648 = arith.truncf %647 : vector<2x64xf32> to vector<2x64xbf16>
    %cst_129 = arith.constant dense<0.000000e+00> : vector<2x128xf32>
    %649 = tpu.matmul %648, %39, %cst_129 {dimension_numbers = #tpu.dot_dimension_numbers<[1], [0], [0], [1], [0, 0, 1, 1], [], []>} : vector<2x64xbf16>, vector<64x128xbf16>, vector<2x128xf32> -> vector<2x128xf32>
    %650 = vector.broadcast %41 : vector<1x128xf32> to vector<2x128xf32>
    %651 = arith.addf %649, %650 : vector<2x128xf32>
    %652 = vector.extract_strided_slice %651 {offsets = [0, 0], sizes = [2, 32], strides = [1, 1]} : vector<2x128xf32> to vector<2x32xf32>
    %653 = arith.negf %652 : vector<2x32xf32>
    %654 = math.exp %653 : vector<2x32xf32>
    %cst_130 = arith.constant 1.000000e+00 : f32
    %655 = vector.broadcast %cst_130 : f32 to vector<2x32xf32>
    %656 = arith.addf %655, %654 : vector<2x32xf32>
    %657 = arith.divf %655, %656 : vector<2x32xf32>
    %658 = vector.extract_strided_slice %651 {offsets = [0, 32], sizes = [2, 32], strides = [1, 1]} : vector<2x128xf32> to vector<2x32xf32>
    %659 = arith.negf %658 : vector<2x32xf32>
    %660 = math.exp %659 : vector<2x32xf32>
    %cst_131 = arith.constant 1.000000e+00 : f32
    %661 = vector.broadcast %cst_131 : f32 to vector<2x32xf32>
    %662 = arith.addf %661, %660 : vector<2x32xf32>
    %663 = arith.divf %661, %662 : vector<2x32xf32>
    %664 = vector.extract_strided_slice %651 {offsets = [0, 64], sizes = [2, 32], strides = [1, 1]} : vector<2x128xf32> to vector<2x32xf32>
    %665 = vector.extract_strided_slice %651 {offsets = [0, 96], sizes = [2, 32], strides = [1, 1]} : vector<2x128xf32> to vector<2x32xf32>
    %666 = arith.mulf %657, %665 : vector<2x32xf32>
    %667 = arith.addf %664, %666 : vector<2x32xf32>
    %668 = math.tanh %667 : vector<2x32xf32>
    %cst_132 = arith.constant 1.000000e+00 : f32
    %669 = vector.broadcast %cst_132 : f32 to vector<2x32xf32>
    %670 = arith.subf %669, %663 : vector<2x32xf32>
    %671 = arith.mulf %670, %668 : vector<2x32xf32>
    %672 = arith.mulf %663, %583 : vector<2x32xf32>
    %673 = arith.addf %671, %672 : vector<2x32xf32>
    %674 = tpu.concatenate %673, %615 in 1 : vector<2x32xf32>, vector<2x32xf32> -> vector<2x64xf32>
    %c12 = arith.constant 12 : index
    %c0_133 = arith.constant 0 : index
    %675 = vector.load %arg5[%c12, %c0_133] : memref<16x64xf32, #tpu.memory_space<vmem>>, vector<2x64xf32>
    tpu.vector_store %arg5[%c12, %c0_133], %674 {strides = array<i32>} : memref<16x64xf32, #tpu.memory_space<vmem>>, vector<2x64xf32>,
    %676 = arith.truncf %673 : vector<2x32xf32> to vector<2x32xbf16>
    %cst_134 = arith.constant dense<0.000000e+00> : vector<2x32xf32>
    %677 = tpu.matmul %676, %3, %cst_134 {dimension_numbers = #tpu.dot_dimension_numbers<[1], [0], [0], [1], [0, 0, 1, 1], [], []>} : vector<2x32xbf16>, vector<32x32xbf16>, vector<2x32xf32> -> vector<2x32xf32>
    %678 = vector.extract_strided_slice %26 {offsets = [0, 0], sizes = [10, 32], strides = [1, 1]} : vector<20x32xf32> to vector<10x32xf32>
    %679 = vector.extract_strided_slice %677 {offsets = [0, 0], sizes = [1, 32], strides = [1, 1]} : vector<2x32xf32> to vector<1x32xf32>
    %680 = vector.broadcast %679 : vector<1x32xf32> to vector<10x32xf32>
    %681 = arith.addf %678, %680 : vector<10x32xf32>
    %682 = vector.extract_strided_slice %26 {offsets = [10, 0], sizes = [10, 32], strides = [1, 1]} : vector<20x32xf32> to vector<10x32xf32>
    %683 = vector.extract_strided_slice %677 {offsets = [1, 0], sizes = [1, 32], strides = [1, 1]} : vector<2x32xf32> to vector<1x32xf32>
    %684 = vector.broadcast %683 : vector<1x32xf32> to vector<10x32xf32>
    %685 = arith.addf %682, %684 : vector<10x32xf32>
    %686 = tpu.concatenate %681, %685 in 0 : vector<10x32xf32>, vector<10x32xf32> -> vector<20x32xf32>
    %687 = math.tanh %686 : vector<20x32xf32>
    %688 = arith.truncf %687 : vector<20x32xf32> to vector<20x32xbf16>
    %cst_135 = arith.constant dense<0.000000e+00> : vector<1x20xf32>
    %689 = tpu.matmul %8, %688, %cst_135 {dimension_numbers = #tpu.dot_dimension_numbers<[1], [1], [0], [0], [0, 0, 1, 0], [], []>} : vector<1x32xbf16>, vector<20x32xbf16>, vector<1x20xf32> -> vector<1x20xf32>
    %690 = vector.shape_cast %689 : vector<1x20xf32> to vector<1x20xf32>
    %691 = vector.broadcast %690 : vector<1x20xf32> to vector<2x20xf32>
    %cst_136 = arith.constant -1.000000e+30 : f32
    %692 = vector.broadcast %cst_136 : f32 to vector<2x20xf32>
    %693 = arith.select %37, %691, %692 : vector<2x20xi1>, vector<2x20xf32>
    %cst_137 = arith.constant dense<0xFF800000> : vector<2xf32>
    %694 = vector.multi_reduction <maximumf>, %693, %cst_137 [1] : vector<2x20xf32> to vector<2xf32>
    %695 = vector.shape_cast %694 : vector<2xf32> to vector<2x1xf32>
    %696 = vector.broadcast %695 : vector<2x1xf32> to vector<2x20xf32>
    %697 = arith.subf %693, %696 : vector<2x20xf32>
    %698 = math.exp %697 : vector<2x20xf32>
    %cst_138 = arith.constant dense<0.000000e+00> : vector<2xf32>
    %699 = vector.multi_reduction <add>, %698, %cst_138 [1] : vector<2x20xf32> to vector<2xf32>
    %700 = vector.shape_cast %699 : vector<2xf32> to vector<2x1xf32>
    %701 = tpu.reciprocal %700 {approx = true} : vector<2x1xf32> -> vector<2x1xf32>
    %702 = vector.broadcast %701 : vector<2x1xf32> to vector<2x20xf32>
    %703 = arith.mulf %698, %702 : vector<2x20xf32>
    %704 = arith.truncf %703 : vector<2x20xf32> to vector<2x20xbf16>
    %cst_139 = arith.constant dense<0.000000e+00> : vector<2x32xf32>
    %705 = tpu.matmul %704, %23, %cst_139 {dimension_numbers = #tpu.dot_dimension_numbers<[1], [0], [0], [1], [0, 0, 1, 1], [], []>} : vector<2x20xbf16>, vector<20x32xbf16>, vector<2x32xf32> -> vector<2x32xf32>
    %706 = vector.extract_strided_slice %703 {offsets = [0, 0], sizes = [2, 10], strides = [1, 1]} : vector<2x20xf32> to vector<2x10xf32>
    %707 = vector.extract_strided_slice %703 {offsets = [0, 10], sizes = [2, 10], strides = [1, 1]} : vector<2x20xf32> to vector<2x10xf32>
    %708 = arith.addf %706, %707 : vector<2x10xf32>
    %c0_140 = arith.constant 0 : index
    %c326 = arith.constant 326 : index
    %709 = vector.load %arg4[%c0_140, %c326] : memref<2x512xf32, #tpu.memory_space<vmem>>, vector<2x10xf32>
    tpu.vector_store %arg4[%c0_140, %c326], %708 {strides = array<i32>} : memref<2x512xf32, #tpu.memory_space<vmem>>, vector<2x10xf32>,
    %710 = tpu.concatenate %705, %646 in 1 : vector<2x32xf32>, vector<2x32xf32> -> vector<2x64xf32>
    %711 = arith.truncf %710 : vector<2x64xf32> to vector<2x64xbf16>
    %cst_141 = arith.constant dense<0.000000e+00> : vector<2x128xf32>
    %712 = tpu.matmul %711, %38, %cst_141 {dimension_numbers = #tpu.dot_dimension_numbers<[1], [0], [0], [1], [0, 0, 1, 1], [], []>} : vector<2x64xbf16>, vector<64x128xbf16>, vector<2x128xf32> -> vector<2x128xf32>
    %713 = vector.extract_strided_slice %21 {offsets = [14, 0], sizes = [2, 128], strides = [1, 1]} : vector<16x128xf32> to vector<2x128xf32>
    %714 = arith.addf %712, %713 : vector<2x128xf32>
    %715 = vector.extract_strided_slice %714 {offsets = [0, 0], sizes = [2, 32], strides = [1, 1]} : vector<2x128xf32> to vector<2x32xf32>
    %716 = arith.negf %715 : vector<2x32xf32>
    %717 = math.exp %716 : vector<2x32xf32>
    %cst_142 = arith.constant 1.000000e+00 : f32
    %718 = vector.broadcast %cst_142 : f32 to vector<2x32xf32>
    %719 = arith.addf %718, %717 : vector<2x32xf32>
    %720 = arith.divf %718, %719 : vector<2x32xf32>
    %721 = vector.extract_strided_slice %714 {offsets = [0, 32], sizes = [2, 32], strides = [1, 1]} : vector<2x128xf32> to vector<2x32xf32>
    %722 = arith.negf %721 : vector<2x32xf32>
    %723 = math.exp %722 : vector<2x32xf32>
    %cst_143 = arith.constant 1.000000e+00 : f32
    %724 = vector.broadcast %cst_143 : f32 to vector<2x32xf32>
    %725 = arith.addf %724, %723 : vector<2x32xf32>
    %726 = arith.divf %724, %725 : vector<2x32xf32>
    %727 = vector.extract_strided_slice %714 {offsets = [0, 64], sizes = [2, 32], strides = [1, 1]} : vector<2x128xf32> to vector<2x32xf32>
    %728 = vector.extract_strided_slice %714 {offsets = [0, 96], sizes = [2, 32], strides = [1, 1]} : vector<2x128xf32> to vector<2x32xf32>
    %729 = arith.mulf %720, %728 : vector<2x32xf32>
    %730 = arith.addf %727, %729 : vector<2x32xf32>
    %731 = math.tanh %730 : vector<2x32xf32>
    %cst_144 = arith.constant 1.000000e+00 : f32
    %732 = vector.broadcast %cst_144 : f32 to vector<2x32xf32>
    %733 = arith.subf %732, %726 : vector<2x32xf32>
    %734 = arith.mulf %733, %731 : vector<2x32xf32>
    %735 = arith.mulf %726, %646 : vector<2x32xf32>
    %736 = arith.addf %734, %735 : vector<2x32xf32>
    %737 = tpu.concatenate %736, %673 in 1 : vector<2x32xf32>, vector<2x32xf32> -> vector<2x64xf32>
    %738 = arith.truncf %737 : vector<2x64xf32> to vector<2x64xbf16>
    %cst_145 = arith.constant dense<0.000000e+00> : vector<2x128xf32>
    %739 = tpu.matmul %738, %39, %cst_145 {dimension_numbers = #tpu.dot_dimension_numbers<[1], [0], [0], [1], [0, 0, 1, 1], [], []>} : vector<2x64xbf16>, vector<64x128xbf16>, vector<2x128xf32> -> vector<2x128xf32>
    %740 = vector.broadcast %41 : vector<1x128xf32> to vector<2x128xf32>
    %741 = arith.addf %739, %740 : vector<2x128xf32>
    %742 = vector.extract_strided_slice %741 {offsets = [0, 0], sizes = [2, 32], strides = [1, 1]} : vector<2x128xf32> to vector<2x32xf32>
    %743 = arith.negf %742 : vector<2x32xf32>
    %744 = math.exp %743 : vector<2x32xf32>
    %cst_146 = arith.constant 1.000000e+00 : f32
    %745 = vector.broadcast %cst_146 : f32 to vector<2x32xf32>
    %746 = arith.addf %745, %744 : vector<2x32xf32>
    %747 = arith.divf %745, %746 : vector<2x32xf32>
    %748 = vector.extract_strided_slice %741 {offsets = [0, 32], sizes = [2, 32], strides = [1, 1]} : vector<2x128xf32> to vector<2x32xf32>
    %749 = arith.negf %748 : vector<2x32xf32>
    %750 = math.exp %749 : vector<2x32xf32>
    %cst_147 = arith.constant 1.000000e+00 : f32
    %751 = vector.broadcast %cst_147 : f32 to vector<2x32xf32>
    %752 = arith.addf %751, %750 : vector<2x32xf32>
    %753 = arith.divf %751, %752 : vector<2x32xf32>
    %754 = vector.extract_strided_slice %741 {offsets = [0, 64], sizes = [2, 32], strides = [1, 1]} : vector<2x128xf32> to vector<2x32xf32>
    %755 = vector.extract_strided_slice %741 {offsets = [0, 96], sizes = [2, 32], strides = [1, 1]} : vector<2x128xf32> to vector<2x32xf32>
    %756 = arith.mulf %747, %755 : vector<2x32xf32>
    %757 = arith.addf %754, %756 : vector<2x32xf32>
    %758 = math.tanh %757 : vector<2x32xf32>
    %cst_148 = arith.constant 1.000000e+00 : f32
    %759 = vector.broadcast %cst_148 : f32 to vector<2x32xf32>
    %760 = arith.subf %759, %753 : vector<2x32xf32>
    %761 = arith.mulf %760, %758 : vector<2x32xf32>
    %762 = arith.mulf %753, %673 : vector<2x32xf32>
    %763 = arith.addf %761, %762 : vector<2x32xf32>
    %764 = tpu.concatenate %763, %705 in 1 : vector<2x32xf32>, vector<2x32xf32> -> vector<2x64xf32>
    %c14 = arith.constant 14 : index
    %c0_149 = arith.constant 0 : index
    %765 = vector.load %arg5[%c14, %c0_149] : memref<16x64xf32, #tpu.memory_space<vmem>>, vector<2x64xf32>
    tpu.vector_store %arg5[%c14, %c0_149], %764 {strides = array<i32>} : memref<16x64xf32, #tpu.memory_space<vmem>>, vector<2x64xf32>,
    %766 = vector.extract_strided_slice %2 {offsets = [0, 64], sizes = [32, 32], strides = [1, 1]} : vector<32x128xbf16> to vector<32x32xbf16>
    %767 = vector.extract_strided_slice %2 {offsets = [0, 96], sizes = [32, 32], strides = [1, 1]} : vector<32x128xbf16> to vector<32x32xbf16>
    %768 = tpu.concatenate %766, %767 in 0 : vector<32x32xbf16>, vector<32x32xbf16> -> vector<64x32xbf16>
    %769 = vector.extract_strided_slice %5 {offsets = [0, 64], sizes = [1, 32], strides = [1, 1]} : vector<1x128xbf16> to vector<1x32xbf16>
    %770 = arith.extf %769 : vector<1x32xbf16> to vector<1x32xf32>
    %c0_150 = arith.constant 0 : index
    %c0_151 = arith.constant 0 : index
    %771 = vector.load %arg5[%c0_150, %c0_151] : memref<16x64xf32, #tpu.memory_space<vmem>>, vector<16x64xf32>
    %772 = arith.truncf %771 : vector<16x64xf32> to vector<16x64xbf16>
    %cst_152 = arith.constant dense<0.000000e+00> : vector<16x32xf32>
    %773 = tpu.matmul %772, %768, %cst_152 {dimension_numbers = #tpu.dot_dimension_numbers<[1], [0], [0], [1], [0, 0, 1, 1], [], []>} : vector<16x64xbf16>, vector<64x32xbf16>, vector<16x32xf32> -> vector<16x32xf32>
    %774 = vector.broadcast %770 : vector<1x32xf32> to vector<16x32xf32>
    %775 = arith.addf %773, %774 : vector<16x32xf32>
    %776 = vector.extract_strided_slice %775 {offsets = [0, 0], sizes = [2, 32], strides = [1, 1]} : vector<16x32xf32> to vector<2x32xf32>
    %777 = vector.extract_strided_slice %775 {offsets = [2, 0], sizes = [2, 32], strides = [1, 1]} : vector<16x32xf32> to vector<2x32xf32>
    %778 = vector.extract_strided_slice %775 {offsets = [4, 0], sizes = [2, 32], strides = [1, 1]} : vector<16x32xf32> to vector<2x32xf32>
    %779 = vector.extract_strided_slice %775 {offsets = [6, 0], sizes = [2, 32], strides = [1, 1]} : vector<16x32xf32> to vector<2x32xf32>
    %780 = vector.extract_strided_slice %775 {offsets = [8, 0], sizes = [2, 32], strides = [1, 1]} : vector<16x32xf32> to vector<2x32xf32>
    %781 = vector.extract_strided_slice %775 {offsets = [10, 0], sizes = [2, 32], strides = [1, 1]} : vector<16x32xf32> to vector<2x32xf32>
    %782 = vector.extract_strided_slice %775 {offsets = [12, 0], sizes = [2, 32], strides = [1, 1]} : vector<16x32xf32> to vector<2x32xf32>
    %783 = vector.extract_strided_slice %775 {offsets = [14, 0], sizes = [2, 32], strides = [1, 1]} : vector<16x32xf32> to vector<2x32xf32>
    %784 = tpu.concatenate %776, %777, %778, %779, %780, %781, %782, %783 in 1 : vector<2x32xf32>, vector<2x32xf32>, vector<2x32xf32>, vector<2x32xf32>, vector<2x32xf32>, vector<2x32xf32>, vector<2x32xf32>, vector<2x32xf32> -> vector<2x256xf32>
    %c0_153 = arith.constant 0 : index
    %c0_154 = arith.constant 0 : index
    %785 = vector.load %arg4[%c0_153, %c0_154] : memref<2x512xf32, #tpu.memory_space<vmem>>, vector<2x256xf32>
    tpu.vector_store %arg4[%c0_153, %c0_154], %784 {strides = array<i32>} : memref<2x512xf32, #tpu.memory_space<vmem>>, vector<2x256xf32>,
    %c0_155 = arith.constant 0 : index
    %c384 = arith.constant 384 : index
    %786 = vector.load %arg4[%c0_155, %c384] : memref<2x512xf32, #tpu.memory_space<vmem>>, vector<2x32xf32>
    tpu.vector_store %arg4[%c0_155, %c384], %736 {strides = array<i32>} : memref<2x512xf32, #tpu.memory_space<vmem>>, vector<2x32xf32>,
    %c0_156 = arith.constant 0 : index
    %c416 = arith.constant 416 : index
    %787 = vector.load %arg4[%c0_156, %c416] : memref<2x512xf32, #tpu.memory_space<vmem>>, vector<2x32xf32>
    tpu.vector_store %arg4[%c0_156, %c416], %763 {strides = array<i32>} : memref<2x512xf32, #tpu.memory_space<vmem>>, vector<2x32xf32>,
    return
  }
}

</mosaic_0001>

<bundles_post_ra>
// kernel: attention_decoder_forward.1
= control target key start
LH: loop header
LB: loop body
LE: loop exit
PB: predicated region body
PF: predicated region fallthrough
CT: control target
= control target key end

     0   :  { %s2387_s17 = smov 96   ;;  %vm61_vm0 = vcmask 261120   ;;  %vm177_vm1 = vcmask 1041408   ;;  %v27_v41 = vlaneseq  ;;  %vm214_vm5 = vcmask 156672   ;;  %s2390_s9 = smov 32   ;;  %s3212_s3 = inlined_call_operand.vmem [shape: bf16[195,128], index: 3, kind: input, shape index: {}]   ;;  %s3213_s1 = inlined_call_operand.vmem [shape: f32[2,2,32], index: 1, kind: input, shape index: {}]   ;;  %s3214_s2 = inlined_call_operand.vmem [shape: f32[20,32], index: 2, kind: input, shape index: {}]   ;;  %s3215_s0 = inlined_call_operand.vmem [shape: s32[16,1], index: 0, kind: input, shape index: {}]   ;;  %s3216_s4 = inlined_call_operand.vmem [shape: f32[2,512], index: 4, kind: output, shape index: {}]  }
   0x1   :  { %v2428_v0 = vld [vmem:[%s3212_s3 + $0x58] sm:$0xff]  ;;  %v2436_v1 = vld [vmem:[%s3212_s3 + $0x50] sm:$0xff]  ;;  %v2444_v2 = vld [vmem:[%s3213_s1 + $0x2] sm:$0x3]  ;;  %v2388_v53 = vmov 0   ;;  %v2389_v56 = vmov 0.0  }
   0x2   :  { %97 = vrot.lane.b32.xlu0 %v2428_v0, %s2387_s17  ;;  %164 = vmatpush.bf16.msra.mxu2 %v2428_v0  ;;  %v152_v3 = vpack.c.bf16 %v2444_v2, %v2444_v2  ;;  %v23_v4 = vld [vmem:[%s3212_s3 + $0x60] sm:$0x2]  ;;  %v80_v10 = vld [vmem:[%s3214_s2 + $0x8] sm:$0xff]  ;;  %v81_v13 = vld [vmem:[%s3214_s2 + $0x10] sm:$0xf]  ;;  %v126_v42 = vshrl.u32 %v27_v41, 7 }
   0x3   :  { %v185_v5 = vunpack.c.l.b16 %v23_v4  ;;  %v79_v9 = vld [vmem:[%s3214_s2] sm:$0xff]  ;;  %v2472_v14 = vpack.c.bf16 %v81_v13, %v81_v13  ;;  %v24_v18 = vunpack.c.l.bf16 %v23_v4  ;;  %v28_v44 = vand.u32 127, %v27_v41  ;;  %2197 = vset.pattern.permute.xlu2 %v2388_v53  ;;  %2198 = vset.pattern.permute.xlu0 %v2388_v53  ;;  %v26_v55 = vld [vmem:[%s3215_s0 + $0x8] sm:$0xff]  ;;  %18 = vst [vmem:[%s3216_s4] sm:$0xff] %v2389_v56  ;;  %s2391_s25 = smov 64   ;;  %s2392_s2 = smov 118  }
   0x4   :  { %v2464_v12 = vpack.c.bf16 %v80_v10, %v79_v9  ;;  %v129_v43 = vadd.s32 1, %v126_v42  ;;  %v127_v45 = vmul.u32 10, %v126_v42  ;;  %v25_v54 = vld [vmem:[%s3215_s0] sm:$0xff]  ;;  %v2175_v62 = vld [vmem:[%s3212_s3 + $0x8] sm:$0xff]  ;;  %vm227_vm8 = vcmask 162816   ;;  %s2393_s6 = smov 20  }
   0x5   :  { %v186_v6 = vpack.c.b16 %v185_v5, %v185_v5  ;;  %v2476_v20 = vperm.slane %v24_v18, 2  ;;  %30 = vperm.xlu2 %2197, %v25_v54   ;;  %71 = vmatpush.bf16.msra.mxu0 %v2175_v62  ;;  %v2522_v63 = vsel %vm177_vm1, %v2472_v14, 0  ;;  %v149_v9 = vld [vmem:[%s3213_s1] sm:$0x3]  ;;  %v2556_v18 = vld [vmem:[%s3212_s3 + $0x18] sm:$0xff]  ;;  %vm283_vm9 = vcmask 523264  }
   0x6   :  { %165 = vmatpush.bf16.msra.mxu2 %v2436_v1  ;;  %v130_v46 = vmul.u32 10, %v129_v43  ;;  %vm128_vm2 = vcmp.ge.s32.totalorder %v28_v44, %v127_v45  ;;  %s2395_s13 = smov 10   ;;  %s2396_s14 = smov 40  }
   0x7   :  { %v187_v8 = vrot.slane %v186_v6, 1  ;;  %s2397_s15 = smov 50   ;;  %s2398_s27 = smov 60  }
   0x8   :  { %vm131_vm3 = vcmp.lt.s32.totalorder %v28_v44, %v130_v46  ;;  %s2399_s28 = smov 70  }
   0x9   :  { %2083 = vmatmul.msk.bf16.vlgmr.msra.gmra.mxu2 %vm61_vm0, %v152_v3  ;;  %188 = vrot.lane.b32.xlu1 %v187_v8, %s2387_s17  ;;  %vm2498_vm4 = vmand %vm128_vm2, %vm131_vm3  ;;  %v2174_v3 = vld [vmem:[%s3212_s3] sm:$0xff] }
   0xa   :  { %95 = vrot.lane.b32.xlu0 %v2436_v1, %s2387_s17  ;;  %72 = vmatpush.bf16.msra.mxu0 %v2174_v3 }
   0xd   :  { %33 = vperm.xlu2 %2197, %v26_v55  }
   0xe   :  { %239 = vmatpush.bf16.msrb.mxu0 %v2522_v63 }
  0x12   :  { %240 = vmatpush.bf16.msrb.mxu0 %v2464_v12 }
  0x15   :  { %254 = vrot.lane.b32.xlu2 %v149_v9, %s2390_s9 }
  0x5f   :  { %v31_v4 = vpop.permute.xlu2 %30 }
  0x60   :  { %vm35_vm6 = vcmp.eq.s32.totalorder %v31_v4, %v28_v44 }
  0x67   :  { %v34_v5 = vpop.permute.xlu2 %33 }
  0x68   :  { %vm36_vm7 = vcmp.eq.s32.totalorder %v34_v5, %v28_v44 }
  0x69   :  { %v2062_v6 = vsel %vm36_vm7, 1.0, %v2389_v56 }
  0x74   :  { %v2452_v7 = vpop.permute.xlu0 %97 }
  0x75   :  { %113 = vmatpush.bf16.msra.mxu1 %v2452_v7 }
  0x7b   :  { %v2494_v40 = vpop.permute.xlu1 %188 }
  0x7c   :  { %v2462_v11 = vpop.permute.xlu0 %95 }
  0x7d   :  { %114 = vmatpush.bf16.msra.mxu1 %v2462_v11 }
  0x80   :  { %2080 = vmatmul.msk.bf16.vlgmr.msra.gmra.mxu1 %vm61_vm0, %v2464_v12 }
  0x8c   :  { %v167_v15 = vpop.f32.mrf.mxu2 }
  0x8d   :  { %v174_v21 = vperm.slane %v167_v15, 1  ;;  %v171_v23 = vperm.slane %v167_v15, 0 }
  0x90   :  { %2081 = vmatmul.msk.bf16.gmra.mxu1 %vm61_vm0, %v2472_v14 }
  0x94   :  { %v169_v16 = vpop.f32.mrf.mxu2 }
  0x95   :  { %v2544_v16 = vld [vmem:[%s3212_s3 + $0x28] sm:$0xff] }
  0x96   :  { %291 = vmatpush.bf16.msrb.mxu2 %v2544_v16 }
  0xfd   :  { %v116_v17 = vpop.f32.mrf.mxu1 }
  0xfe   :  { %v2487_v28 = vadd.f32 %v116_v17, %v2476_v20  ;;  %v2550_v17 = vld [vmem:[%s3212_s3 + $0x20] sm:$0xff] }
  0xff   :  { %292 = vmatpush.bf16.msrb.mxu2 %v2550_v17 }
 0x100   :  { %v172_v31 = vadd.f32 %v171_v23, %v2487_v28 }
 0x103   :  { %293 = vmatpush.bf16.msrb.mxu2 %v2556_v18 }
 0x105   :  { %v118_v19 = vpop.f32.mrf.mxu1 }
 0x106   :  { %v2479_v22 = vadd.f32 %v118_v19, %v2476_v20  ;;  %v2562_v19 = vld [vmem:[%s3212_s3 + $0x60] sm:$0x1] }
 0x108   :  { %v173_v26 = vadd.f32 %v171_v23, %v2479_v22  ;;  %v175_v27 = vadd.f32 %v174_v21, %v2479_v22  ;;  %v47_v23 = vunpack.c.l.bf16 %v2562_v19 }
 0x10a   :  { %v178_v30 = vsel %vm177_vm1, %v173_v26, %v175_v27 }
 0x10d   :  { %v121_v24 = vpop.f32.mrf.mxu1 }
 0x10e   :  { %v2482_v25 = vadd.f32 %v121_v24, %v2476_v20  ;;  %v48_v24 = vperm.slane %v47_v23, 0 }
 0x110   :  { %v176_v29 = vadd.f32 %v174_v21, %v2482_v25 }
 0x112   :  { %2199 = vtanh.f32 %v176_v29  ;;  %v2572_v29 = vld [vmem:[%s3212_s3 + $0x10] sm:$0xff] }
 0x113   :  { %2201 = vtanh.f32 %v178_v30  ;;  %294 = vmatpush.bf16.msrb.mxu2 %v2572_v29  ;;  %v255_v30 = vpop.permute.xlu2 %254 }
 0x114   :  { %2203 = vtanh.f32 %v172_v31 }
 0x115   :  { %v123_v32 = vpop.f32.mrf.mxu1 }
 0x117   :  { %512 = vmatpush.bf16.msra.mxu2 %v2522_v63 }
 0x118   :  { %v2200_v33 = vpop.eup %2199 }
 0x119   :  { %v183_v34 = vpack.c.bf16 %v2200_v33, %v2200_v33  ;;  %v2202_v36 = vpop.eup %2201 }
 0x11a   :  { %v2204_v37 = vpop.eup %2203 }
 0x11b   :  { %v197_v35 = vsel %vm61_vm0, %v183_v34, 0  ;;  %v182_v38 = vpack.c.bf16 %v2202_v36, %v2204_v37  ;;  %513 = vmatpush.bf16.msra.mxu2 %v2464_v12 }
 0x11c   :  { %205 = vmatpush.bf16.xpose.msra.mxu3 %v197_v35 }
 0x11d   :  { %v194_v39 = vsel %vm61_vm0, %v182_v38, 0 }
 0x124   :  { %206 = vmatpush.bf16.xpose.msra.mxu3 %v194_v39 }
 0x12b   :  { %2084 = vmatmul.msk.bf16.vlgmr.msra.gmra.mxu3 %vm61_vm0, %v2494_v40 }
 0x1ae   :  { %v208_v47 = vpop.f32.mrf.mxu3 }
 0x1af   :  { %v212_v49 = vperm.slane %v208_v47, 0 }
 0x1b1   :  { %v213_v50 = vsel %vm2498_vm4, %v212_v49, -1e+30 }
 0x1b2   :  { %v215_v51 = vsel %vm214_vm5, %v213_v50, -inf }
 0x1b3   :  { %216 = vmax.xlane.f32.xlu1 %v215_v51 }
 0x1b6   :  { %v210_v52 = vpop.f32.mrf.mxu3 }
 0x1cc   :  { %343 = vrot.lane.b32.xlu1 %v2444_v2, %s2390_s9  ;;  %v2061_v2 = vsel %vm35_vm6, 1.0, %v2389_v56 }
 0x1cd   :  { %v41_v8 = vpack.c.bf16 %v2062_v6, %v2061_v2  ;;  %v2616_v6 = vld [vmem:[%s3212_s3 + $0x30] sm:$0xff] }
 0x1cf   :  { %2071 = vmatmul.msk.bf16.vlgmr.msra.gmra.mxu0 %vm61_vm0, %v41_v8 }
 0x1d0   :  { %451 = vmatpush.bf16.msra.mxu0 %v2428_v0 }
 0x1d4   :  { %452 = vmatpush.bf16.msra.mxu0 %v2436_v1 }
 0x226   :  { %v217_v57 = vpop.xlane.xlu1 %216 }
 0x227   :  { %v218_v58 = vsub.f32 %v213_v50, %v217_v57 }
 0x229   :  { %v219_v59 = vmul.f32 1.442695, %v218_v58 }
 0x22b   :  { %2205 = vpow2.f32 %v219_v59  ;;  %v2591_v59 = vld [vmem:[%s3212_s3 + $0x48] sm:$0xff] }
 0x22c   :  { %380 = vmatpush.bf16.msrb.mxu3 %v2591_v59 }
 0x231   :  { %v2206_v60 = vpop.eup %2205 }
 0x232   :  { %v221_v61 = vsel %vm214_vm5, %v2206_v60, 0.0 }
 0x233   :  { %222 = vadd.xlane.f32.xlu0 %v221_v61  ;;  %v2604_v61 = vld [vmem:[%s3212_s3 + $0x38] sm:$0xff] }
 0x23e   :  { %v344_v8 = vpop.permute.xlu1 %343 }
 0x24c   :  { %v74_v21 = vpop.f32.mrf.mxu0 }
 0x24d   :  { %v2582_v35 = vadd.f32 %v74_v21, %v48_v24 }
 0x254   :  { %v76_v26 = vpop.f32.mrf.mxu0 }
 0x255   :  { %v2567_v27 = vadd.f32 %v76_v26, %v48_v24 }
 0x2a6   :  { %v223_v10 = vpop.xlane.xlu0 %222 }
 0x2a7   :  { %2207 = vrcp.f32 %v223_v10 }
 0x2ad   :  { %v2208_v13 = vpop.eup %2207 }
 0x2ae   :  { %v2536_v14 = vmul.f32 %v2208_v13, %v2206_v60  ;;  %v2597_v60 = vld [vmem:[%s3212_s3 + $0x40] sm:$0xff] }
 0x2af   :  { %381 = vmatpush.bf16.msrb.mxu3 %v2597_v60 }
 0x2b0   :  { %v226_v15 = vpack.c.bf16 %v2536_v14, %v2536_v14 }
 0x2b2   :  { %2085 = vmatmul.msk.bf16.vlgmr.msrb.gmra.mxu0 %vm227_vm8, %v226_v15  ;;  %v2630_v15 = vperm.slane %v47_v23, 1 }
 0x2b3   :  { %602 = vmatpush.bf16.msrb.mxu0 %v2591_v59  ;;  %382 = vmatpush.bf16.msrb.mxu3 %v2604_v61 }
 0x2b7   :  { %603 = vmatpush.bf16.msrb.mxu0 %v2597_v60  ;;  %383 = vmatpush.bf16.msrb.mxu3 %v2616_v6 }
 0x2bb   :  { %604 = vmatpush.bf16.msrb.mxu0 %v2604_v61  ;;  %542 = vmatpush.bf16.msra.mxu3 %v2544_v16 }
 0x2bf   :  { %605 = vmatpush.bf16.msrb.mxu0 %v2616_v6  ;;  %543 = vmatpush.bf16.msra.mxu3 %v2550_v17 }
 0x2c3   :  { %544 = vmatpush.bf16.msra.mxu3 %v2556_v18 }
 0x2c7   :  { %545 = vmatpush.bf16.msra.mxu3 %v2572_v29 }
 0x32f   :  { %v2577_v31 = vpop.f32.mrf.mxu0 }
 0x330   :  { %v257_v32 = vsel %vm61_vm0, %v2577_v31, %v255_v30 }
 0x331   :  { %v258_v33 = vpack.c.bf16 %v257_v32, %v257_v32 }
 0x333   :  { %2102 = vmatmul.msk.bf16.vlgmr.msrb.gmra.mxu2 %vm283_vm9, %v258_v33 }
 0x337   :  { %v244_v34 = vpop.f32.mrf.mxu0 }
 0x3b6   :  { %v296_v36 = vpop.f32.mrf.mxu2 }
 0x3b7   :  { %v297_v37 = vadd.f32 %v296_v36, %v2582_v35 }
 0x3b9   :  { %320 = vrot.lane.b32.xlu2 %v297_v37, %s2390_s9  ;;  %v2103_v39 = vmul.f32 -1.442695, %v297_v37 }
 0x3bb   :  { %2209 = vpow2.f32 %v2103_v39 }
 0x3be   :  { %v298_v38 = vpop.f32.mrf.mxu2 }
 0x3c1   :  { %v2210_v41 = vpop.eup %2209 }
 0x3c2   :  { %v303_v42 = vadd.f32 1.0, %v2210_v41 }
 0x3c4   :  { %2211 = vrcp.f32 %v303_v42  ;;  %v315_v49 = vand.u32 2147483648, %v303_v42  ;;  %vm309_vm11 = vweird.f32 %v303_v42  ;;  %v313_v50 = vand.u32 2147483647, %v303_v42 }
 0x3c6   :  { %v316_v52 = vor.u32 1.1754944e-38, %v315_v49  ;;  %vm314_vm13 = vcmp.eq.f32.partialorder %v313_v50, 8.507059e+37 }
 0x3ca   :  { %v2212_v43 = vpop.eup %2211 }
 0x3cb   :  { %v305_v44 = vmul.f32 %v2212_v43, %v303_v42  ;;  %vm310_vm10 = vweird.f32 %v2212_v43 }
 0x3cc   :  { %vm311_vm12 = vmor %vm309_vm11, %vm310_vm10 }
 0x3cd   :  { %v306_v45 = vsub.f32 1.0, %v305_v44 }
 0x3cf   :  { %v307_v46 = vmul.f32 %v2212_v43, %v306_v45 }
 0x3d1   :  { %v308_v47 = vadd.f32 %v2212_v43, %v307_v46 }
 0x3d3   :  { %v312_v51 = vsel %vm311_vm12, %v2212_v43, %v308_v47 }
 0x3d4   :  { %v317_v54 = vsel %vm314_vm13, %v316_v52, %v312_v51 }
 0x3d5   :  { %v330_v62 = vsub.f32 1.0, %v317_v54  ;;  %v336_v4 = vmul.f32 %v317_v54, %v255_v30 }
 0x413   :  { %v321_v53 = vpop.permute.xlu2 %320 }
 0x414   :  { %v323_v55 = vmul.f32 %v321_v53, %v317_v54 }
 0x416   :  { %325 = vrot.lane.b32.xlu2 %v323_v55, %s2391_s25 }
 0x470   :  { %v326_v56 = vpop.permute.xlu2 %325 }
 0x471   :  { %v328_v57 = vadd.f32 %v326_v56, %v297_v37 }
 0x473   :  { %2213 = vtanh.f32 %v328_v57 }
 0x479   :  { %v2214_v58 = vpop.eup %2213 }
 0x47a   :  { %332 = vrot.lane.b32.xlu2 %v2214_v58, %s2387_s17 }
 0x4d4   :  { %v333_v3 = vpop.permute.xlu2 %332 }
 0x4d5   :  { %v335_v2 = vmul.f32 %v333_v3, %v330_v62 }
 0x4d7   :  { %v2609_v5 = vadd.f32 %v336_v4, %v335_v2 }
 0x4d9   :  { %339 = vrot.lane.b32.xlu2 %v2609_v5, %s2387_s17 }
 0x533   :  { %v340_v9 = vpop.permute.xlu2 %339 }
 0x534   :  { %v346_v10 = vsel %vm61_vm0, %v340_v9, %v344_v8 }
 0x535   :  { %v347_v13 = vpack.c.bf16 %v346_v10, %v346_v10 }
 0x537   :  { %2120 = vmatmul.msk.bf16.vlgmr.msrb.gmra.mxu3 %vm283_vm9, %v347_v13 }
 0x538   :  { %733 = vmatpush.bf16.msrb.mxu3 %v2522_v63 }
 0x53c   :  { %734 = vmatpush.bf16.msrb.mxu3 %v2464_v12 }
 0x5ba   :  { %v385_v21 = vpop.f32.mrf.mxu3 }
 0x5bb   :  { %v386_v24 = vadd.f32 %v385_v21, %v2630_v15 }
 0x5bd   :  { %409 = vrot.lane.b32.xlu2 %v386_v24, %s2390_s9  ;;  %v2121_v30 = vmul.f32 -1.442695, %v386_v24 }
 0x5bf   :  { %2215 = vpow2.f32 %v2121_v30 }
 0x5c2   :  { %v387_v26 = vpop.f32.mrf.mxu3 }
 0x5c5   :  { %v2216_v32 = vpop.eup %2215 }
 0x5c6   :  { %v392_v33 = vadd.f32 1.0, %v2216_v32 }
 0x5c8   :  { %2217 = vrcp.f32 %v392_v33  ;;  %v404_v19 = vand.u32 2147483648, %v392_v33  ;;  %vm398_vm15 = vweird.f32 %v392_v33  ;;  %v402_v23 = vand.u32 2147483647, %v392_v33 }
 0x5ca   :  { %v405_v42 = vor.u32 1.1754944e-38, %v404_v19  ;;  %vm403_vm3 = vcmp.eq.f32.partialorder %v402_v23, 8.507059e+37 }
 0x5ce   :  { %v2218_v34 = vpop.eup %2217 }
 0x5cf   :  { %v394_v36 = vmul.f32 %v2218_v34, %v392_v33  ;;  %vm399_vm14 = vweird.f32 %v2218_v34 }
 0x5d0   :  { %vm400_vm2 = vmor %vm398_vm15, %vm399_vm14 }
 0x5d1   :  { %v395_v37 = vsub.f32 1.0, %v394_v36 }
 0x5d3   :  { %v396_v38 = vmul.f32 %v2218_v34, %v395_v37 }
 0x5d5   :  { %v397_v39 = vadd.f32 %v2218_v34, %v396_v38 }
 0x5d7   :  { %v401_v41 = vsel %vm400_vm2, %v2218_v34, %v397_v39 }
 0x5d8   :  { %v406_v44 = vsel %vm403_vm3, %v405_v42, %v401_v41 }
 0x5d9   :  { %v419_v50 = vsub.f32 1.0, %v406_v44  ;;  %v425_v52 = vmul.f32 %v406_v44, %v344_v8 }
 0x617   :  { %v410_v43 = vpop.permute.xlu2 %409 }
 0x618   :  { %v412_v45 = vmul.f32 %v410_v43, %v406_v44 }
 0x61a   :  { %414 = vrot.lane.b32.xlu0 %v412_v45, %s2391_s25 }
 0x68c   :  { %v415_v46 = vpop.permute.xlu0 %414 }
 0x68d   :  { %v417_v47 = vadd.f32 %v415_v46, %v386_v24 }
 0x68f   :  { %2219 = vtanh.f32 %v417_v47 }
 0x695   :  { %v2220_v49 = vpop.eup %2219 }
 0x696   :  { %421 = vrot.lane.b32.xlu2 %v2220_v49, %s2387_s17 }
 0x6f0   :  { %v422_v51 = vpop.permute.xlu2 %421 }
 0x6f1   :  { %v424_v53 = vmul.f32 %v422_v51, %v419_v50 }
 0x6f3   :  { %v2636_v54 = vadd.f32 %v425_v52, %v424_v53  ;;  %v533_v53 = vrot.slane %v2582_v35, 2 }
 0x6f5   :  { %v438_v55 = vpack.c.bf16 %v2636_v54, %v2636_v54 }
 0x6f7   :  { %440 = vrot.lane.b32.xlu2 %v438_v55, %s2387_s17 }
 0x751   :  { %v441_v56 = vpop.permute.xlu2 %440 }
 0x752   :  { %2122 = vmatmul.msk.bf16.vlgmr.msra.gmra.mxu0 %vm61_vm0, %v441_v56 }
 0x753   :  { %762 = vmatpush.bf16.msra.mxu0 %v2544_v16 }
 0x757   :  { %763 = vmatpush.bf16.msra.mxu0 %v2550_v17 }
 0x75b   :  { %764 = vmatpush.bf16.msra.mxu0 %v2556_v18 }
 0x75f   :  { %765 = vmatpush.bf16.msra.mxu0 %v2572_v29 }
 0x7cf   :  { %v454_v57 = vpop.f32.mrf.mxu0 }
 0x7d0   :  { %v458_v58 = vperm.slane %v454_v57, 0  ;;  %v461_v62 = vperm.slane %v454_v57, 1 }
 0x7d2   :  { %v463_v3 = vadd.f32 %v461_v62, %v2482_v25  ;;  %v460_v4 = vadd.f32 %v458_v58, %v2479_v22  ;;  %v462_v2 = vadd.f32 %v461_v62, %v2479_v22  ;;  %v459_v8 = vadd.f32 %v458_v58, %v2487_v28 }
 0x7d4   :  { %2221 = vtanh.f32 %v463_v3  ;;  %v464_v9 = vsel %vm177_vm1, %v460_v4, %v462_v2 }
 0x7d5   :  { %2223 = vtanh.f32 %v459_v8 }
 0x7d6   :  { %2225 = vtanh.f32 %v464_v9 }
 0x7d7   :  { %v456_v10 = vpop.f32.mrf.mxu0 }
 0x7da   :  { %v2222_v13 = vpop.eup %2221 }
 0x7db   :  { %v469_v21 = vpack.c.bf16 %v2222_v13, %v2222_v13  ;;  %v2224_v24 = vpop.eup %2223 }
 0x7dc   :  { %v2226_v30 = vpop.eup %2225 }
 0x7dd   :  { %v474_v26 = vsel %vm61_vm0, %v469_v21, 0  ;;  %v468_v32 = vpack.c.bf16 %v2226_v30, %v2224_v24 }
 0x7de   :  { %482 = vmatpush.bf16.xpose.msrb.mxu1 %v474_v26 }
 0x7df   :  { %v471_v33 = vsel %vm61_vm0, %v468_v32, 0 }
 0x7e6   :  { %483 = vmatpush.bf16.xpose.msrb.mxu1 %v471_v33 }
 0x7ed   :  { %2123 = vmatmul.msk.bf16.vlgmr.msrb.gmra.mxu1 %vm61_vm0, %v2494_v40 }
 0x7ee   :  { %672 = vmatpush.bf16.msra.mxu1 %v2428_v0 }
 0x7f2   :  { %673 = vmatpush.bf16.msra.mxu1 %v2436_v1 }
 0x7f6   :  { %822 = vmatpush.bf16.msrb.mxu1 %v2591_v59 }
 0x7fa   :  { %823 = vmatpush.bf16.msrb.mxu1 %v2597_v60 }
 0x7fe   :  { %824 = vmatpush.bf16.msrb.mxu1 %v2604_v61 }
 0x802   :  { %825 = vmatpush.bf16.msrb.mxu1 %v2616_v6 }
 0x86a   :  { %v485_v34 = vpop.f32.mrf.mxu1 }
 0x86b   :  { %v489_v36 = vperm.slane %v485_v34, 0 }
 0x86d   :  { %v490_v37 = vsel %vm2498_vm4, %v489_v36, -1e+30 }
 0x86e   :  { %v491_v38 = vsel %vm214_vm5, %v490_v37, -inf }
 0x86f   :  { %492 = vmax.xlane.f32.xlu1 %v491_v38 }
 0x872   :  { %v487_v39 = vpop.f32.mrf.mxu1 }
 0x8e2   :  { %v493_v19 = vpop.xlane.xlu1 %492 }
 0x8e3   :  { %v494_v23 = vsub.f32 %v490_v37, %v493_v19 }
 0x8e5   :  { %v495_v41 = vmul.f32 1.442695, %v494_v23 }
 0x8e7   :  { %2227 = vpow2.f32 %v495_v41 }
 0x8ed   :  { %v2228_v42 = vpop.eup %2227 }
 0x8ee   :  { %v497_v43 = vsel %vm214_vm5, %v2228_v42, 0.0 }
 0x8ef   :  { %498 = vadd.xlane.f32.xlu0 %v497_v43 }
 0x962   :  { %v499_v44 = vpop.xlane.xlu0 %498 }
 0x963   :  { %2229 = vrcp.f32 %v499_v44 }
 0x969   :  { %v2230_v45 = vpop.eup %2229 }
 0x96a   :  { %v2665_v46 = vmul.f32 %v2230_v45, %v2228_v42 }
 0x96c   :  { %v502_v47 = vpack.c.bf16 %v2665_v46, %v2665_v46 }
 0x96e   :  { %2124 = vmatmul.msk.bf16.vlgmr.msra.gmra.mxu2 %vm227_vm8, %v502_v47 }
 0x9f1   :  { %v2670_v49 = vpop.f32.mrf.mxu2 }
 0x9f2   :  { %v530_v50 = vsel %vm61_vm0, %v2670_v49, %v2609_v5 }
 0x9f3   :  { %v531_v51 = vpack.c.bf16 %v530_v50, %v530_v50 }
 0x9f5   :  { %2125 = vmatmul.msk.bf16.vlgmr.msra.gmra.mxu3 %vm283_vm9, %v531_v51 }
 0x9f9   :  { %v517_v52 = vpop.f32.mrf.mxu2 }
 0xa78   :  { %v547_v55 = vpop.f32.mrf.mxu3 }
 0xa79   :  { %v548_v56 = vadd.f32 %v547_v55, %v533_v53 }
 0xa7b   :  { %571 = vrot.lane.b32.xlu2 %v548_v56, %s2390_s9  ;;  %v2126_v58 = vmul.f32 -1.442695, %v548_v56 }
 0xa7d   :  { %2231 = vpow2.f32 %v2126_v58 }
 0xa80   :  { %v549_v57 = vpop.f32.mrf.mxu3 }
 0xa83   :  { %v2232_v62 = vpop.eup %2231 }
 0xa84   :  { %v554_v3 = vadd.f32 1.0, %v2232_v62 }
 0xa86   :  { %2233 = vrcp.f32 %v554_v3  ;;  %v566_v13 = vand.u32 2147483648, %v554_v3  ;;  %vm560_vm7 = vweird.f32 %v554_v3  ;;  %v564_v21 = vand.u32 2147483647, %v554_v3 }
 0xa88   :  { %v567_v26 = vor.u32 1.1754944e-38, %v566_v13  ;;  %vm565_vm11 = vcmp.eq.f32.partialorder %v564_v21, 8.507059e+37 }
 0xa8c   :  { %v2234_v4 = vpop.eup %2233 }
 0xa8d   :  { %v556_v2 = vmul.f32 %v2234_v4, %v554_v3  ;;  %vm561_vm6 = vweird.f32 %v2234_v4 }
 0xa8e   :  { %vm562_vm10 = vmor %vm560_vm7, %vm561_vm6 }
 0xa8f   :  { %v557_v8 = vsub.f32 1.0, %v556_v2 }
 0xa91   :  { %v558_v9 = vmul.f32 %v2234_v4, %v557_v8 }
 0xa93   :  { %v559_v10 = vadd.f32 %v2234_v4, %v558_v9 }
 0xa95   :  { %v563_v24 = vsel %vm562_vm10, %v2234_v4, %v559_v10 }
 0xa96   :  { %v568_v32 = vsel %vm565_vm11, %v567_v26, %v563_v24 }
 0xa97   :  { %v581_v38 = vsub.f32 1.0, %v568_v32  ;;  %v587_v19 = vmul.f32 %v568_v32, %v2609_v5 }
 0xad5   :  { %v572_v30 = vpop.permute.xlu2 %571 }
 0xad6   :  { %v574_v33 = vmul.f32 %v572_v30, %v568_v32 }
 0xad8   :  { %576 = vrot.lane.b32.xlu2 %v574_v33, %s2391_s25 }
 0xb32   :  { %v577_v34 = vpop.permute.xlu2 %576 }
 0xb33   :  { %v579_v36 = vadd.f32 %v577_v34, %v548_v56 }
 0xb35   :  { %2235 = vtanh.f32 %v579_v36 }
 0xb3b   :  { %v2236_v37 = vpop.eup %2235 }
 0xb3c   :  { %583 = vrot.lane.b32.xlu2 %v2236_v37, %s2387_s17 }
 0xb96   :  { %v584_v39 = vpop.permute.xlu2 %583 }
 0xb97   :  { %v586_v23 = vmul.f32 %v584_v39, %v581_v38 }
 0xb99   :  { %v2681_v41 = vadd.f32 %v587_v19, %v586_v23 }
 0xb9b   :  { %590 = vrot.lane.b32.xlu2 %v2681_v41, %s2387_s17 }
 0xbf5   :  { %v591_v42 = vpop.permute.xlu2 %590 }
 0xbf6   :  { %v593_v43 = vsel %vm61_vm0, %v591_v42, %v2636_v54 }
 0xbf7   :  { %v594_v44 = vpack.c.bf16 %v593_v43, %v593_v43 }
 0xbf9   :  { %2127 = vmatmul.msk.bf16.vlgmr.msrb.gmra.mxu0 %vm283_vm9, %v594_v44 }
 0xbfa   :  { %953 = vmatpush.bf16.msrb.mxu0 %v2522_v63 }
 0xbfe   :  { %954 = vmatpush.bf16.msrb.mxu0 %v2464_v12 }
 0xc76   :  { %v607_v45 = vpop.f32.mrf.mxu0 }
 0xc77   :  { %v608_v5 = vadd.f32 %v607_v45, %v2630_v15 }
 0xc79   :  { %631 = vrot.lane.b32.xlu2 %v608_v5, %s2390_s9  ;;  %v2128_v50 = vmul.f32 -1.442695, %v608_v5 }
 0xc7b   :  { %2237 = vpow2.f32 %v2128_v50 }
 0xc7e   :  { %v609_v47 = vpop.f32.mrf.mxu0 }
 0xc81   :  { %v2238_v51 = vpop.eup %2237 }
 0xc82   :  { %v614_v52 = vadd.f32 1.0, %v2238_v51 }
 0xc84   :  { %2239 = vrcp.f32 %v614_v52  ;;  %v626_v62 = vand.u32 2147483648, %v614_v52  ;;  %vm620_vm13 = vweird.f32 %v614_v52  ;;  %v624_v3 = vand.u32 2147483647, %v614_v52 }
 0xc86   :  { %v627_v2 = vor.u32 1.1754944e-38, %v626_v62  ;;  %vm625_vm15 = vcmp.eq.f32.partialorder %v624_v3, 8.507059e+37 }
 0xc8a   :  { %v2240_v53 = vpop.eup %2239 }
 0xc8b   :  { %v616_v55 = vmul.f32 %v2240_v53, %v614_v52  ;;  %vm621_vm12 = vweird.f32 %v2240_v53 }
 0xc8c   :  { %vm622_vm14 = vmor %vm620_vm13, %vm621_vm12 }
 0xc8d   :  { %v617_v56 = vsub.f32 1.0, %v616_v55 }
 0xc8f   :  { %v618_v57 = vmul.f32 %v2240_v53, %v617_v56 }
 0xc91   :  { %v619_v58 = vadd.f32 %v2240_v53, %v618_v57 }
 0xc93   :  { %v623_v4 = vsel %vm622_vm14, %v2240_v53, %v619_v58 }
 0xc94   :  { %v628_v9 = vsel %vm625_vm15, %v627_v2, %v623_v4 }
 0xc95   :  { %v641_v26 = vsub.f32 1.0, %v628_v9  ;;  %v647_v32 = vmul.f32 %v628_v9, %v2636_v54 }
 0xcd3   :  { %v632_v8 = vpop.permute.xlu2 %631 }
 0xcd4   :  { %v634_v10 = vmul.f32 %v632_v8, %v628_v9 }
 0xcd6   :  { %636 = vrot.lane.b32.xlu1 %v634_v10, %s2391_s25 }
 0xd48   :  { %v637_v13 = vpop.permute.xlu1 %636 }
 0xd49   :  { %v639_v21 = vadd.f32 %v637_v13, %v608_v5 }
 0xd4b   :  { %2241 = vtanh.f32 %v639_v21 }
 0xd51   :  { %v2242_v24 = vpop.eup %2241 }
 0xd52   :  { %643 = vrot.lane.b32.xlu0 %v2242_v24, %s2387_s17 }
 0xdc4   :  { %v644_v30 = vpop.permute.xlu0 %643 }
 0xdc5   :  { %v646_v33 = vmul.f32 %v644_v30, %v641_v26 }
 0xdc7   :  { %v2695_v34 = vadd.f32 %v647_v32, %v646_v33 }
 0xdc9   :  { %v659_v36 = vpack.c.bf16 %v2695_v34, %v2695_v34 }
 0xdcb   :  { %661 = vrot.lane.b32.xlu2 %v659_v36, %s2387_s17  ;;  %v753_v36 = vrot.slane %v2582_v35, 4 }
 0xe25   :  { %v662_v37 = vpop.permute.xlu2 %661 }
 0xe26   :  { %2129 = vmatmul.msk.bf16.vlgmr.msra.gmra.mxu1 %vm61_vm0, %v662_v37 }
 0xe27   :  { %982 = vmatpush.bf16.msra.mxu1 %v2544_v16 }
 0xe2b   :  { %983 = vmatpush.bf16.msra.mxu1 %v2550_v17 }
 0xe2f   :  { %984 = vmatpush.bf16.msra.mxu1 %v2556_v18 }
 0xe33   :  { %985 = vmatpush.bf16.msra.mxu1 %v2572_v29 }
 0xea3   :  { %v675_v38 = vpop.f32.mrf.mxu1 }
 0xea4   :  { %v679_v39 = vperm.slane %v675_v38, 0  ;;  %v682_v19 = vperm.slane %v675_v38, 1 }
 0xea6   :  { %v684_v23 = vadd.f32 %v682_v19, %v2482_v25  ;;  %v681_v42 = vadd.f32 %v679_v39, %v2479_v22  ;;  %v683_v43 = vadd.f32 %v682_v19, %v2479_v22  ;;  %v680_v44 = vadd.f32 %v679_v39, %v2487_v28 }
 0xea8   :  { %2243 = vtanh.f32 %v684_v23  ;;  %v685_v45 = vsel %vm177_vm1, %v681_v42, %v683_v43 }
 0xea9   :  { %2245 = vtanh.f32 %v680_v44 }
 0xeaa   :  { %2247 = vtanh.f32 %v685_v45 }
 0xeab   :  { %v677_v5 = vpop.f32.mrf.mxu1 }
 0xeae   :  { %v2244_v47 = vpop.eup %2243 }
 0xeaf   :  { %v690_v50 = vpack.c.bf16 %v2244_v47, %v2244_v47  ;;  %v2246_v51 = vpop.eup %2245 }
 0xeb0   :  { %v2248_v53 = vpop.eup %2247 }
 0xeb1   :  { %v695_v52 = vsel %vm61_vm0, %v690_v50, 0  ;;  %v689_v55 = vpack.c.bf16 %v2248_v53, %v2246_v51 }
 0xeb2   :  { %703 = vmatpush.bf16.xpose.msrb.mxu2 %v695_v52 }
 0xeb3   :  { %v692_v56 = vsel %vm61_vm0, %v689_v55, 0 }
 0xeba   :  { %704 = vmatpush.bf16.xpose.msrb.mxu2 %v692_v56 }
 0xec1   :  { %2130 = vmatmul.msk.bf16.vlgmr.msrb.gmra.mxu2 %vm61_vm0, %v2494_v40 }
 0xec2   :  { %892 = vmatpush.bf16.msra.mxu2 %v2428_v0 }
 0xec6   :  { %893 = vmatpush.bf16.msra.mxu2 %v2436_v1 }
 0xeca   :  { %1042 = vmatpush.bf16.msrb.mxu2 %v2591_v59 }
 0xece   :  { %1043 = vmatpush.bf16.msrb.mxu2 %v2597_v60 }
 0xed2   :  { %1044 = vmatpush.bf16.msrb.mxu2 %v2604_v61 }
 0xed6   :  { %1045 = vmatpush.bf16.msrb.mxu2 %v2616_v6 }
 0xf44   :  { %v706_v57 = vpop.f32.mrf.mxu2 }
 0xf45   :  { %v710_v58 = vperm.slane %v706_v57, 0 }
 0xf47   :  { %v711_v62 = vsel %vm2498_vm4, %v710_v58, -1e+30 }
 0xf48   :  { %v712_v0 = vsel %vm214_vm5, %v711_v62, -inf }
 0xf49   :  { %713 = vmax.xlane.f32.xlu2 %v712_v0 }
 0xf4c   :  { %v708_v1 = vpop.f32.mrf.mxu2 }
 0xfbc   :  { %v714_v3 = vpop.xlane.xlu2 %713 }
 0xfbd   :  { %v715_v4 = vsub.f32 %v711_v62, %v714_v3 }
 0xfbf   :  { %v716_v2 = vmul.f32 1.442695, %v715_v4 }
 0xfc1   :  { %2249 = vpow2.f32 %v716_v2 }
 0xfc7   :  { %v2250_v8 = vpop.eup %2249 }
 0xfc8   :  { %v718_v9 = vsel %vm214_vm5, %v2250_v8, 0.0 }
 0xfc9   :  { %719 = vadd.xlane.f32.xlu0 %v718_v9 }
0x103c   :  { %v720_v10 = vpop.xlane.xlu0 %719 }
0x103d   :  { %2251 = vrcp.f32 %v720_v10 }
0x1043   :  { %v2252_v13 = vpop.eup %2251 }
0x1044   :  { %v2724_v21 = vmul.f32 %v2252_v13, %v2250_v8 }
0x1046   :  { %v723_v24 = vpack.c.bf16 %v2724_v21, %v2724_v21 }
0x1048   :  { %2131 = vmatmul.msk.bf16.vlgmr.msrb.gmra.mxu3 %vm227_vm8, %v723_v24 }
0x10cb   :  { %v2729_v26 = vpop.f32.mrf.mxu3 }
0x10cc   :  { %v751_v30 = vsel %vm61_vm0, %v2729_v26, %v2681_v41 }
0x10cd   :  { %v752_v32 = vpack.c.bf16 %v751_v30, %v751_v30 }
0x10cf   :  { %2132 = vmatmul.msk.bf16.vlgmr.msra.gmra.mxu0 %vm283_vm9, %v752_v32 }
0x10d3   :  { %v738_v33 = vpop.f32.mrf.mxu3 }
0x114c   :  { %v767_v37 = vpop.f32.mrf.mxu0 }
0x114d   :  { %v768_v38 = vadd.f32 %v767_v37, %v753_v36 }
0x114f   :  { %791 = vrot.lane.b32.xlu1 %v768_v38, %s2390_s9  ;;  %v2133_v19 = vmul.f32 -1.442695, %v768_v38 }
0x1151   :  { %2253 = vpow2.f32 %v2133_v19 }
0x1154   :  { %v769_v39 = vpop.f32.mrf.mxu0 }
0x1157   :  { %v2254_v23 = vpop.eup %2253 }
0x1158   :  { %v774_v42 = vadd.f32 1.0, %v2254_v23 }
0x115a   :  { %2255 = vrcp.f32 %v774_v42  ;;  %v786_v50 = vand.u32 2147483648, %v774_v42  ;;  %vm780_vm3 = vweird.f32 %v774_v42  ;;  %v784_v51 = vand.u32 2147483647, %v774_v42 }
0x115c   :  { %v787_v53 = vor.u32 1.1754944e-38, %v786_v50  ;;  %vm785_vm7 = vcmp.eq.f32.partialorder %v784_v51, 8.507059e+37 }
0x1160   :  { %v2256_v43 = vpop.eup %2255 }
0x1161   :  { %v776_v44 = vmul.f32 %v2256_v43, %v774_v42  ;;  %vm781_vm2 = vweird.f32 %v2256_v43 }
0x1162   :  { %vm782_vm6 = vmor %vm780_vm3, %vm781_vm2 }
0x1163   :  { %v777_v45 = vsub.f32 1.0, %v776_v44 }
0x1165   :  { %v778_v5 = vmul.f32 %v2256_v43, %v777_v45 }
0x1167   :  { %v779_v47 = vadd.f32 %v2256_v43, %v778_v5 }
0x1169   :  { %v783_v52 = vsel %vm782_vm6, %v2256_v43, %v779_v47 }
0x116a   :  { %v788_v56 = vsel %vm785_vm7, %v787_v53, %v783_v52 }
0x116b   :  { %v801_v1 = vsub.f32 1.0, %v788_v56  ;;  %v807_v4 = vmul.f32 %v788_v56, %v2681_v41 }
0x11c1   :  { %v792_v55 = vpop.permute.xlu1 %791 }
0x11c2   :  { %v794_v57 = vmul.f32 %v792_v55, %v788_v56 }
0x11c4   :  { %796 = vrot.lane.b32.xlu1 %v794_v57, %s2391_s25 }
0x1236   :  { %v797_v58 = vpop.permute.xlu1 %796 }
0x1237   :  { %v799_v62 = vadd.f32 %v797_v58, %v768_v38 }
0x1239   :  { %2257 = vtanh.f32 %v799_v62 }
0x123f   :  { %v2258_v0 = vpop.eup %2257 }
0x1240   :  { %803 = vrot.lane.b32.xlu1 %v2258_v0, %s2387_s17 }
0x12b2   :  { %v804_v3 = vpop.permute.xlu1 %803 }
0x12b3   :  { %v806_v2 = vmul.f32 %v804_v3, %v801_v1 }
0x12b5   :  { %v2740_v8 = vadd.f32 %v807_v4, %v806_v2 }
0x12b7   :  { %810 = vrot.lane.b32.xlu1 %v2740_v8, %s2387_s17 }
0x1329   :  { %v811_v9 = vpop.permute.xlu1 %810 }
0x132a   :  { %v813_v10 = vsel %vm61_vm0, %v811_v9, %v2695_v34 }
0x132b   :  { %v814_v13 = vpack.c.bf16 %v813_v10, %v813_v10 }
0x132d   :  { %2134 = vmatmul.msk.bf16.vlgmr.msrb.gmra.mxu1 %vm283_vm9, %v814_v13 }
0x132e   :  { %1173 = vmatpush.bf16.msrb.mxu1 %v2522_v63 }
0x1332   :  { %1174 = vmatpush.bf16.msrb.mxu1 %v2464_v12 }
0x13aa   :  { %v827_v24 = vpop.f32.mrf.mxu1 }
0x13ab   :  { %v828_v41 = vadd.f32 %v827_v24, %v2630_v15 }
0x13ad   :  { %851 = vrot.lane.b32.xlu2 %v828_v41, %s2390_s9  ;;  %v2135_v32 = vmul.f32 -1.442695, %v828_v41 }
0x13af   :  { %2259 = vpow2.f32 %v2135_v32 }
0x13b2   :  { %v829_v30 = vpop.f32.mrf.mxu1 }
0x13b5   :  { %v2260_v33 = vpop.eup %2259 }
0x13b6   :  { %v834_v36 = vadd.f32 1.0, %v2260_v33 }
0x13b8   :  { %2261 = vrcp.f32 %v834_v36  ;;  %v846_v42 = vand.u32 2147483648, %v834_v36  ;;  %vm840_vm11 = vweird.f32 %v834_v36  ;;  %v844_v43 = vand.u32 2147483647, %v834_v36 }
0x13ba   :  { %v847_v45 = vor.u32 1.1754944e-38, %v846_v42  ;;  %vm845_vm13 = vcmp.eq.f32.partialorder %v844_v43, 8.507059e+37 }
0x13be   :  { %v2262_v37 = vpop.eup %2261 }
0x13bf   :  { %v836_v38 = vmul.f32 %v2262_v37, %v834_v36  ;;  %vm841_vm10 = vweird.f32 %v2262_v37 }
0x13c0   :  { %vm842_vm12 = vmor %vm840_vm11, %vm841_vm10 }
0x13c1   :  { %v837_v39 = vsub.f32 1.0, %v836_v38  ;;  %v2780_v38 = vld [vmem:[%s3212_s3 + $0x50] sm:$0xff] }
0x13c3   :  { %v838_v19 = vmul.f32 %v2262_v37, %v837_v39 }
0x13c5   :  { %v839_v23 = vadd.f32 %v2262_v37, %v838_v19 }
0x13c7   :  { %v843_v44 = vsel %vm842_vm12, %v2262_v37, %v839_v23  ;;  %v2774_v37 = vld [vmem:[%s3212_s3 + $0x58] sm:$0xff] }
0x13c8   :  { %v848_v47 = vsel %vm845_vm13, %v847_v45, %v843_v44 }
0x13c9   :  { %v861_v55 = vsub.f32 1.0, %v848_v47  ;;  %v867_v57 = vmul.f32 %v848_v47, %v2695_v34 }
0x1407   :  { %v852_v5 = vpop.permute.xlu2 %851 }
0x1408   :  { %v854_v50 = vmul.f32 %v852_v5, %v848_v47 }
0x140a   :  { %856 = vrot.lane.b32.xlu1 %v854_v50, %s2391_s25 }
0x147c   :  { %v857_v51 = vpop.permute.xlu1 %856 }
0x147d   :  { %v859_v52 = vadd.f32 %v857_v51, %v828_v41 }
0x147f   :  { %2263 = vtanh.f32 %v859_v52 }
0x1485   :  { %v2264_v53 = vpop.eup %2263 }
0x1486   :  { %863 = vrot.lane.b32.xlu0 %v2264_v53, %s2387_s17 }
0x14f8   :  { %v864_v56 = vpop.permute.xlu0 %863 }
0x14f9   :  { %v866_v58 = vmul.f32 %v864_v56, %v861_v55 }
0x14fb   :  { %v2754_v62 = vadd.f32 %v867_v57, %v866_v58  ;;  %v973_v57 = vrot.slane %v2582_v35, 6 }
0x14fd   :  { %v879_v0 = vpack.c.bf16 %v2754_v62, %v2754_v62 }
0x14ff   :  { %881 = vrot.lane.b32.xlu1 %v879_v0, %s2387_s17 }
0x1571   :  { %v882_v1 = vpop.permute.xlu1 %881 }
0x1572   :  { %2136 = vmatmul.msk.bf16.vlgmr.msra.gmra.mxu2 %vm61_vm0, %v882_v1 }
0x1573   :  { %1200 = vmatpush.bf16.msra.mxu2 %v2544_v16 }
0x1577   :  { %1201 = vmatpush.bf16.msra.mxu2 %v2550_v17 }
0x157b   :  { %1202 = vmatpush.bf16.msra.mxu2 %v2556_v18 }
0x157f   :  { %1203 = vmatpush.bf16.msra.mxu2 %v2572_v29 }
0x15f5   :  { %v895_v3 = vpop.f32.mrf.mxu2 }
0x15f6   :  { %v899_v4 = vperm.slane %v895_v3, 0  ;;  %v902_v2 = vperm.slane %v895_v3, 1 }
0x15f8   :  { %v904_v9 = vadd.f32 %v902_v2, %v2482_v25  ;;  %v901_v10 = vadd.f32 %v899_v4, %v2479_v22  ;;  %v903_v13 = vadd.f32 %v902_v2, %v2479_v22  ;;  %v900_v24 = vadd.f32 %v899_v4, %v2487_v28 }
0x15fa   :  { %2265 = vtanh.f32 %v904_v9  ;;  %v905_v16 = vsel %vm177_vm1, %v901_v10, %v903_v13 }
0x15fb   :  { %2267 = vtanh.f32 %v900_v24 }
0x15fc   :  { %2269 = vtanh.f32 %v905_v16 }
0x15fd   :  { %v897_v41 = vpop.f32.mrf.mxu2 }
0x1600   :  { %v2266_v17 = vpop.eup %2265 }
0x1601   :  { %v910_v18 = vpack.c.bf16 %v2266_v17, %v2266_v17  ;;  %v2268_v29 = vpop.eup %2267 }
0x1602   :  { %v2270_v32 = vpop.eup %2269 }
0x1603   :  { %v915_v30 = vsel %vm61_vm0, %v910_v18, 0  ;;  %v909_v33 = vpack.c.bf16 %v2270_v32, %v2268_v29 }
0x1604   :  { %923 = vmatpush.bf16.xpose.msra.mxu3 %v915_v30 }
0x1605   :  { %v912_v36 = vsel %vm61_vm0, %v909_v33, 0 }
0x160c   :  { %924 = vmatpush.bf16.xpose.msra.mxu3 %v912_v36 }
0x1613   :  { %2137 = vmatmul.msk.bf16.vlgmr.msra.gmra.mxu3 %vm61_vm0, %v2494_v40 }
0x1614   :  { %1112 = vmatpush.bf16.msrb.mxu3 %v2774_v37 }
0x1618   :  { %1113 = vmatpush.bf16.msrb.mxu3 %v2780_v38 }
0x161c   :  { %1260 = vmatpush.bf16.msra.mxu3 %v2591_v59 }
0x1620   :  { %1261 = vmatpush.bf16.msra.mxu3 %v2597_v60 }
0x1624   :  { %1262 = vmatpush.bf16.msra.mxu3 %v2604_v61 }
0x1628   :  { %1263 = vmatpush.bf16.msra.mxu3 %v2616_v6 }
0x1696   :  { %v926_v39 = vpop.f32.mrf.mxu3 }
0x1697   :  { %v930_v19 = vperm.slane %v926_v39, 0 }
0x1699   :  { %v931_v23 = vsel %vm2498_vm4, %v930_v19, -1e+30 }
0x169a   :  { %v932_v42 = vsel %vm214_vm5, %v931_v23, -inf }
0x169b   :  { %933 = vmax.xlane.f32.xlu1 %v932_v42 }
0x169e   :  { %v928_v43 = vpop.f32.mrf.mxu3 }
0x170e   :  { %v934_v44 = vpop.xlane.xlu1 %933 }
0x170f   :  { %v935_v45 = vsub.f32 %v931_v23, %v934_v44 }
0x1711   :  { %v936_v5 = vmul.f32 1.442695, %v935_v45 }
0x1713   :  { %2271 = vpow2.f32 %v936_v5 }
0x1719   :  { %v2272_v59 = vpop.eup %2271 }
0x171a   :  { %v938_v60 = vsel %vm214_vm5, %v2272_v59, 0.0 }
0x171b   :  { %939 = vadd.xlane.f32.xlu2 %v938_v60 }
0x178e   :  { %v940_v61 = vpop.xlane.xlu2 %939 }
0x178f   :  { %2273 = vrcp.f32 %v940_v61 }
0x1795   :  { %v2274_v47 = vpop.eup %2273 }
0x1796   :  { %v2793_v50 = vmul.f32 %v2274_v47, %v2272_v59 }
0x1798   :  { %v943_v51 = vpack.c.bf16 %v2793_v50, %v2793_v50 }
0x179a   :  { %2138 = vmatmul.msk.bf16.vlgmr.msrb.gmra.mxu0 %vm227_vm8, %v943_v51 }
0x1817   :  { %v2798_v52 = vpop.f32.mrf.mxu0 }
0x1818   :  { %v971_v53 = vsel %vm61_vm0, %v2798_v52, %v2740_v8 }
0x1819   :  { %v972_v55 = vpack.c.bf16 %v971_v53, %v971_v53 }
0x181b   :  { %2139 = vmatmul.msk.bf16.vlgmr.msra.gmra.mxu1 %vm283_vm9, %v972_v55 }
0x181f   :  { %v958_v56 = vpop.f32.mrf.mxu0 }
0x1898   :  { %v987_v58 = vpop.f32.mrf.mxu1 }
0x1899   :  { %v988_v0 = vadd.f32 %v987_v58, %v973_v57 }
0x189b   :  { %1011 = vrot.lane.b32.xlu0 %v988_v0, %s2390_s9  ;;  %v2140_v3 = vmul.f32 -1.442695, %v988_v0 }
0x189d   :  { %2275 = vpow2.f32 %v2140_v3 }
0x18a0   :  { %v989_v1 = vpop.f32.mrf.mxu1 }
0x18a3   :  { %v2276_v4 = vpop.eup %2275 }
0x18a4   :  { %v994_v2 = vadd.f32 1.0, %v2276_v4 }
0x18a6   :  { %2277 = vrcp.f32 %v994_v2  ;;  %v1006_v41 = vand.u32 2147483648, %v994_v2  ;;  %vm1000_vm15 = vweird.f32 %v994_v2  ;;  %v1004_v17 = vand.u32 2147483647, %v994_v2 }
0x18a8   :  { %v1007_v18 = vor.u32 1.1754944e-38, %v1006_v41  ;;  %vm1005_vm3 = vcmp.eq.f32.partialorder %v1004_v17, 8.507059e+37 }
0x18ac   :  { %v2278_v9 = vpop.eup %2277 }
0x18ad   :  { %v996_v10 = vmul.f32 %v2278_v9, %v994_v2  ;;  %vm1001_vm14 = vweird.f32 %v2278_v9 }
0x18ae   :  { %vm1002_vm2 = vmor %vm1000_vm15, %vm1001_vm14 }
0x18af   :  { %v997_v13 = vsub.f32 1.0, %v996_v10 }
0x18b1   :  { %v998_v24 = vmul.f32 %v2278_v9, %v997_v13 }
0x18b3   :  { %v999_v16 = vadd.f32 %v2278_v9, %v998_v24 }
0x18b5   :  { %v1003_v35 = vsel %vm1002_vm2, %v2278_v9, %v999_v16 }
0x18b6   :  { %v1008_v30 = vsel %vm1005_vm3, %v1007_v18, %v1003_v35 }
0x18b7   :  { %v1021_v19 = vsub.f32 1.0, %v1008_v30  ;;  %v1027_v42 = vmul.f32 %v1008_v30, %v2740_v8 }
0x190d   :  { %v1012_v29 = vpop.permute.xlu0 %1011 }
0x190e   :  { %v1014_v32 = vmul.f32 %v1012_v29, %v1008_v30 }
0x1910   :  { %1016 = vrot.lane.b32.xlu0 %v1014_v32, %s2391_s25 }
0x1982   :  { %v1017_v33 = vpop.permute.xlu0 %1016 }
0x1983   :  { %v1019_v36 = vadd.f32 %v1017_v33, %v988_v0 }
0x1985   :  { %2279 = vtanh.f32 %v1019_v36  ;;  %v2832_v36 = vld [vmem:[%s3212_s3 + $0x28] sm:$0xff] }
0x198b   :  { %v2280_v39 = vpop.eup %2279 }
0x198c   :  { %1023 = vrot.lane.b32.xlu0 %v2280_v39, %s2387_s17  ;;  %v2838_v39 = vld [vmem:[%s3212_s3 + $0x20] sm:$0xff] }
0x19fe   :  { %v1024_v23 = vpop.permute.xlu0 %1023 }
0x19ff   :  { %v1026_v43 = vmul.f32 %v1024_v23, %v1021_v19  ;;  %v2844_v19 = vld [vmem:[%s3212_s3 + $0x18] sm:$0xff]  ;;  %v2850_v23 = vld [vmem:[%s3212_s3 + $0x10] sm:$0xff] }
0x1a01   :  { %v2809_v44 = vadd.f32 %v1027_v42, %v1026_v43 }
0x1a03   :  { %1030 = vrot.lane.b32.xlu0 %v2809_v44, %s2387_s17 }
0x1a75   :  { %v1031_v45 = vpop.permute.xlu0 %1030 }
0x1a76   :  { %v1033_v5 = vsel %vm61_vm0, %v1031_v45, %v2754_v62 }
0x1a77   :  { %v1034_v59 = vpack.c.bf16 %v1033_v5, %v1033_v5 }
0x1a79   :  { %2141 = vmatmul.msk.bf16.vlgmr.msrb.gmra.mxu2 %vm283_vm9, %v1034_v59 }
0x1a7a   :  { %1391 = vmatpush.bf16.msrb.mxu2 %v2522_v63 }
0x1a7e   :  { %1392 = vmatpush.bf16.msrb.mxu2 %v2464_v12 }
0x1afc   :  { %v1047_v60 = vpop.f32.mrf.mxu2 }
0x1afd   :  { %v1048_v8 = vadd.f32 %v1047_v60, %v2630_v15 }
0x1aff   :  { %1071 = vrot.lane.b32.xlu1 %v1048_v8, %s2390_s9  ;;  %v2142_v47 = vmul.f32 -1.442695, %v1048_v8 }
0x1b01   :  { %2281 = vpow2.f32 %v2142_v47 }
0x1b04   :  { %v1049_v61 = vpop.f32.mrf.mxu2 }
0x1b07   :  { %v2282_v51 = vpop.eup %2281 }
0x1b08   :  { %v1054_v53 = vadd.f32 1.0, %v2282_v51 }
0x1b0a   :  { %2283 = vrcp.f32 %v1054_v53  ;;  %v1066_v1 = vand.u32 2147483648, %v1054_v53  ;;  %vm1060_vm7 = vweird.f32 %v1054_v53  ;;  %v1064_v3 = vand.u32 2147483647, %v1054_v53 }
0x1b0c   :  { %v1067_v2 = vor.u32 1.1754944e-38, %v1066_v1  ;;  %vm1065_vm11 = vcmp.eq.f32.partialorder %v1064_v3, 8.507059e+37  ;;  %v2867_v1 = vld [vmem:[%s3212_s3 + $0x48] sm:$0xff]  ;;  %v2873_v3 = vld [vmem:[%s3212_s3 + $0x40] sm:$0xff] }
0x1b10   :  { %v2284_v55 = vpop.eup %2283 }
0x1b11   :  { %v1056_v56 = vmul.f32 %v2284_v55, %v1054_v53  ;;  %vm1061_vm6 = vweird.f32 %v2284_v55 }
0x1b12   :  { %vm1062_vm10 = vmor %vm1060_vm7, %vm1061_vm6 }
0x1b13   :  { %v1057_v57 = vsub.f32 1.0, %v1056_v56 }
0x1b15   :  { %v1058_v58 = vmul.f32 %v2284_v55, %v1057_v57 }
0x1b17   :  { %v1059_v0 = vadd.f32 %v2284_v55, %v1058_v58 }
0x1b19   :  { %v1063_v4 = vsel %vm1062_vm10, %v2284_v55, %v1059_v0 }
0x1b1a   :  { %v1068_v10 = vsel %vm1065_vm11, %v1067_v2, %v1063_v4  ;;  %v2879_v4 = vld [vmem:[%s3212_s3 + $0x38] sm:$0xff] }
0x1b1b   :  { %v1081_v17 = vsub.f32 1.0, %v1068_v10  ;;  %v1087_v18 = vmul.f32 %v1068_v10, %v2754_v62 }
0x1b71   :  { %v1072_v9 = vpop.permute.xlu1 %1071 }
0x1b72   :  { %v1074_v13 = vmul.f32 %v1072_v9, %v1068_v10 }
0x1b74   :  { %1076 = vrot.lane.b32.xlu0 %v1074_v13, %s2391_s25 }
0x1be6   :  { %v1077_v24 = vpop.permute.xlu0 %1076 }
0x1be7   :  { %v1079_v16 = vadd.f32 %v1077_v24, %v1048_v8 }
0x1be9   :  { %2285 = vtanh.f32 %v1079_v16 }
0x1bef   :  { %v2286_v41 = vpop.eup %2285 }
0x1bf0   :  { %1083 = vrot.lane.b32.xlu2 %v2286_v41, %s2387_s17 }
0x1c4a   :  { %v1084_v35 = vpop.permute.xlu2 %1083 }
0x1c4b   :  { %v1086_v29 = vmul.f32 %v1084_v35, %v1081_v17 }
0x1c4d   :  { %v2823_v30 = vadd.f32 %v1087_v18, %v1086_v29 }
0x1c4f   :  { %v1099_v32 = vpack.c.bf16 %v2823_v30, %v2823_v30 }
0x1c51   :  { %1101 = vrot.lane.b32.xlu0 %v1099_v32, %s2387_s17 }
0x1cc3   :  { %v1102_v33 = vpop.permute.xlu0 %1101 }
0x1cc4   :  { %2143 = vmatmul.msk.bf16.vlgmr.msrb.gmra.mxu3 %vm61_vm0, %v1102_v33 }
0x1cc5   :  { %1421 = vmatpush.bf16.msrb.mxu3 %v2832_v36 }
0x1cc9   :  { %1422 = vmatpush.bf16.msrb.mxu3 %v2838_v39 }
0x1ccd   :  { %1423 = vmatpush.bf16.msrb.mxu3 %v2844_v19 }
0x1cd1   :  { %1424 = vmatpush.bf16.msrb.mxu3 %v2850_v23 }
0x1d47   :  { %v1115_v42 = vpop.f32.mrf.mxu3 }
0x1d48   :  { %v1119_v43 = vperm.slane %v1115_v42, 0  ;;  %v1122_v45 = vperm.slane %v1115_v42, 1 }
0x1d4a   :  { %v1124_v5 = vadd.f32 %v1122_v45, %v2482_v25  ;;  %v1121_v59 = vadd.f32 %v1119_v43, %v2479_v22  ;;  %v1123_v60 = vadd.f32 %v1122_v45, %v2479_v22  ;;  %v1120_v8 = vadd.f32 %v1119_v43, %v2487_v28 }
0x1d4c   :  { %2287 = vtanh.f32 %v1124_v5  ;;  %v1125_v61 = vsel %vm177_vm1, %v1121_v59, %v1123_v60 }
0x1d4d   :  { %2289 = vtanh.f32 %v1120_v8 }
0x1d4e   :  { %2291 = vtanh.f32 %v1125_v61 }
0x1d4f   :  { %v1117_v47 = vpop.f32.mrf.mxu3 }
0x1d52   :  { %v2288_v51 = vpop.eup %2287 }
0x1d53   :  { %v1130_v53 = vpack.c.bf16 %v2288_v51, %v2288_v51  ;;  %v2290_v55 = vpop.eup %2289 }
0x1d54   :  { %v2292_v57 = vpop.eup %2291 }
0x1d55   :  { %v1135_v56 = vsel %vm61_vm0, %v1130_v53, 0  ;;  %v1129_v58 = vpack.c.bf16 %v2292_v57, %v2290_v55 }
0x1d56   :  { %1143 = vmatpush.bf16.xpose.msra.mxu0 %v1135_v56 }
0x1d57   :  { %v1132_v0 = vsel %vm61_vm0, %v1129_v58, 0 }
0x1d5e   :  { %1144 = vmatpush.bf16.xpose.msra.mxu0 %v1132_v0 }
0x1d65   :  { %2144 = vmatmul.msk.bf16.vlgmr.msra.gmra.mxu0 %vm61_vm0, %v2494_v40 }
0x1d66   :  { %1330 = vmatpush.bf16.msrb.mxu0 %v2774_v37 }
0x1d6a   :  { %1331 = vmatpush.bf16.msrb.mxu0 %v2780_v38 }
0x1d6e   :  { %1481 = vmatpush.bf16.msra.mxu0 %v2867_v1 }
0x1d72   :  { %1482 = vmatpush.bf16.msra.mxu0 %v2873_v3 }
0x1d76   :  { %1483 = vmatpush.bf16.msra.mxu0 %v2879_v4 }
0x1d7a   :  { %1484 = vmatpush.bf16.msra.mxu0 %v2616_v6 }
0x1de2   :  { %v1146_v2 = vpop.f32.mrf.mxu0 }
0x1de3   :  { %v1150_v9 = vperm.slane %v1146_v2, 0 }
0x1de5   :  { %v1151_v10 = vsel %vm2498_vm4, %v1150_v9, -1e+30 }
0x1de6   :  { %v1152_v13 = vsel %vm214_vm5, %v1151_v10, -inf }
0x1de7   :  { %1153 = vmax.xlane.f32.xlu0 %v1152_v13 }
0x1dea   :  { %v1148_v24 = vpop.f32.mrf.mxu0 }
0x1e5a   :  { %v1154_v16 = vpop.xlane.xlu0 %1153 }
0x1e5b   :  { %v1155_v41 = vsub.f32 %v1151_v10, %v1154_v16 }
0x1e5d   :  { %v1156_v17 = vmul.f32 1.442695, %v1155_v41 }
0x1e5f   :  { %2293 = vpow2.f32 %v1156_v17 }
0x1e65   :  { %v2294_v35 = vpop.eup %2293 }
0x1e66   :  { %v1158_v18 = vsel %vm214_vm5, %v2294_v35, 0.0 }
0x1e67   :  { %1159 = vadd.xlane.f32.xlu1 %v1158_v18 }
0x1eda   :  { %v1160_v29 = vpop.xlane.xlu1 %1159 }
0x1edb   :  { %2295 = vrcp.f32 %v1160_v29 }
0x1ee1   :  { %v2296_v6 = vpop.eup %2295 }
0x1ee2   :  { %v2887_v32 = vmul.f32 %v2296_v6, %v2294_v35 }
0x1ee4   :  { %v1163_v33 = vpack.c.bf16 %v2887_v32, %v2887_v32 }
0x1ee6   :  { %2145 = vmatmul.msk.bf16.vlgmr.msrb.gmra.mxu1 %vm227_vm8, %v1163_v33 }
0x1f63   :  { %v2892_v42 = vpop.f32.mrf.mxu1 }
0x1f64   :  { %v1191_v43 = vsel %vm61_vm0, %v2892_v42, %v2809_v44 }
0x1f65   :  { %v1192_v45 = vpack.c.bf16 %v1191_v43, %v1191_v43 }
0x1f67   :  { %2146 = vmatmul.msk.bf16.vlgmr.msra.gmra.mxu2 %vm283_vm9, %v1192_v45 }
0x1f6b   :  { %v1178_v5 = vpop.f32.mrf.mxu1 }
0x1fea   :  { %v1205_v59 = vpop.f32.mrf.mxu2 }
0x1feb   :  { %v1206_v60 = vadd.f32 %v1205_v59, %v2567_v27 }
0x1fed   :  { %1229 = vrot.lane.b32.xlu2 %v1206_v60, %s2390_s9  ;;  %v2147_v61 = vmul.f32 -1.442695, %v1206_v60 }
0x1fef   :  { %2297 = vpow2.f32 %v2147_v61 }
0x1ff2   :  { %v1207_v8 = vpop.f32.mrf.mxu2 }
0x1ff5   :  { %v2298_v47 = vpop.eup %2297 }
0x1ff6   :  { %v1212_v51 = vadd.f32 1.0, %v2298_v47 }
0x1ff8   :  { %2299 = vrcp.f32 %v1212_v51  ;;  %v1224_v0 = vand.u32 2147483648, %v1212_v51  ;;  %vm1218_vm13 = vweird.f32 %v1212_v51  ;;  %v1222_v2 = vand.u32 2147483647, %v1212_v51 }
0x1ffa   :  { %v1225_v10 = vor.u32 1.1754944e-38, %v1224_v0  ;;  %vm1223_vm15 = vcmp.eq.f32.partialorder %v1222_v2, 8.507059e+37 }
0x1ffe   :  { %v2300_v53 = vpop.eup %2299 }
0x1fff   :  { %v1214_v55 = vmul.f32 %v2300_v53, %v1212_v51  ;;  %vm1219_vm12 = vweird.f32 %v2300_v53 }
0x2000   :  { %vm1220_vm14 = vmor %vm1218_vm13, %vm1219_vm12 }
0x2001   :  { %v1215_v56 = vsub.f32 1.0, %v1214_v55 }
0x2003   :  { %v1216_v57 = vmul.f32 %v2300_v53, %v1215_v56 }
0x2005   :  { %v1217_v58 = vadd.f32 %v2300_v53, %v1216_v57 }
0x2007   :  { %v1221_v9 = vsel %vm1220_vm14, %v2300_v53, %v1217_v58 }
0x2008   :  { %v1226_v24 = vsel %vm1223_vm15, %v1225_v10, %v1221_v9 }
0x2009   :  { %v1239_v18 = vsub.f32 1.0, %v1226_v24  ;;  %v1245_v6 = vmul.f32 %v1226_v24, %v2809_v44 }
0x2047   :  { %v1230_v13 = vpop.permute.xlu2 %1229 }
0x2048   :  { %v1232_v16 = vmul.f32 %v1230_v13, %v1226_v24 }
0x204a   :  { %1234 = vrot.lane.b32.xlu2 %v1232_v16, %s2391_s25 }
0x20a4   :  { %v1235_v41 = vpop.permute.xlu2 %1234 }
0x20a5   :  { %v1237_v17 = vadd.f32 %v1235_v41, %v1206_v60 }
0x20a7   :  { %2301 = vtanh.f32 %v1237_v17 }
0x20ad   :  { %v2302_v35 = vpop.eup %2301 }
0x20ae   :  { %1241 = vrot.lane.b32.xlu2 %v2302_v35, %s2387_s17 }
0x2108   :  { %v1242_v29 = vpop.permute.xlu2 %1241 }
0x2109   :  { %v1244_v33 = vmul.f32 %v1242_v29, %v1239_v18 }
0x210b   :  { %v2903_v43 = vadd.f32 %v1245_v6, %v1244_v33 }
0x210d   :  { %1248 = vrot.lane.b32.xlu2 %v2903_v43, %s2387_s17 }
0x2167   :  { %v1249_v45 = vpop.permute.xlu2 %1248 }
0x2168   :  { %v1251_v5 = vsel %vm61_vm0, %v1249_v45, %v2823_v30 }
0x2169   :  { %v1252_v59 = vpack.c.bf16 %v1251_v5, %v1251_v5 }
0x216b   :  { %2148 = vmatmul.msk.bf16.vlgmr.msra.gmra.mxu3 %vm283_vm9, %v1252_v59 }
0x216c   :  { %1612 = vmatpush.bf16.msra.mxu3 %v2522_v63 }
0x2170   :  { %1613 = vmatpush.bf16.msra.mxu3 %v2464_v12 }
0x21ee   :  { %v1265_v60 = vpop.f32.mrf.mxu3 }
0x21ef   :  { %v1266_v44 = vadd.f32 %v1265_v60, %v2630_v15 }
0x21f1   :  { %1289 = vrot.lane.b32.xlu2 %v1266_v44, %s2390_s9  ;;  %v2149_v61 = vmul.f32 -1.442695, %v1266_v44 }
0x21f3   :  { %2303 = vpow2.f32 %v2149_v61 }
0x21f6   :  { %v1267_v8 = vpop.f32.mrf.mxu3 }
0x21f9   :  { %v2304_v47 = vpop.eup %2303 }
0x21fa   :  { %v1272_v51 = vadd.f32 1.0, %v2304_v47 }
0x21fc   :  { %2305 = vrcp.f32 %v1272_v51  ;;  %v1284_v0 = vand.u32 2147483648, %v1272_v51  ;;  %vm1278_vm3 = vweird.f32 %v1272_v51  ;;  %v1282_v2 = vand.u32 2147483647, %v1272_v51 }
0x21fe   :  { %v1285_v10 = vor.u32 1.1754944e-38, %v1284_v0  ;;  %vm1283_vm7 = vcmp.eq.f32.partialorder %v1282_v2, 8.507059e+37 }
0x2202   :  { %v2306_v53 = vpop.eup %2305 }
0x2203   :  { %v1274_v55 = vmul.f32 %v2306_v53, %v1272_v51  ;;  %vm1279_vm2 = vweird.f32 %v2306_v53 }
0x2204   :  { %vm1280_vm6 = vmor %vm1278_vm3, %vm1279_vm2 }
0x2205   :  { %v1275_v56 = vsub.f32 1.0, %v1274_v55 }
0x2207   :  { %v1276_v57 = vmul.f32 %v2306_v53, %v1275_v56 }
0x2209   :  { %v1277_v58 = vadd.f32 %v2306_v53, %v1276_v57 }
0x220b   :  { %v1281_v9 = vsel %vm1280_vm6, %v2306_v53, %v1277_v58 }
0x220c   :  { %v1286_v24 = vsel %vm1283_vm7, %v1285_v10, %v1281_v9 }
0x220d   :  { %v1299_v18 = vsub.f32 1.0, %v1286_v24  ;;  %v1305_v6 = vmul.f32 %v1286_v24, %v2823_v30 }
0x224b   :  { %v1290_v13 = vpop.permute.xlu2 %1289 }
0x224c   :  { %v1292_v16 = vmul.f32 %v1290_v13, %v1286_v24  ;;  %v2944_v24 = vld [vmem:[%s3212_s3 + $0x30] sm:$0xff] }
0x224e   :  { %1294 = vrot.lane.b32.xlu0 %v1292_v16, %s2391_s25 }
0x22c0   :  { %v1295_v41 = vpop.permute.xlu0 %1294 }
0x22c1   :  { %v1297_v17 = vadd.f32 %v1295_v41, %v1266_v44 }
0x22c3   :  { %2307 = vtanh.f32 %v1297_v17 }
0x22c9   :  { %v2308_v35 = vpop.eup %2307 }
0x22ca   :  { %1301 = vrot.lane.b32.xlu2 %v2308_v35, %s2387_s17 }
0x2324   :  { %v1302_v29 = vpop.permute.xlu2 %1301 }
0x2325   :  { %v1304_v33 = vmul.f32 %v1302_v29, %v1299_v18 }
0x2327   :  { %v2917_v45 = vadd.f32 %v1305_v6, %v1304_v33 }
0x2329   :  { %v1317_v5 = vpack.c.bf16 %v2917_v45, %v2917_v45 }
0x232b   :  { %1319 = vrot.lane.b32.xlu1 %v1317_v5, %s2387_s17 }
0x239d   :  { %v1320_v59 = vpop.permute.xlu1 %1319 }
0x239e   :  { %2150 = vmatmul.msk.bf16.vlgmr.msrb.gmra.mxu0 %vm61_vm0, %v1320_v59 }
0x239f   :  { %1641 = vmatpush.bf16.msrb.mxu0 %v2832_v36 }
0x23a3   :  { %1642 = vmatpush.bf16.msrb.mxu0 %v2838_v39 }
0x23a7   :  { %1643 = vmatpush.bf16.msrb.mxu0 %v2844_v19 }
0x23ab   :  { %1644 = vmatpush.bf16.msrb.mxu0 %v2850_v23 }
0x241b   :  { %v1333_v60 = vpop.f32.mrf.mxu0 }
0x241c   :  { %v1337_v44 = vperm.slane %v1333_v60, 0  ;;  %v1340_v8 = vperm.slane %v1333_v60, 1 }
0x241e   :  { %v1342_v61 = vadd.f32 %v1340_v8, %v2482_v25  ;;  %v1339_v47 = vadd.f32 %v1337_v44, %v2479_v22  ;;  %v1341_v51 = vadd.f32 %v1340_v8, %v2479_v22  ;;  %v1338_v53 = vadd.f32 %v1337_v44, %v2487_v28 }
0x2420   :  { %2309 = vtanh.f32 %v1342_v61  ;;  %v1343_v55 = vsel %vm177_vm1, %v1339_v47, %v1341_v51 }
0x2421   :  { %2311 = vtanh.f32 %v1338_v53 }
0x2422   :  { %2313 = vtanh.f32 %v1343_v55 }
0x2423   :  { %v1335_v56 = vpop.f32.mrf.mxu0 }
0x2424   :  { %v1412_v56 = vrot.slane %v2567_v27, 2 }
0x2426   :  { %v2310_v57 = vpop.eup %2309 }
0x2427   :  { %v1348_v58 = vpack.c.bf16 %v2310_v57, %v2310_v57  ;;  %v2312_v0 = vpop.eup %2311 }
0x2428   :  { %v2314_v9 = vpop.eup %2313 }
0x2429   :  { %v1353_v2 = vsel %vm61_vm0, %v1348_v58, 0  ;;  %v1347_v10 = vpack.c.bf16 %v2314_v9, %v2312_v0 }
0x242a   :  { %1361 = vmatpush.bf16.xpose.msra.mxu1 %v1353_v2 }
0x242b   :  { %v1350_v13 = vsel %vm61_vm0, %v1347_v10, 0 }
0x2432   :  { %1362 = vmatpush.bf16.xpose.msra.mxu1 %v1350_v13 }
0x2439   :  { %2151 = vmatmul.msk.bf16.vlgmr.msra.gmra.mxu1 %vm61_vm0, %v2494_v40 }
0x243a   :  { %1551 = vmatpush.bf16.msrb.mxu1 %v2774_v37 }
0x243e   :  { %1552 = vmatpush.bf16.msrb.mxu1 %v2780_v38 }
0x2442   :  { %1701 = vmatpush.bf16.msra.mxu1 %v2867_v1 }
0x2446   :  { %1702 = vmatpush.bf16.msra.mxu1 %v2873_v3 }
0x244a   :  { %1703 = vmatpush.bf16.msra.mxu1 %v2879_v4 }
0x244e   :  { %1704 = vmatpush.bf16.msra.mxu1 %v2944_v24 }
0x24b6   :  { %v1364_v16 = vpop.f32.mrf.mxu1 }
0x24b7   :  { %v1368_v41 = vperm.slane %v1364_v16, 0 }
0x24b9   :  { %v1369_v17 = vsel %vm2498_vm4, %v1368_v41, -1e+30 }
0x24ba   :  { %v1370_v35 = vsel %vm214_vm5, %v1369_v17, -inf }
0x24bb   :  { %1371 = vmax.xlane.f32.xlu2 %v1370_v35 }
0x24be   :  { %v1366_v18 = vpop.f32.mrf.mxu1 }
0x252e   :  { %v1372_v29 = vpop.xlane.xlu2 %1371 }
0x252f   :  { %v1373_v6 = vsub.f32 %v1369_v17, %v1372_v29 }
0x2531   :  { %v1374_v33 = vmul.f32 1.442695, %v1373_v6 }
0x2533   :  { %2315 = vpow2.f32 %v1374_v33 }
0x2539   :  { %v2316_v5 = vpop.eup %2315 }
0x253a   :  { %v1376_v59 = vsel %vm214_vm5, %v2316_v5, 0.0 }
0x253b   :  { %1377 = vadd.xlane.f32.xlu0 %v1376_v59 }
0x25ae   :  { %v1378_v60 = vpop.xlane.xlu0 %1377 }
0x25af   :  { %2317 = vrcp.f32 %v1378_v60 }
0x25b5   :  { %v2318_v44 = vpop.eup %2317 }
0x25b6   :  { %v2951_v8 = vmul.f32 %v2318_v44, %v2316_v5 }
0x25b8   :  { %v1381_v61 = vpack.c.bf16 %v2951_v8, %v2951_v8 }
0x25ba   :  { %2152 = vmatmul.msk.bf16.vlgmr.msrb.gmra.mxu2 %vm227_vm8, %v1381_v61 }
0x263d   :  { %v2956_v47 = vpop.f32.mrf.mxu2 }
0x263e   :  { %v1409_v51 = vsel %vm61_vm0, %v2956_v47, %v2903_v43 }
0x263f   :  { %v1410_v53 = vpack.c.bf16 %v1409_v51, %v1409_v51 }
0x2641   :  { %2153 = vmatmul.msk.bf16.vlgmr.msrb.gmra.mxu3 %vm283_vm9, %v1410_v53 }
0x2645   :  { %v1396_v55 = vpop.f32.mrf.mxu2 }
0x26c4   :  { %v1426_v57 = vpop.f32.mrf.mxu3 }
0x26c5   :  { %v1427_v58 = vadd.f32 %v1426_v57, %v1412_v56 }
0x26c7   :  { %1450 = vrot.lane.b32.xlu1 %v1427_v58, %s2390_s9  ;;  %v2154_v2 = vmul.f32 -1.442695, %v1427_v58 }
0x26c9   :  { %2319 = vpow2.f32 %v2154_v2 }
0x26cc   :  { %v1428_v0 = vpop.f32.mrf.mxu3 }
0x26cf   :  { %v2320_v9 = vpop.eup %2319 }
0x26d0   :  { %v1433_v10 = vadd.f32 1.0, %v2320_v9 }
0x26d2   :  { %2321 = vrcp.f32 %v1433_v10  ;;  %v1445_v18 = vand.u32 2147483648, %v1433_v10  ;;  %vm1439_vm11 = vweird.f32 %v1433_v10  ;;  %v1443_v29 = vand.u32 2147483647, %v1433_v10 }
0x26d4   :  { %v1446_v33 = vor.u32 1.1754944e-38, %v1445_v18  ;;  %vm1444_vm13 = vcmp.eq.f32.partialorder %v1443_v29, 8.507059e+37 }
0x26d8   :  { %v2322_v13 = vpop.eup %2321 }
0x26d9   :  { %v1435_v16 = vmul.f32 %v2322_v13, %v1433_v10  ;;  %vm1440_vm10 = vweird.f32 %v2322_v13 }
0x26da   :  { %vm1441_vm12 = vmor %vm1439_vm11, %vm1440_vm10 }
0x26db   :  { %v1436_v41 = vsub.f32 1.0, %v1435_v16 }
0x26dd   :  { %v1437_v17 = vmul.f32 %v2322_v13, %v1436_v41 }
0x26df   :  { %v1438_v35 = vadd.f32 %v2322_v13, %v1437_v17 }
0x26e1   :  { %v1442_v6 = vsel %vm1441_vm12, %v2322_v13, %v1438_v35 }
0x26e2   :  { %v1447_v59 = vsel %vm1444_vm13, %v1446_v33, %v1442_v6 }
0x26e3   :  { %v1460_v53 = vsub.f32 1.0, %v1447_v59  ;;  %v1466_v56 = vmul.f32 %v1447_v59, %v2903_v43 }
0x2739   :  { %v1451_v5 = vpop.permute.xlu1 %1450 }
0x273a   :  { %v1453_v60 = vmul.f32 %v1451_v5, %v1447_v59 }
0x273c   :  { %1455 = vrot.lane.b32.xlu1 %v1453_v60, %s2391_s25 }
0x27ae   :  { %v1456_v44 = vpop.permute.xlu1 %1455 }
0x27af   :  { %v1458_v61 = vadd.f32 %v1456_v44, %v1427_v58 }
0x27b1   :  { %2323 = vtanh.f32 %v1458_v61 }
0x27b7   :  { %v2324_v51 = vpop.eup %2323 }
0x27b8   :  { %1462 = vrot.lane.b32.xlu1 %v2324_v51, %s2387_s17 }
0x282a   :  { %v1463_v55 = vpop.permute.xlu1 %1462 }
0x282b   :  { %v1465_v57 = vmul.f32 %v1463_v55, %v1460_v53 }
0x282d   :  { %v2967_v0 = vadd.f32 %v1466_v56, %v1465_v57 }
0x282f   :  { %1469 = vrot.lane.b32.xlu2 %v2967_v0, %s2387_s17 }
0x2889   :  { %v1470_v2 = vpop.permute.xlu2 %1469 }
0x288a   :  { %v1472_v9 = vsel %vm61_vm0, %v1470_v2, %v2917_v45 }
0x288b   :  { %v1473_v10 = vpack.c.bf16 %v1472_v9, %v1472_v9 }
0x288d   :  { %2155 = vmatmul.msk.bf16.vlgmr.msra.gmra.mxu0 %vm283_vm9, %v1473_v10 }
0x288e   :  { %1832 = vmatpush.bf16.msra.mxu0 %v2522_v63 }
0x2892   :  { %1833 = vmatpush.bf16.msra.mxu0 %v2464_v12 }
0x290a   :  { %v1486_v58 = vpop.f32.mrf.mxu0 }
0x290b   :  { %v1487_v43 = vadd.f32 %v1486_v58, %v2630_v15 }
0x290d   :  { %1510 = vrot.lane.b32.xlu1 %v1487_v43, %s2390_s9  ;;  %v2156_v16 = vmul.f32 -1.442695, %v1487_v43 }
0x290f   :  { %2325 = vpow2.f32 %v2156_v16 }
0x2912   :  { %v1488_v13 = vpop.f32.mrf.mxu0 }
0x2915   :  { %v2326_v41 = vpop.eup %2325 }
0x2916   :  { %v1493_v17 = vadd.f32 1.0, %v2326_v41 }
0x2918   :  { %2327 = vrcp.f32 %v1493_v17  ;;  %v1505_v63 = vand.u32 2147483648, %v1493_v17  ;;  %vm1499_vm15 = vweird.f32 %v1493_v17  ;;  %v1503_v12 = vand.u32 2147483647, %v1493_v17 }
0x291a   :  { %v1506_v59 = vor.u32 1.1754944e-38, %v1505_v63  ;;  %vm1504_vm3 = vcmp.eq.f32.partialorder %v1503_v12, 8.507059e+37 }
0x291e   :  { %v2328_v35 = vpop.eup %2327 }
0x291f   :  { %v1495_v18 = vmul.f32 %v2328_v35, %v1493_v17  ;;  %vm1500_vm14 = vweird.f32 %v2328_v35 }
0x2920   :  { %vm1501_vm2 = vmor %vm1499_vm15, %vm1500_vm14 }
0x2921   :  { %v1496_v29 = vsub.f32 1.0, %v1495_v18 }
0x2923   :  { %v1497_v6 = vmul.f32 %v2328_v35, %v1496_v29 }
0x2925   :  { %v1498_v33 = vadd.f32 %v2328_v35, %v1497_v6 }
0x2927   :  { %v1502_v5 = vsel %vm1501_vm2, %v2328_v35, %v1498_v33 }
0x2928   :  { %v1507_v44 = vsel %vm1504_vm3, %v1506_v59, %v1502_v5  ;;  %vm2053_vm3 = vcmask 254976  }
0x2929   :  { %v1520_v56 = vsub.f32 1.0, %v1507_v44  ;;  %v1526_v2 = vmul.f32 %v1507_v44, %v2917_v45 }
0x297f   :  { %v1511_v60 = vpop.permute.xlu1 %1510 }
0x2980   :  { %v1513_v61 = vmul.f32 %v1511_v60, %v1507_v44 }
0x2982   :  { %1515 = vrot.lane.b32.xlu0 %v1513_v61, %s2391_s25 }
0x29f4   :  { %v1516_v51 = vpop.permute.xlu0 %1515 }
0x29f5   :  { %v1518_v53 = vadd.f32 %v1516_v51, %v1487_v43 }
0x29f7   :  { %2329 = vtanh.f32 %v1518_v53 }
0x29fd   :  { %v2330_v55 = vpop.eup %2329 }
0x29fe   :  { %1522 = vrot.lane.b32.xlu1 %v2330_v55, %s2387_s17 }
0x2a70   :  { %v1523_v57 = vpop.permute.xlu1 %1522 }
0x2a71   :  { %v1525_v9 = vmul.f32 %v1523_v57, %v1520_v56 }
0x2a73   :  { %v2981_v10 = vadd.f32 %v1526_v2, %v1525_v9 }
0x2a75   :  { %v1538_v58 = vpack.c.bf16 %v2981_v10, %v2981_v10 }
0x2a77   :  { %1540 = vrot.lane.b32.xlu1 %v1538_v58, %s2387_s17 }
0x2ae9   :  { %v1541_v13 = vpop.permute.xlu1 %1540 }
0x2aea   :  { %2157 = vmatmul.msk.bf16.vlgmr.msrb.gmra.mxu1 %vm61_vm0, %v1541_v13  ;;  %v1632_v13 = vrot.slane %v2567_v27, 4 }
0x2aeb   :  { %1861 = vmatpush.bf16.msrb.mxu1 %v2832_v36 }
0x2aef   :  { %1862 = vmatpush.bf16.msrb.mxu1 %v2838_v39 }
0x2af3   :  { %1863 = vmatpush.bf16.msrb.mxu1 %v2844_v19 }
0x2af7   :  { %1864 = vmatpush.bf16.msrb.mxu1 %v2850_v23 }
0x2b67   :  { %v1554_v43 = vpop.f32.mrf.mxu1 }
0x2b68   :  { %v1558_v16 = vperm.slane %v1554_v43, 0  ;;  %v1561_v41 = vperm.slane %v1554_v43, 1 }
0x2b6a   :  { %v1563_v17 = vadd.f32 %v1561_v41, %v2482_v25  ;;  %v1560_v35 = vadd.f32 %v1558_v16, %v2479_v22  ;;  %v1562_v18 = vadd.f32 %v1561_v41, %v2479_v22  ;;  %v1559_v29 = vadd.f32 %v1558_v16, %v2487_v28 }
0x2b6c   :  { %2331 = vtanh.f32 %v1563_v17  ;;  %v1564_v36 = vsel %vm177_vm1, %v1560_v35, %v1562_v18 }
0x2b6d   :  { %2333 = vtanh.f32 %v1559_v29 }
0x2b6e   :  { %2335 = vtanh.f32 %v1564_v36 }
0x2b6f   :  { %v1556_v6 = vpop.f32.mrf.mxu1 }
0x2b72   :  { %v2332_v39 = vpop.eup %2331 }
0x2b73   :  { %v1569_v19 = vpack.c.bf16 %v2332_v39, %v2332_v39  ;;  %v2334_v23 = vpop.eup %2333 }
0x2b74   :  { %v2336_v63 = vpop.eup %2335 }
0x2b75   :  { %v1574_v33 = vsel %vm61_vm0, %v1569_v19, 0  ;;  %v1568_v12 = vpack.c.bf16 %v2336_v63, %v2334_v23 }
0x2b76   :  { %1582 = vmatpush.bf16.xpose.msra.mxu2 %v1574_v33 }
0x2b77   :  { %v1571_v5 = vsel %vm61_vm0, %v1568_v12, 0 }
0x2b7e   :  { %1583 = vmatpush.bf16.xpose.msra.mxu2 %v1571_v5 }
0x2b85   :  { %2158 = vmatmul.msk.bf16.vlgmr.msra.gmra.mxu2 %vm61_vm0, %v2494_v40 }
0x2b86   :  { %1771 = vmatpush.bf16.msrb.mxu2 %v2774_v37 }
0x2b8a   :  { %1772 = vmatpush.bf16.msrb.mxu2 %v2780_v38 }
0x2b8e   :  { %1921 = vmatpush.bf16.msra.mxu2 %v2867_v1 }
0x2b92   :  { %1922 = vmatpush.bf16.msra.mxu2 %v2873_v3 }
0x2b96   :  { %1923 = vmatpush.bf16.msra.mxu2 %v2879_v4 }
0x2b9a   :  { %1924 = vmatpush.bf16.msra.mxu2 %v2944_v24 }
0x2c08   :  { %v1585_v59 = vpop.f32.mrf.mxu2 }
0x2c09   :  { %v1589_v60 = vperm.slane %v1585_v59, 0 }
0x2c0b   :  { %v1590_v44 = vsel %vm2498_vm4, %v1589_v60, -1e+30 }
0x2c0c   :  { %v1591_v37 = vsel %vm214_vm5, %v1590_v44, -inf }
0x2c0d   :  { %1592 = vmax.xlane.f32.xlu2 %v1591_v37 }
0x2c10   :  { %v1587_v38 = vpop.f32.mrf.mxu2 }
0x2c80   :  { %v1593_v61 = vpop.xlane.xlu2 %1592 }
0x2c81   :  { %v1594_v51 = vsub.f32 %v1590_v44, %v1593_v61 }
0x2c83   :  { %v1595_v53 = vmul.f32 1.442695, %v1594_v51 }
0x2c85   :  { %2337 = vpow2.f32 %v1595_v53 }
0x2c8b   :  { %v2338_v1 = vpop.eup %2337 }
0x2c8c   :  { %v1597_v3 = vsel %vm214_vm5, %v2338_v1, 0.0 }
0x2c8d   :  { %1598 = vadd.xlane.f32.xlu1 %v1597_v3 }
0x2d00   :  { %v1599_v4 = vpop.xlane.xlu1 %1598 }
0x2d01   :  { %2339 = vrcp.f32 %v1599_v4 }
0x2d07   :  { %v2340_v24 = vpop.eup %2339 }
0x2d08   :  { %v3010_v55 = vmul.f32 %v2340_v24, %v2338_v1 }
0x2d0a   :  { %v1602_v56 = vpack.c.bf16 %v3010_v55, %v3010_v55 }
0x2d0c   :  { %2159 = vmatmul.msk.bf16.vlgmr.msra.gmra.mxu3 %vm227_vm8, %v1602_v56 }
0x2d8f   :  { %v3015_v57 = vpop.f32.mrf.mxu3 }
0x2d90   :  { %v1630_v2 = vsel %vm61_vm0, %v3015_v57, %v2967_v0 }
0x2d91   :  { %v1631_v9 = vpack.c.bf16 %v1630_v2, %v1630_v2 }
0x2d93   :  { %2160 = vmatmul.msk.bf16.vlgmr.msrb.gmra.mxu0 %vm283_vm9, %v1631_v9 }
0x2d97   :  { %v1617_v58 = vpop.f32.mrf.mxu3 }
0x2e10   :  { %v1646_v43 = vpop.f32.mrf.mxu0 }
0x2e11   :  { %v1647_v16 = vadd.f32 %v1646_v43, %v1632_v13 }
0x2e13   :  { %1670 = vrot.lane.b32.xlu0 %v1647_v16, %s2390_s9  ;;  %v2161_v17 = vmul.f32 -1.442695, %v1647_v16 }
0x2e15   :  { %2341 = vpow2.f32 %v2161_v17 }
0x2e18   :  { %v1648_v41 = vpop.f32.mrf.mxu0 }
0x2e1b   :  { %v2342_v35 = vpop.eup %2341 }
0x2e1c   :  { %v1653_v18 = vadd.f32 1.0, %v2342_v35 }
0x2e1e   :  { %2343 = vrcp.f32 %v1653_v18  ;;  %v1665_v23 = vand.u32 2147483648, %v1653_v18  ;;  %vm1659_vm7 = vweird.f32 %v1653_v18  ;;  %v1663_v33 = vand.u32 2147483647, %v1653_v18 }
0x2e20   :  { %v1666_v12 = vor.u32 1.1754944e-38, %v1665_v23  ;;  %vm1664_vm11 = vcmp.eq.f32.partialorder %v1663_v33, 8.507059e+37 }
0x2e24   :  { %v2344_v29 = vpop.eup %2343 }
0x2e25   :  { %v1655_v36 = vmul.f32 %v2344_v29, %v1653_v18  ;;  %vm1660_vm6 = vweird.f32 %v2344_v29 }
0x2e26   :  { %vm1661_vm10 = vmor %vm1659_vm7, %vm1660_vm6 }
0x2e27   :  { %v1656_v6 = vsub.f32 1.0, %v1655_v36 }
0x2e29   :  { %v1657_v39 = vmul.f32 %v2344_v29, %v1656_v6 }
0x2e2b   :  { %v1658_v19 = vadd.f32 %v2344_v29, %v1657_v39 }
0x2e2d   :  { %v1662_v63 = vsel %vm1661_vm10, %v2344_v29, %v1658_v19 }
0x2e2e   :  { %v1667_v59 = vsel %vm1664_vm11, %v1666_v12, %v1662_v63 }
0x2e2f   :  { %v1680_v61 = vsub.f32 1.0, %v1667_v59  ;;  %v1686_v53 = vmul.f32 %v1667_v59, %v2967_v0 }
0x2e85   :  { %v1671_v5 = vpop.permute.xlu0 %1670 }
0x2e86   :  { %v1673_v60 = vmul.f32 %v1671_v5, %v1667_v59 }
0x2e88   :  { %1675 = vrot.lane.b32.xlu0 %v1673_v60, %s2391_s25 }
0x2efa   :  { %v1676_v44 = vpop.permute.xlu0 %1675 }
0x2efb   :  { %v1678_v37 = vadd.f32 %v1676_v44, %v1647_v16 }
0x2efd   :  { %2345 = vtanh.f32 %v1678_v37 }
0x2f03   :  { %v2346_v38 = vpop.eup %2345 }
0x2f04   :  { %1682 = vrot.lane.b32.xlu0 %v2346_v38, %s2387_s17 }
0x2f76   :  { %v1683_v51 = vpop.permute.xlu0 %1682 }
0x2f77   :  { %v1685_v1 = vmul.f32 %v1683_v51, %v1680_v61 }
0x2f79   :  { %v3026_v3 = vadd.f32 %v1686_v53, %v1685_v1 }
0x2f7b   :  { %1689 = vrot.lane.b32.xlu0 %v3026_v3, %s2387_s17 }
0x2fed   :  { %v1690_v4 = vpop.permute.xlu0 %1689 }
0x2fee   :  { %v1692_v24 = vsel %vm61_vm0, %v1690_v4, %v2981_v10 }
0x2fef   :  { %v1693_v56 = vpack.c.bf16 %v1692_v24, %v1692_v24 }
0x2ff1   :  { %2162 = vmatmul.msk.bf16.vlgmr.msra.gmra.mxu1 %vm283_vm9, %v1693_v56 }
0x306e   :  { %v1706_v2 = vpop.f32.mrf.mxu1 }
0x306f   :  { %v1707_v9 = vadd.f32 %v1706_v2, %v2630_v15 }
0x3071   :  { %1730 = vrot.lane.b32.xlu0 %v1707_v9, %s2390_s9  ;;  %v2163_v0 = vmul.f32 -1.442695, %v1707_v9 }
0x3073   :  { %2347 = vpow2.f32 %v2163_v0 }
0x3076   :  { %v1708_v58 = vpop.f32.mrf.mxu1 }
0x3079   :  { %v2348_v13 = vpop.eup %2347 }
0x307a   :  { %v1713_v43 = vadd.f32 1.0, %v2348_v13 }
0x307c   :  { %2349 = vrcp.f32 %v1713_v43  ;;  %v1725_v29 = vand.u32 2147483648, %v1713_v43  ;;  %vm1719_vm13 = vweird.f32 %v1713_v43  ;;  %v1723_v36 = vand.u32 2147483647, %v1713_v43 }
0x307e   :  { %v1726_v39 = vor.u32 1.1754944e-38, %v1725_v29  ;;  %vm1724_vm15 = vcmp.eq.f32.partialorder %v1723_v36, 8.507059e+37 }
0x3082   :  { %v2350_v16 = vpop.eup %2349 }
0x3083   :  { %v1715_v41 = vmul.f32 %v2350_v16, %v1713_v43  ;;  %vm1720_vm12 = vweird.f32 %v2350_v16 }
0x3084   :  { %vm1721_vm14 = vmor %vm1719_vm13, %vm1720_vm12  ;;  %vm436_vm12 = vcmask 517120   ;;  %vm251_vm13 = vcmask 74752  }
0x3085   :  { %v1716_v17 = vsub.f32 1.0, %v1715_v41 }
0x3087   :  { %v1717_v35 = vmul.f32 %v2350_v16, %v1716_v17 }
0x3089   :  { %v1718_v18 = vadd.f32 %v2350_v16, %v1717_v35 }
0x308b   :  { %v1722_v6 = vsel %vm1721_vm14, %v2350_v16, %v1718_v18  ;;  %vm2055_vm14 = vcmask 517376  }
0x308c   :  { %v1727_v23 = vsel %vm1724_vm15, %v1726_v39, %v1722_v6  ;;  %vm528_vm15 = vcmask 156752  }
0x308d   :  { %v1740_v59 = vsub.f32 1.0, %v1727_v23  ;;  %v1746_v44 = vmul.f32 %v1727_v23, %v2981_v10 }
0x30e3   :  { %v1731_v19 = vpop.permute.xlu0 %1730 }
0x30e4   :  { %v1733_v33 = vmul.f32 %v1731_v19, %v1727_v23 }
0x30e6   :  { %1735 = vrot.lane.b32.xlu2 %v1733_v33, %s2391_s25 }
0x3140   :  { %v1736_v63 = vpop.permute.xlu2 %1735 }
0x3141   :  { %v1738_v12 = vadd.f32 %v1736_v63, %v1707_v9 }
0x3143   :  { %2351 = vtanh.f32 %v1738_v12 }
0x3149   :  { %v2352_v5 = vpop.eup %2351 }
0x314a   :  { %1742 = vrot.lane.b32.xlu0 %v2352_v5, %s2387_s17 }
0x31bc   :  { %v1743_v60 = vpop.permute.xlu0 %1742 }
0x31bd   :  { %v1745_v37 = vmul.f32 %v1743_v60, %v1740_v59 }
0x31bf   :  { %v3038_v38 = vadd.f32 %v1746_v44, %v1745_v37  ;;  %v1852_v37 = vrot.slane %v2567_v27, 6 }
0x31c1   :  { %v1758_v61 = vpack.c.bf16 %v3038_v38, %v3038_v38 }
0x31c3   :  { %1760 = vrot.lane.b32.xlu1 %v1758_v61, %s2387_s17 }
0x3235   :  { %v1761_v51 = vpop.permute.xlu1 %1760 }
0x3236   :  { %2164 = vmatmul.msk.bf16.vlgmr.msrb.gmra.mxu2 %vm61_vm0, %v1761_v51 }
0x32b9   :  { %v1774_v53 = vpop.f32.mrf.mxu2 }
0x32ba   :  { %v1778_v1 = vperm.slane %v1774_v53, 0  ;;  %v1781_v4 = vperm.slane %v1774_v53, 1 }
0x32bc   :  { %v1783_v24 = vadd.f32 %v1781_v4, %v2482_v25  ;;  %v1780_v56 = vadd.f32 %v1778_v1, %v2479_v22  ;;  %v1782_v2 = vadd.f32 %v1781_v4, %v2479_v22  ;;  %v1779_v9 = vadd.f32 %v1778_v1, %v2487_v28 }
0x32be   :  { %2353 = vtanh.f32 %v1783_v24  ;;  %v1784_v58 = vsel %vm177_vm1, %v1780_v56, %v1782_v2 }
0x32bf   :  { %2355 = vtanh.f32 %v1779_v9 }
0x32c0   :  { %2357 = vtanh.f32 %v1784_v58 }
0x32c1   :  { %v1776_v0 = vpop.f32.mrf.mxu2 }
0x32c4   :  { %v2354_v13 = vpop.eup %2353 }
0x32c5   :  { %v1789_v43 = vpack.c.bf16 %v2354_v13, %v2354_v13  ;;  %v2356_v16 = vpop.eup %2355 }
0x32c6   :  { %v2358_v17 = vpop.eup %2357 }
0x32c7   :  { %v1794_v41 = vsel %vm61_vm0, %v1789_v43, 0  ;;  %v1788_v25 = vpack.c.bf16 %v2358_v17, %v2356_v16 }
0x32c8   :  { %1802 = vmatpush.bf16.xpose.msrb.mxu3 %v1794_v41 }
0x32c9   :  { %v1791_v35 = vsel %vm61_vm0, %v1788_v25, 0 }
0x32d0   :  { %1803 = vmatpush.bf16.xpose.msrb.mxu3 %v1791_v35 }
0x32d7   :  { %2165 = vmatmul.msk.bf16.vlgmr.msrb.gmra.mxu3 %vm61_vm0, %v2494_v40 }
0x335a   :  { %v1805_v22 = vpop.f32.mrf.mxu3 }
0x335b   :  { %v1809_v28 = vperm.slane %v1805_v22, 0 }
0x335d   :  { %v1810_v18 = vsel %vm2498_vm4, %v1809_v28, -1e+30 }
0x335e   :  { %v1811_v29 = vsel %vm214_vm5, %v1810_v18, -inf }
0x335f   :  { %1812 = vmax.xlane.f32.xlu0 %v1811_v29 }
0x3362   :  { %v1807_v36 = vpop.f32.mrf.mxu3 }
0x33d2   :  { %v1813_v6 = vpop.xlane.xlu0 %1812 }
0x33d3   :  { %v1814_v39 = vsub.f32 %v1810_v18, %v1813_v6 }
0x33d5   :  { %v1815_v19 = vmul.f32 1.442695, %v1814_v39 }
0x33d7   :  { %2359 = vpow2.f32 %v1815_v19 }
0x33dd   :  { %v2360_v23 = vpop.eup %2359 }
0x33de   :  { %v1817_v33 = vsel %vm214_vm5, %v2360_v23, 0.0 }
0x33df   :  { %1818 = vadd.xlane.f32.xlu2 %v1817_v33 }
0x3452   :  { %v1819_v63 = vpop.xlane.xlu2 %1818 }
0x3453   :  { %2361 = vrcp.f32 %v1819_v63 }
0x3459   :  { %v2362_v40 = vpop.eup %2361 }
0x345a   :  { %v3057_v12 = vmul.f32 %v2362_v40, %v2360_v23 }
0x345c   :  { %v1822_v48 = vpack.c.bf16 %v3057_v12, %v3057_v12 }
0x345e   :  { %2166 = vmatmul.msk.bf16.vlgmr.msra.gmra.mxu0 %vm227_vm8, %v1822_v48 }
0x34db   :  { %v3062_v5 = vpop.f32.mrf.mxu0 }
0x34dc   :  { %v1850_v59 = vsel %vm61_vm0, %v3062_v5, %v3026_v3 }
0x34dd   :  { %v1851_v60 = vpack.c.bf16 %v1850_v59, %v1850_v59 }
0x34df   :  { %2167 = vmatmul.msk.bf16.vlgmr.msrb.gmra.mxu1 %vm283_vm9, %v1851_v60 }
0x34e3   :  { %v1837_v44 = vpop.f32.mrf.mxu0 }
0x355c   :  { %v1866_v61 = vpop.f32.mrf.mxu1 }
0x355d   :  { %v1867_v51 = vadd.f32 %v1866_v61, %v1852_v37 }
0x355f   :  { %1890 = vrot.lane.b32.xlu1 %v1867_v51, %s2390_s9  ;;  %v2168_v1 = vmul.f32 -1.442695, %v1867_v51 }
0x3561   :  { %2363 = vpow2.f32 %v2168_v1 }
0x3564   :  { %v1868_v53 = vpop.f32.mrf.mxu1 }
0x3567   :  { %v2364_v4 = vpop.eup %2363 }
0x3568   :  { %v1873_v24 = vadd.f32 1.0, %v2364_v4 }
0x356a   :  { %2365 = vrcp.f32 %v1873_v24  ;;  %v1885_v13 = vand.u32 2147483648, %v1873_v24  ;;  %vm1879_vm5 = vweird.f32 %v1873_v24  ;;  %v1883_v43 = vand.u32 2147483647, %v1873_v24 }
0x356c   :  { %v1886_v16 = vor.u32 1.1754944e-38, %v1885_v13  ;;  %vm1884_vm2 = vcmp.eq.f32.partialorder %v1883_v43, 8.507059e+37 }
0x3570   :  { %v2366_v56 = vpop.eup %2365 }
0x3571   :  { %v1875_v2 = vmul.f32 %v2366_v56, %v1873_v24  ;;  %vm1880_vm4 = vweird.f32 %v2366_v56 }
0x3572   :  { %vm1881_vm8 = vmor %vm1879_vm5, %vm1880_vm4  ;;  %vm749_vm4 = vcmask 238752   ;;  %vm969_vm5 = vcmask 320752  }
0x3573   :  { %v1876_v9 = vsub.f32 1.0, %v1875_v2 }
0x3575   :  { %v1877_v58 = vmul.f32 %v2366_v56, %v1876_v9 }
0x3577   :  { %v1878_v0 = vadd.f32 %v2366_v56, %v1877_v58 }
0x3579   :  { %v1882_v27 = vsel %vm1881_vm8, %v2366_v56, %v1878_v0  ;;  %vm1189_vm8 = vcmask 402752  }
0x357a   :  { %v1887_v17 = vsel %vm1884_vm2, %v1886_v16, %v1882_v27  ;;  %vm1407_vm2 = vcmask 484752  }
0x357b   :  { %v1900_v18 = vsub.f32 1.0, %v1887_v17  ;;  %v1906_v36 = vmul.f32 %v1887_v17, %v3026_v3 }
0x35d1   :  { %v1891_v41 = vpop.permute.xlu1 %1890 }
0x35d2   :  { %v1893_v25 = vmul.f32 %v1891_v41, %v1887_v17 }
0x35d4   :  { %1895 = vrot.lane.b32.xlu1 %v1893_v25, %s2391_s25 }
0x3646   :  { %v1896_v35 = vpop.permute.xlu1 %1895 }
0x3647   :  { %v1898_v22 = vadd.f32 %v1896_v35, %v1867_v51 }
0x3649   :  { %2367 = vtanh.f32 %v1898_v22 }
0x364f   :  { %v2368_v28 = vpop.eup %2367 }
0x3650   :  { %1902 = vrot.lane.b32.xlu1 %v2368_v28, %s2387_s17 }
0x36c2   :  { %v1903_v29 = vpop.permute.xlu1 %1902 }
0x36c3   :  { %v1905_v6 = vmul.f32 %v1903_v29, %v1900_v18 }
0x36c5   :  { %v1907_v39 = vadd.f32 %v1906_v36, %v1905_v6 }
0x36c7   :  { %1909 = vrot.lane.b32.xlu1 %v1907_v39, %s2387_s17  ;;  %v2386_v39 = vld [vmem:[%s3212_s3 + $0x58] sm:$0xff] }
0x3739   :  { %v1910_v19 = vpop.permute.xlu1 %1909 }
0x373a   :  { %v1912_v23 = vsel %vm61_vm0, %v1910_v19, %v3038_v38  ;;  %2054 = vst.msk [vmem:[%s3216_s4 + $0x6] sm:$0x3] %vm2053_vm3, %v1910_v19  ;;  %vm1628_vm3 = vcmask 566752  }
0x373b   :  { %v1913_v33 = vpack.c.bf16 %v1912_v23, %v1912_v23 }
0x373d   :  { %2169 = vmatmul.msk.bf16.vlgmr.msra.gmra.mxu2 %vm283_vm9, %v1913_v33 }
0x37c0   :  { %v1926_v63 = vpop.f32.mrf.mxu2 }
0x37c1   :  { %v1927_v40 = vadd.f32 %v1926_v63, %v2630_v15 }
0x37c3   :  { %1950 = vrot.lane.b32.xlu0 %v1927_v40, %s2390_s9  ;;  %v2170_v15 = vmul.f32 -1.442695, %v1927_v40 }
0x37c5   :  { %2369 = vpow2.f32 %v2170_v15 }
0x37c8   :  { %v1928_v3 = vpop.f32.mrf.mxu2 }
0x37cb   :  { %428 = vrot.lane.b32.xlu0 %v2636_v54, %s2387_s17  ;;  %v2370_v54 = vpop.eup %2369 }
0x37d3   :  { %650 = vrot.lane.b32.xlu0 %v2695_v34, %s2387_s17  ;;  %v1933_v34 = vadd.f32 1.0, %v2370_v54 }
0x37d5   :  { %2371 = vrcp.f32 %v1933_v34  ;;  %v1945_v48 = vand.u32 2147483648, %v1933_v34  ;;  %vm1939_vm7 = vweird.f32 %v1933_v34 }
0x37d7   :  { %v1946_v60 = vor.u32 1.1754944e-38, %v1945_v48 }
0x37db   :  { %870 = vrot.lane.b32.xlu0 %v2754_v62, %s2387_s17  ;;  %v2372_v62 = vpop.eup %2371 }
0x37dc   :  { %vm1940_vm6 = vweird.f32 %v2372_v62 }
0x37dd   :  { %vm1941_vm10 = vmor %vm1939_vm7, %vm1940_vm6  ;;  %vm2042_vm6 = vcmask 785408  }
0x37e3   :  { %1094 = vrot.lane.b32.xlu0 %v2798_v52, %s2390_s9  ;;  %v1935_v52 = vmul.f32 %v2372_v62, %v1933_v34 }
0x37eb   :  { %1529 = vrot.lane.b32.xlu0 %v2981_v10, %s2387_s17  ;;  %v1936_v10 = vsub.f32 1.0, %v1935_v52 }
0x37f3   :  { %1753 = vrot.lane.b32.xlu0 %v3015_v57, %s2390_s9  ;;  %v1937_v57 = vmul.f32 %v2372_v62, %v1936_v10 }
0x37fb   :  { %1985 = vrot.lane.b32.xlu0 %v2462_v11, %s2391_s25  ;;  %v1938_v11 = vadd.f32 %v2372_v62, %v1937_v57 }
0x37fd   :  { %v1942_v59 = vsel %vm1941_vm10, %v2372_v62, %v1938_v11 }
0x3803   :  { %1994 = vrot.lane.b32.xlu0 %v2476_v20, %s2391_s25  ;;  %v1943_v20 = vand.u32 2147483647, %v1933_v34 }
0x3805   :  { %vm1944_vm11 = vcmp.eq.f32.partialorder %v1943_v20, 8.507059e+37 }
0x3806   :  { %v1947_v37 = vsel %vm1944_vm11, %v1946_v60, %v1942_v59 }
0x3807   :  { %v1966_v29 = vmul.f32 %v1947_v37, %v3038_v38 }
0x380b   :  { %961 = vrot.lane.b32.xlu0 %v2793_v50, %s2392_s2 }
0x3813   :  { %1620 = vrot.lane.b32.xlu0 %v3010_v55, %s2392_s2 }
0x3835   :  { %v1951_v44 = vpop.permute.xlu0 %1950 }
0x3836   :  { %v1953_v61 = vmul.f32 %v1951_v44, %v1947_v37 }
0x3838   :  { %1955 = vrot.lane.b32.xlu1 %v1953_v61, %s2391_s25 }
0x3840   :  { %1987 = vrot.lane.b32.xlu1 %v2452_v7, %s2391_s25  ;;  %v2385_v7 = vld [vmem:[%s3212_s3 + $0x50] sm:$0xff]  ;;  %s2394_s3 = smov 30  }
0x3848   :  { %432 = vrot.lane.b32.xlu1 %v2577_v31, %s2390_s9  ;;  %v429_v31 = vpop.permute.xlu0 %428 }
0x3850   :  { %654 = vrot.lane.b32.xlu1 %v2670_v49, %s2390_s9  ;;  %v651_v49 = vpop.permute.xlu0 %650 }
0x3858   :  { %1090 = vrot.lane.b32.xlu1 %v2823_v30, %s2387_s17  ;;  %v871_v30 = vpop.permute.xlu0 %870 }
0x3860   :  { %1312 = vrot.lane.b32.xlu1 %v2892_v42, %s2390_s9  ;;  %v1095_v42 = vpop.permute.xlu0 %1094 }
0x3868   :  { %1749 = vrot.lane.b32.xlu1 %v3038_v38, %s2387_s17 }
0x3870   :  { %1973 = vrot.lane.b32.xlu1 %v3062_v5, %s2390_s9  ;;  %v1530_v5 = vpop.permute.xlu0 %1529 }
0x3878   :  { %1981 = vrot.lane.b32.xlu1 %v2385_v7, %s2391_s25  ;;  %v1754_v1 = vpop.permute.xlu0 %1753 }
0x3880   :  { %741 = vrot.lane.b32.xlu1 %v2724_v21, %s2392_s2  ;;  %v1986_v56 = vpop.permute.xlu0 %1985 }
0x3888   :  { %1399 = vrot.lane.b32.xlu1 %v2951_v8, %s2392_s2  ;;  %v1995_v63 = vpop.permute.xlu0 %1994 }
0x3890   :  { %247 = vrot.lane.b32.xlu1 %v2536_v14, %s2392_s2 }
0x38aa   :  { %v1956_v51 = vpop.permute.xlu1 %1955 }
0x38ab   :  { %v1958_v53 = vadd.f32 %v1956_v51, %v1927_v40  ;;  %v962_v40 = vpop.permute.xlu0 %961 }
0x38ac   :  { %v964_v3 = vadd.f32 %v962_v40, %v2793_v50 }
0x38ad   :  { %2373 = vtanh.f32 %v1958_v53 }
0x38b2   :  { %v1988_v4 = vpop.permute.xlu1 %1987 }
0x38b3   :  { %v2374_v24 = vpop.eup %2373  ;;  %2004 = vmatpush.bf16.msra.mxu3 %v1988_v4  ;;  %v1621_v60 = vpop.permute.xlu0 %1620 }
0x38b4   :  { %1962 = vrot.lane.b32.xlu2 %v2374_v24, %s2387_s17  ;;  %v1623_v53 = vadd.f32 %v1621_v60, %v3010_v55 }
0x38b7   :  { %2005 = vmatpush.bf16.msra.mxu3 %v1986_v56 }
0x38ba   :  { %v433_v2 = vpop.permute.xlu1 %432 }
0x38bb   :  { %v435_v9 = vsel %vm61_vm0, %v429_v31, %v433_v2 }
0x38bc   :  { %437 = vst.msk [vmem:[#allocation2] sm:$0x3] %vm436_vm12, %v435_v9  ;;  %874 = vrot.lane.b32.xlu2 %v2729_v26, %s2390_s9 }
0x38c2   :  { %v655_v58 = vpop.permute.xlu1 %654 }
0x38c3   :  { %v657_v0 = vsel %vm61_vm0, %v651_v49, %v655_v58 }
0x38c4   :  { %658 = vst.msk [vmem:[#allocation2 + $0x2] sm:$0x3] %vm436_vm12, %v657_v0  ;;  %1308 = vrot.lane.b32.xlu2 %v2917_v45, %s2387_s17 }
0x38ca   :  { %v1091_v13 = vpop.permute.xlu1 %1090 }
0x38cb   :  { %v1097_v43 = vsel %vm61_vm0, %v1091_v13, %v1095_v42 }
0x38cc   :  { %1098 = vst.msk [vmem:[#allocation2 + $0x6] sm:$0x3] %vm436_vm12, %v1097_v43  ;;  %1533 = vrot.lane.b32.xlu2 %v2956_v47, %s2390_s9  ;;  %v1960_v47 = vsub.f32 1.0, %v1947_v37 }
0x38d2   :  { %v1313_v27 = vpop.permute.xlu1 %1312 }
0x38da   :  { %v1750_v16 = vpop.permute.xlu1 %1749 }
0x38db   :  { %v1756_v26 = vsel %vm61_vm0, %v1750_v16, %v1754_v1 }
0x38dc   :  { %1757 = vst.msk [vmem:[#allocation2 + $0xc] sm:$0x3] %vm436_vm12, %v1756_v26 }
0x38e2   :  { %v1974_v41 = vpop.permute.xlu1 %1973 }
0x38ea   :  { %v1982_v17 = vpop.permute.xlu1 %1981 }
0x38f2   :  { %v742_v25 = vpop.permute.xlu1 %741 }
0x38f3   :  { %v744_v35 = vadd.f32 %v742_v25, %v2724_v21 }
0x38f5   :  { %746 = vrot.lane.b32.xlu1 %v744_v35, %s2393_s6 }
0x38fa   :  { %v1400_v45 = vpop.permute.xlu1 %1399 }
0x38fb   :  { %v1402_v48 = vadd.f32 %v1400_v45, %v2951_v8 }
0x3902   :  { %v248_v22 = vpop.permute.xlu1 %247 }
0x3903   :  { %v250_v28 = vadd.f32 %v248_v22, %v2536_v14 }
0x3905   :  { %252 = vst.msk [vmem:[%s3216_s4 + $0x4] sm:$0x3] %vm251_vm13, %v250_v28 }
0x390e   :  { %v1963_v18 = vpop.permute.xlu2 %1962 }
0x390f   :  { %v1965_v36 = vmul.f32 %v1963_v18, %v1960_v47 }
0x3911   :  { %v1967_v6 = vadd.f32 %v1966_v29, %v1965_v36 }
0x3913   :  { %2056 = vst.msk [vmem:[%s3216_s4 + $0x6] sm:$0x3] %vm2055_vm14, %v1967_v6  ;;  %1969 = vrot.lane.b32.xlu2 %v1967_v6, %s2387_s17 }
0x3916   :  { %v875_v21 = vpop.permute.xlu2 %874 }
0x3917   :  { %v877_v14 = vsel %vm61_vm0, %v871_v30, %v875_v21 }
0x3918   :  { %878 = vst.msk [vmem:[#allocation2 + $0x4] sm:$0x3] %vm436_vm12, %v877_v14 }
0x391b   :  { %1983 = vrot.lane.b32.xlu2 %v2386_v39, %s2391_s25 }
0x391e   :  { %v1309_v38 = vpop.permute.xlu2 %1308 }
0x391f   :  { %v1315_v19 = vsel %vm61_vm0, %v1309_v38, %v1313_v27  ;;  %v1978_v52 = vld [vmem:[#allocation2] sm:$0xff] }
0x3920   :  { %1316 = vst.msk [vmem:[#allocation2 + $0x8] sm:$0x3] %vm436_vm12, %v1315_v19 }
0x3923   :  { %520 = vrot.lane.b32.xlu2 %v2665_v46, %s2392_s2 }
0x3926   :  { %v1534_v23 = vpop.permute.xlu2 %1533 }
0x3927   :  { %v1536_v33 = vsel %vm61_vm0, %v1530_v5, %v1534_v23 }
0x3928   :  { %1537 = vst.msk [vmem:[#allocation2 + $0xa] sm:$0x3] %vm436_vm12, %v1536_v33 }
0x392b   :  { %1181 = vrot.lane.b32.xlu2 %v2887_v32, %s2392_s2 }
0x3933   :  { %1840 = vrot.lane.b32.xlu2 %v3057_v12, %s2392_s2 }
0x393b   :  { %966 = vrot.lane.b32.xlu2 %v964_v3, %s2394_s3 }
0x3967   :  { %v747_v61 = vpop.permute.xlu1 %746 }
0x396d   :  { %v1970_v15 = vpop.permute.xlu2 %1969 }
0x396e   :  { %v1976_v54 = vsel %vm61_vm0, %v1970_v15, %v1974_v41 }
0x396f   :  { %1977 = vst.msk [vmem:[#allocation2 + $0xe] sm:$0x3] %vm436_vm12, %v1976_v54 }
0x3975   :  { %v1984_v34 = vpop.permute.xlu2 %1983 }
0x3976   :  { %2006 = vmatpush.bf16.msra.mxu3 %v1984_v34  ;;  %v1979_v62 = vld [vmem:[#allocation2 + $0x8] sm:$0xff] }
0x3977   :  { %v1980_v10 = vpack.c.bf16 %v1979_v62, %v1978_v52 }
0x397a   :  { %2007 = vmatpush.bf16.msra.mxu3 %v1982_v17 }
0x397d   :  { %v521_v57 = vpop.permute.xlu2 %520  ;;  %2171 = vmatmul.msk.bf16.vlgmr.msra.gmra.mxu3 %vm283_vm9, %v1980_v10 }
0x397e   :  { %v523_v11 = vadd.f32 %v521_v57, %v2665_v46 }
0x3980   :  { %525 = vrot.lane.b32.xlu0 %v523_v11, %s2395_s13 }
0x3985   :  { %v1182_v50 = vpop.permute.xlu2 %1181 }
0x3986   :  { %v1184_v20 = vadd.f32 %v1182_v50, %v2887_v32 }
0x3988   :  { %1186 = vrot.lane.b32.xlu2 %v1184_v20, %s2396_s14  ;;  %1404 = vrot.lane.b32.xlu0 %v1402_v48, %s2397_s15 }
0x398d   :  { %v1841_v59 = vpop.permute.xlu2 %1840 }
0x398e   :  { %v1843_v24 = vadd.f32 %v1841_v59, %v3057_v12 }
0x3995   :  { %v967_v44 = vpop.permute.xlu2 %966 }
0x39e2   :  { %v1187_v46 = vpop.permute.xlu2 %1186 }
0x39f2   :  { %v526_v37 = vpop.permute.xlu0 %525 }
0x39f3   :  { %529 = vst.msk [vmem:[%s3216_s4 + $0x4] sm:$0x3] %vm528_vm15, %v526_v37 }
0x39f4   :  { %750 = vst.msk [vmem:[%s3216_s4 + $0x4] sm:$0x3] %vm749_vm4, %v747_v61 }
0x39f5   :  { %970 = vst.msk [vmem:[%s3216_s4 + $0x4] sm:$0x3] %vm969_vm5, %v967_v44 }
0x39f6   :  { %1190 = vst.msk [vmem:[%s3216_s4 + $0x4] sm:$0x3] %vm1189_vm8, %v1187_v46 }
0x39fa   :  { %v1405_v32 = vpop.permute.xlu0 %1404 }
0x39fb   :  { %1408 = vst.msk [vmem:[%s3216_s4 + $0x4] sm:$0x3] %vm1407_vm2, %v1405_v32 }
0x3a00   :  { %v2009_v8 = vpop.f32.mrf.mxu3 }
0x3a01   :  { %v2010_v7 = vadd.f32 %v2009_v8, %v1995_v63 }
0x3a03   :  { %v2015_v31 = vrot.slane %v2010_v7, 2  ;;  %v2019_v5 = vrot.slane %v2010_v7, 4  ;;  %v2023_v1 = vrot.slane %v2010_v7, 6 }
0x3a05   :  { %2016 = vrot.lane.b32.xlu1 %v2015_v31, %s2390_s9 }
0x3a08   :  { %v2011_v49 = vpop.f32.mrf.mxu3 }
0x3a09   :  { %v2012_v30 = vadd.f32 %v2011_v49, %v1995_v63 }
0x3a0b   :  { %v2028_v42 = vrot.slane %v2012_v30, 2  ;;  %v2032_v51 = vrot.slane %v2012_v30, 4  ;;  %v2036_v4 = vrot.slane %v2012_v30, 6 }
0x3a0d   :  { %2029 = vrot.lane.b32.xlu2 %v2028_v42, %s2390_s9  ;;  %2020 = vrot.lane.b32.xlu1 %v2019_v5, %s2391_s25 }
0x3a0e   :  { %2033 = vrot.lane.b32.xlu0 %v2032_v51, %s2391_s25 }
0x3a15   :  { %2024 = vrot.lane.b32.xlu2 %v2023_v1, %s2387_s17  ;;  %1625 = vrot.lane.b32.xlu1 %v1623_v53, %s2398_s27 }
0x3a16   :  { %2037 = vrot.lane.b32.xlu0 %v2036_v4, %s2387_s17 }
0x3a1e   :  { %1845 = vrot.lane.b32.xlu0 %v1843_v24, %s2399_s28 }
0x3a67   :  { %v2030_v9 = vpop.permute.xlu2 %2029 }
0x3a68   :  { %v2044_v0 = vsel %vm61_vm0, %v2012_v30, %v2030_v9 }
0x3a6f   :  { %v2025_v26 = vpop.permute.xlu2 %2024 }
0x3a77   :  { %v2017_v56 = vpop.permute.xlu1 %2016 }
0x3a78   :  { %v2040_v55 = vsel %vm61_vm0, %v2010_v7, %v2017_v56  ;;  %vm1848_vm0 = vcmask 648752  }
0x3a7f   :  { %v2021_v2 = vpop.permute.xlu1 %2020 }
0x3a80   :  { %v2034_v58 = vpop.permute.xlu0 %2033  ;;  %v2041_v27 = vsel %vm283_vm9, %v2040_v55, %v2021_v2 }
0x3a81   :  { %v2045_v43 = vsel %vm283_vm9, %v2044_v0, %v2034_v58  ;;  %v2043_v17 = vsel %vm2042_vm6, %v2041_v27, %v2025_v26 }
0x3a87   :  { %v1626_v13 = vpop.permute.xlu1 %1625 }
0x3a88   :  { %v2038_v16 = vpop.permute.xlu0 %2037  ;;  %1629 = vst.msk [vmem:[%s3216_s4 + $0x4] sm:$0x3] %vm1628_vm3, %v1626_v13 }
0x3a89   :  { %v2046_v12 = vsel %vm2042_vm6, %v2045_v43, %v2038_v16 }
0x3a8a   :  { %v2049_v41 = vrot.slane %v2046_v12, 6 }
0x3a8c   :  { %v2050_v25 = vsel %vm177_vm1, %v2043_v17, %v2049_v41 }
0x3a8d   :  { %2052 = vst [vmem:[%s3216_s4] sm:$0xf] %v2050_v25 }
0x3a90   :  { %v1846_v35 = vpop.permute.xlu0 %1845 }
0x3a91   :  { %1849 = vst.msk [vmem:[%s3216_s4 + $0x4] sm:$0x3] %vm1848_vm0, %v1846_v35 }

</bundles_post_ra>
